<compile_context>
chip_gen: v6e
topology: v6e:2x2x1
jax: 0.10.0
libtpu: 0.0.40
codegen_flags: <defaults>
</compile_context>

<pallas_src>
import jax
import jax.numpy as jnp
from jax.experimental import pallas as pl
from jax.experimental.pallas import tpu as pltpu

_VMEM_LIMIT = 32 * 1024 * 1024      # explicit scoped-VMEM budget (v7x-safe)
_FUSED_BUDGET = 20 * 1024 * 1024    # ceiling for the single-call whole-net path


# --------------------------------------------------------------------------
# Kernels
# --------------------------------------------------------------------------
def _gcn2_fused_kernel(x_ref, adj_ref, w1_ref, b1_ref, a1_ref,
                       w2_ref, b2_ref, a2_ref, o_ref):
    """Whole 2-layer GCN with every operand VMEM-resident (single grid step)."""
    # ---- layer 1: h = prelu(adj @ (x @ W1) + b1) ----
    p1 = jnp.dot(x_ref[...], w1_ref[...], preferred_element_type=jnp.float32)
    h = jnp.dot(adj_ref[...], p1.astype(jnp.bfloat16),
                preferred_element_type=jnp.float32) + b1_ref[...]
    h = jnp.where(h > 0, h, a1_ref[...] * h)
    # TODO(synk): F.dropout(p=0.5) is the identity in eval mode; nothing to do.
    # ---- layer 2: out = prelu(adj @ (h @ W2) + b2) ----
    p2 = jnp.dot(h.astype(jnp.bfloat16), w2_ref[...],
                 preferred_element_type=jnp.float32)
    o = jnp.dot(adj_ref[...], p2.astype(jnp.bfloat16),
                preferred_element_type=jnp.float32) + b2_ref[...]
    o_ref[...] = jnp.where(o > 0, o, a2_ref[...] * o).astype(o_ref.dtype)


def _gcn_layer_kernel(x_ref, w_ref, b_ref, a_ref, adj_ref, o_ref):
    """One GCN layer, fused: out_tile = prelu(adj_tile @ (x @ W) + b).

    x / W / b / a are grid-invariant blocks (DMA'd once); only the adj
    row-tile streams.  Recomputing the small projection per row-tile is pure
    MXU work hidden under the HBM-bound adj stream and keeps the row axis
    megacore-shardable on v7x (no cross-iteration scratch dependence).
    """
    p = jnp.dot(x_ref[...], w_ref[...], preferred_element_type=jnp.float32)
    h = jnp.dot(adj_ref[...], p.astype(jnp.bfloat16),
                preferred_element_type=jnp.float32) + b_ref[...]
    o_ref[...] = jnp.where(h > 0, h, a_ref[...] * h).astype(o_ref.dtype)


# --------------------------------------------------------------------------
# Wrappers
# --------------------------------------------------------------------------
def _fused_vmem_bytes(n, din, dhid, dout):
    """Rough VMEM estimate for the single-call path (double-buffered windows
    + f32 working intermediates)."""
    bf, f32 = 2, 4
    inputs = (n * n + n * din + din * dhid + dhid * dout) * bf \
        + 2 * (dhid + dout) * f32
    out = n * dout * f32
    interm = (2 * n * dhid + n * dout) * f32
    return 2 * (inputs + out) + interm


def _pick_row_tile(n_rows, n_cols, *, itemsize=2, target=256,
                   adj_block_budget=8 * 1024 * 1024):
    """Largest multiple-of-8 divisor of n_rows that is <= target, capped so a
    double-buffered (tm, n_cols) adj block stays within adj_block_budget and
    preferring >= 2 row tiles (keeps the axis shardable on v7x megacore)."""
    cap = max(8, adj_block_budget // (2 * n_cols * itemsize))
    tgt = min(target, cap)
    if n_rows >= 16:
        tgt = min(tgt, n_rows // 2)
    if n_rows <= tgt:
        return n_rows
    for t in range(int(tgt), 7, -1):
        if n_rows % t == 0 and t % 8 == 0:
            return t
    return n_rows   # last resort: single full-extent row tile (always legal)


def _gcn2_fused(x, adj, w1, b1, a1, w2, b2, a2, *, out_dtype=jnp.float32):
    n = adj.shape[0]
    dout = w2.shape[1]

    def full(shape):
        return pl.BlockSpec(shape, lambda i: (0,) * len(shape))

    return pl.pallas_call(
        _gcn2_fused_kernel,
        out_shape=jax.ShapeDtypeStruct((n, dout), out_dtype),
        grid_spec=pltpu.PrefetchScalarGridSpec(
            num_scalar_prefetch=0,
            grid=(1,),
            in_specs=[full(x.shape), full(adj.shape),
                      full(w1.shape), full(b1.shape), full(a1.shape),
                      full(w2.shape), full(b2.shape), full(a2.shape)],
            out_specs=full((n, dout)),
        ),
        compiler_params=pltpu.CompilerParams(
            dimension_semantics=("arbitrary",),
            vmem_limit_bytes=_VMEM_LIMIT,
        ),
    )(x, adj, w1, b1, a1, w2, b2, a2)


def _gcn_layer(x, adj, w, b, a, *, out_dtype):
    n_rows, n_cols = adj.shape          # square adjacency: n_cols == num nodes
    din = x.shape[1]
    dout = w.shape[1]
    tm = _pick_row_tile(n_rows, n_cols, itemsize=adj.dtype.itemsize)
    grid = (n_rows // tm,)

    return pl.pallas_call(
        _gcn_layer_kernel,
        out_shape=jax.ShapeDtypeStruct((n_rows, dout), out_dtype),
        grid_spec=pltpu.PrefetchScalarGridSpec(
            num_scalar_prefetch=0,
            grid=grid,
            in_specs=[
                pl.BlockSpec((n_cols, din), lambda i: (0, 0)),   # x (invariant)
                pl.BlockSpec((din, dout), lambda i: (0, 0)),     # W (invariant)
                pl.BlockSpec((1, dout), lambda i: (0, 0)),       # bias
                pl.BlockSpec((1, dout), lambda i: (0, 0)),       # PReLU slope
                pl.BlockSpec((tm, n_cols), lambda i: (i, 0)),    # adj row-tile
            ],
            out_specs=pl.BlockSpec((tm, dout), lambda i: (i, 0)),
        ),
        compiler_params=pltpu.CompilerParams(
            dimension_semantics=("parallel",),
            vmem_limit_bytes=_VMEM_LIMIT,
        ),
    )(x, w, b, a, adj)


def gcn_forward(x, adj, w1, b1, a1, w2, b2, a2, *, force_tiled=False):
    """prelu2(adj @ (prelu1(adj @ (x @ W1) + b1) @ W2) + b2)."""
    n, din = x.shape
    dhid = w1.shape[1]
    dout = w2.shape[1]

    # bf16 MXU operands; adj should already arrive bf16 from preprocessing
    # (then this cast is a no-op).  Accumulation / epilogue stay f32 in-kernel.
    x_bf = x.astype(jnp.bfloat16)
    adj_bf = adj if adj.dtype == jnp.bfloat16 else adj.astype(jnp.bfloat16)
    w1_bf = w1.astype(jnp.bfloat16)
    w2_bf = w2.astype(jnp.bfloat16)

    if not force_tiled and _fused_vmem_bytes(n, din, dhid, dout) <= _FUSED_BUDGET:
        # Everything fits in VMEM: whole network in one pallas_call.
        return _gcn2_fused(x_bf, adj_bf, w1_bf, b1, a1, w2_bf, b2, a2)

    # General path: one fused (projection + aggregation + PReLU) call per layer.
    # Layer 1 emits bf16 so layer 2 consumes it directly (no wrapper cast).
    h = _gcn_layer(x_bf, adj_bf, w1_bf, b1, a1, out_dtype=jnp.bfloat16)
    # TODO(synk): F.dropout(p=0.5, training=True) is identity in eval mode.
    return _gcn_layer(h, adj_bf, w2_bf, b2, a2, out_dtype=jnp.float32)


def gcn_reference(x, adj, w1, b1, a1, w2, b2, a2):
    h = adj @ (x @ w1) + b1
    h = jnp.where(h > 0, h, a1 * h)
    o = adj @ (h @ w2) + b2
    return jnp.where(o > 0, o, a2 * o)


# --------------------------------------------------------------------------
# Self-test
# --------------------------------------------------------------------------
if __name__ == "__main__":
    key = jax.random.PRNGKey(0)
    kx, kadj, kw1, kw2, kb1, kb2 = jax.random.split(key, 6)

    # Lane-dense sizes: nodes and all feature dims are multiples of 128.
    N, nfeat, nhid, nout = 512, 128, 128, 128

    x = jax.random.normal(kx, (N, nfeat), dtype=jnp.float32)

    # Symmetric, self-looped, row-normalized adjacency.
    adj_raw = jax.random.uniform(kadj, (N, N), dtype=jnp.float32)
    adj = (adj_raw > 0.9).astype(jnp.float32)
    adj = jnp.minimum(adj + adj.T + jnp.eye(N, dtype=jnp.float32), 1.0)
    deg = jnp.sum(adj, axis=1, keepdims=True)
    adj_f32 = adj / deg                          # f32 copy for the reference
    adj_bf16 = adj_f32.astype(jnp.bfloat16)      # cast folded into preprocessing

    # Deterministic parameters (glorot-ish weights, small biases,
    # PyTorch PReLU default slope 0.25).
    w1 = jax.random.normal(kw1, (nfeat, nhid), dtype=jnp.float32) / jnp.sqrt(nfeat)
    b1 = jax.random.uniform(kb1, (1, nhid), dtype=jnp.float32,
                            minval=-0.1, maxval=0.1)
    a1 = jnp.full((1, nhid), 0.25, dtype=jnp.float32)
    w2 = jax.random.normal(kw2, (nhid, nout), dtype=jnp.float32) / jnp.sqrt(nhid)
    b2 = jax.random.uniform(kb2, (1, nout), dtype=jnp.float32,
                            minval=-0.1, maxval=0.1)
    a2 = jnp.full((1, nout), 0.25, dtype=jnp.float32)

    ref = gcn_reference(x, adj_f32, w1, b1, a1, w2, b2, a2)

    # Fully fused single-call path (auto-selected at this size).
    out = jax.block_until_ready(
        gcn_forward(x, adj_bf16, w1, b1, a1, w2, b2, a2))
    assert out.shape == (N, nout)
    assert jnp.allclose(out, ref, atol=3e-2, rtol=3e-2), "fused path mismatch"

    # General per-layer row-tiled path (exercised explicitly for coverage).
    out_tiled = jax.block_until_ready(
        gcn_forward(x, adj_bf16, w1, b1, a1, w2, b2, a2, force_tiled=True))
    assert jnp.allclose(out_tiled, ref, atol=3e-2, rtol=3e-2), \
        "tiled path mismatch"

    print("KERNEL_OK")
</pallas_src>

<mosaic_0001>
module attributes {stable_mosaic.version = 11 : i64} {
  func.func @_gcn2_fused_kernel(%arg0: i32, %arg1: memref<512x128xbf16, #tpu.memory_space<vmem>>, %arg2: memref<512x512xbf16, #tpu.memory_space<vmem>>, %arg3: memref<128x128xbf16, #tpu.memory_space<vmem>>, %arg4: memref<1x128xf32, #tpu.memory_space<vmem>>, %arg5: memref<1x128xf32, #tpu.memory_space<vmem>>, %arg6: memref<128x128xbf16, #tpu.memory_space<vmem>>, %arg7: memref<1x128xf32, #tpu.memory_space<vmem>>, %arg8: memref<1x128xf32, #tpu.memory_space<vmem>>, %arg9: memref<512x128xf32, #tpu.memory_space<vmem>>) attributes {dimension_semantics = [#tpu.dimension_semantics<arbitrary>], iteration_bounds = array<i64: 1>, scalar_prefetch = 0 : i64, scratch_operands = 0 : i64, tpu.core_type = #tpu.core_type<tc>, window_params = [{pipeline_mode = #tpu.pipeline_mode<synchronous>, transform_indices = @transform_0, window_bounds = array<i64: 512, 128>}, {pipeline_mode = #tpu.pipeline_mode<synchronous>, transform_indices = @transform_1, window_bounds = array<i64: 512, 512>}, {pipeline_mode = #tpu.pipeline_mode<synchronous>, transform_indices = @transform_2, window_bounds = array<i64: 128, 128>}, {pipeline_mode = #tpu.pipeline_mode<synchronous>, transform_indices = @transform_3, window_bounds = array<i64: 1, 128>}, {pipeline_mode = #tpu.pipeline_mode<synchronous>, transform_indices = @transform_4, window_bounds = array<i64: 1, 128>}, {pipeline_mode = #tpu.pipeline_mode<synchronous>, transform_indices = @transform_5, window_bounds = array<i64: 128, 128>}, {pipeline_mode = #tpu.pipeline_mode<synchronous>, transform_indices = @transform_6, window_bounds = array<i64: 1, 128>}, {pipeline_mode = #tpu.pipeline_mode<synchronous>, transform_indices = @transform_7, window_bounds = array<i64: 1, 128>}, {pipeline_mode = #tpu.pipeline_mode<synchronous>, transform_indices = @transform_8, window_bounds = array<i64: 512, 128>}]} {
    %c0 = arith.constant 0 : index
    %c0_0 = arith.constant 0 : index
    %0 = vector.load %arg1[%c0, %c0_0] : memref<512x128xbf16, #tpu.memory_space<vmem>>, vector<512x128xbf16>
    %c0_1 = arith.constant 0 : index
    %c0_2 = arith.constant 0 : index
    %1 = vector.load %arg3[%c0_1, %c0_2] : memref<128x128xbf16, #tpu.memory_space<vmem>>, vector<128x128xbf16>
    %cst = arith.constant dense<0.000000e+00> : vector<512x128xf32>
    %2 = tpu.matmul %0, %1, %cst {dimension_numbers = #tpu.dot_dimension_numbers<[1], [0], [0], [1], [0, 0, 1, 1], [], []>} : vector<512x128xbf16>, vector<128x128xbf16>, vector<512x128xf32> -> vector<512x128xf32>
    %c0_3 = arith.constant 0 : index
    %c0_4 = arith.constant 0 : index
    %3 = vector.load %arg2[%c0_3, %c0_4] : memref<512x512xbf16, #tpu.memory_space<vmem>>, vector<512x512xbf16>
    %4 = arith.truncf %2 : vector<512x128xf32> to vector<512x128xbf16>
    %cst_5 = arith.constant dense<0.000000e+00> : vector<512x128xf32>
    %5 = tpu.matmul %3, %4, %cst_5 {dimension_numbers = #tpu.dot_dimension_numbers<[1], [0], [0], [1], [0, 0, 1, 1], [], []>} : vector<512x512xbf16>, vector<512x128xbf16>, vector<512x128xf32> -> vector<512x128xf32>
    %c0_6 = arith.constant 0 : index
    %c0_7 = arith.constant 0 : index
    %6 = vector.load %arg4[%c0_6, %c0_7] : memref<1x128xf32, #tpu.memory_space<vmem>>, vector<1x128xf32>
    %7 = vector.broadcast %6 : vector<1x128xf32> to vector<512x128xf32>
    %8 = arith.addf %5, %7 : vector<512x128xf32>
    %cst_8 = arith.constant 0.000000e+00 : f32
    %9 = vector.broadcast %cst_8 : f32 to vector<512x128xf32>
    %10 = arith.cmpf ogt, %8, %9 : vector<512x128xf32>
    %c0_9 = arith.constant 0 : index
    %c0_10 = arith.constant 0 : index
    %11 = vector.load %arg5[%c0_9, %c0_10] : memref<1x128xf32, #tpu.memory_space<vmem>>, vector<1x128xf32>
    %12 = vector.broadcast %11 : vector<1x128xf32> to vector<512x128xf32>
    %13 = arith.mulf %12, %8 : vector<512x128xf32>
    %14 = arith.select %10, %8, %13 : vector<512x128xi1>, vector<512x128xf32>
    %15 = arith.truncf %14 : vector<512x128xf32> to vector<512x128xbf16>
    %c0_11 = arith.constant 0 : index
    %c0_12 = arith.constant 0 : index
    %16 = vector.load %arg6[%c0_11, %c0_12] : memref<128x128xbf16, #tpu.memory_space<vmem>>, vector<128x128xbf16>
    %cst_13 = arith.constant dense<0.000000e+00> : vector<512x128xf32>
    %17 = tpu.matmul %15, %16, %cst_13 {dimension_numbers = #tpu.dot_dimension_numbers<[1], [0], [0], [1], [0, 0, 1, 1], [], []>} : vector<512x128xbf16>, vector<128x128xbf16>, vector<512x128xf32> -> vector<512x128xf32>
    %c0_14 = arith.constant 0 : index
    %c0_15 = arith.constant 0 : index
    %18 = vector.load %arg2[%c0_14, %c0_15] : memref<512x512xbf16, #tpu.memory_space<vmem>>, vector<512x512xbf16>
    %19 = arith.truncf %17 : vector<512x128xf32> to vector<512x128xbf16>
    %cst_16 = arith.constant dense<0.000000e+00> : vector<512x128xf32>
    %20 = tpu.matmul %18, %19, %cst_16 {dimension_numbers = #tpu.dot_dimension_numbers<[1], [0], [0], [1], [0, 0, 1, 1], [], []>} : vector<512x512xbf16>, vector<512x128xbf16>, vector<512x128xf32> -> vector<512x128xf32>
    %c0_17 = arith.constant 0 : index
    %c0_18 = arith.constant 0 : index
    %21 = vector.load %arg7[%c0_17, %c0_18] : memref<1x128xf32, #tpu.memory_space<vmem>>, vector<1x128xf32>
    %22 = vector.broadcast %21 : vector<1x128xf32> to vector<512x128xf32>
    %23 = arith.addf %20, %22 : vector<512x128xf32>
    %cst_19 = arith.constant 0.000000e+00 : f32
    %24 = vector.broadcast %cst_19 : f32 to vector<512x128xf32>
    %25 = arith.cmpf ogt, %23, %24 : vector<512x128xf32>
    %c0_20 = arith.constant 0 : index
    %c0_21 = arith.constant 0 : index
    %26 = vector.load %arg8[%c0_20, %c0_21] : memref<1x128xf32, #tpu.memory_space<vmem>>, vector<1x128xf32>
    %27 = vector.broadcast %26 : vector<1x128xf32> to vector<512x128xf32>
    %28 = arith.mulf %27, %23 : vector<512x128xf32>
    %29 = arith.select %25, %23, %28 : vector<512x128xi1>, vector<512x128xf32>
    %c0_22 = arith.constant 0 : index
    %c0_23 = arith.constant 0 : index
    %30 = vector.load %arg9[%c0_22, %c0_23] : memref<512x128xf32, #tpu.memory_space<vmem>>, vector<512x128xf32>
    tpu.vector_store %arg9[%c0_22, %c0_23], %29 {strides = array<i32>} : memref<512x128xf32, #tpu.memory_space<vmem>>, vector<512x128xf32>,
    return
  }
  func.func @transform_0(%arg0: i32) -> (i32, i32) {
    %c0_i32 = arith.constant 0 : i32
    %c0_i32_0 = arith.constant 0 : i32
    %c0_i32_1 = arith.constant 0 : i32
    return %c0_i32, %c0_i32_0 : i32, i32
  }
  func.func @transform_1(%arg0: i32) -> (i32, i32) {
    %c0_i32 = arith.constant 0 : i32
    %c0_i32_0 = arith.constant 0 : i32
    %c0_i32_1 = arith.constant 0 : i32
    return %c0_i32, %c0_i32_0 : i32, i32
  }
  func.func @transform_2(%arg0: i32) -> (i32, i32) {
    %c0_i32 = arith.constant 0 : i32
    %c0_i32_0 = arith.constant 0 : i32
    %c0_i32_1 = arith.constant 0 : i32
    return %c0_i32, %c0_i32_0 : i32, i32
  }
  func.func @transform_3(%arg0: i32) -> (i32, i32) {
    %c0_i32 = arith.constant 0 : i32
    %c0_i32_0 = arith.constant 0 : i32
    %c0_i32_1 = arith.constant 0 : i32
    return %c0_i32, %c0_i32_0 : i32, i32
  }
  func.func @transform_4(%arg0: i32) -> (i32, i32) {
    %c0_i32 = arith.constant 0 : i32
    %c0_i32_0 = arith.constant 0 : i32
    %c0_i32_1 = arith.constant 0 : i32
    return %c0_i32, %c0_i32_0 : i32, i32
  }
  func.func @transform_5(%arg0: i32) -> (i32, i32) {
    %c0_i32 = arith.constant 0 : i32
    %c0_i32_0 = arith.constant 0 : i32
    %c0_i32_1 = arith.constant 0 : i32
    return %c0_i32, %c0_i32_0 : i32, i32
  }
  func.func @transform_6(%arg0: i32) -> (i32, i32) {
    %c0_i32 = arith.constant 0 : i32
    %c0_i32_0 = arith.constant 0 : i32
    %c0_i32_1 = arith.constant 0 : i32
    return %c0_i32, %c0_i32_0 : i32, i32
  }
  func.func @transform_7(%arg0: i32) -> (i32, i32) {
    %c0_i32 = arith.constant 0 : i32
    %c0_i32_0 = arith.constant 0 : i32
    %c0_i32_1 = arith.constant 0 : i32
    return %c0_i32, %c0_i32_0 : i32, i32
  }
  func.func @transform_8(%arg0: i32) -> (i32, i32) {
    %c0_i32 = arith.constant 0 : i32
    %c0_i32_0 = arith.constant 0 : i32
    %c0_i32_1 = arith.constant 0 : i32
    return %c0_i32, %c0_i32_0 : i32, i32
  }
}

</mosaic_0001>

<bundles_post_ra>
// kernel: tpu_custom_call.1
= control target key start
LH: loop header
LB: loop body
LE: loop exit
PB: predicated region body
PF: predicated region fallthrough
CT: control target
= control target key end

     0   :  { %13 = vsyncpa [#allocation3], 0  ;;  %s5420_s0 = inlined_call_operand.hbm [shape: bf16[512,128], index: 0, kind: input, shape index: {}]   ;;  %s5421_s1 = inlined_call_operand.hbm [shape: bf16[512,512], index: 1, kind: input, shape index: {}]   ;;  %s5422_s2 = inlined_call_operand.hbm [shape: bf16[128,128], index: 2, kind: input, shape index: {}]   ;;  %s5423_s3 = inlined_call_operand.vmem [shape: f32[1,128], index: 3, kind: input, shape index: {}]   ;;  %s5424_s4 = inlined_call_operand.vmem [shape: f32[1,128], index: 4, kind: input, shape index: {}]   ;;  %s5425_s5 = inlined_call_operand.hbm [shape: bf16[128,128], index: 5, kind: input, shape index: {}]   ;;  %s5426_s6 = inlined_call_operand.vmem [shape: f32[1,128], index: 6, kind: input, shape index: {}]   ;;  %s5427_s7 = inlined_call_operand.vmem [shape: f32[1,128], index: 7, kind: input, shape index: {}]   ;;  %s5428_s8 = inlined_call_operand.hbm [shape: f32[512,128], index: 8, kind: output, shape index: {}]  }
   0x1   :  { %14 = vsyncpa [#allocation6], 0 }
   0x2   :  { %15 = vsyncpa [#allocation9], 0 }
   0x3   :  { %16 = vsyncpa [#allocation4], 0  ;;  %s4507_s27 = smov [#allocation5]  }
   0x4   :  { %s34_s28 = sshll.u32 %s4507_s27, 4  ;;  %s35_s28 = int_to_ptr.vmem [resolvable:$true] %s34_s28 }
   0x5   :  { %s4407_s29 = scalar_lea.vmem %s35_s28, 16384  ;;  %p4412_p1 = scmp.lt.s32.totalorder %s35_s28, %s35_s28 }
   0x6   :  { %p4408_p0 = scmp.ne.s32.totalorder %s35_s28, %s4407_s29  ;;  %p4413_p2 = scmp.lt.s32.totalorder %s4407_s29, %s4407_s29 }
   0x8   :  { %p4414_p3 = por %p4413_p2, %p4412_p1 }
   0xa   :  { %p4415_p4 = pnand %p4414_p3, %p4408_p0 }
   0xc   :  { %4418 = shalt.err (!%p4415_p4)
}
   0xd   :  { %s4508_s30 = smov 256   ;;  %s4509_s9 = smov 16  }
   0xe   :  { %40 = dma.hbm_to_vmem [thread:$0]  %s5421_s1, 16384, %s35_s28, [#allocation6], %s4508_s30, %s4508_s30, %s4509_s9  }
   0xf   :  { %s4510_s12 = smov [#allocation2]  }
  0x10   :  { %s22_s13 = sshll.u32 %s4510_s12, 4  ;;  %s23_s13 = int_to_ptr.vmem [resolvable:$true] %s22_s13 }
  0x11   :  { %s4427_s14 = scalar_lea.vmem %s23_s13, 4096  ;;  %p4432_p6 = scmp.lt.s32.totalorder %s23_s13, %s23_s13 }
  0x12   :  { %p4428_p5 = scmp.ne.s32.totalorder %s23_s13, %s4427_s14  ;;  %p4433_p7 = scmp.lt.s32.totalorder %s4427_s14, %s4427_s14 }
  0x14   :  { %p4434_p8 = por %p4433_p7, %p4432_p6 }
  0x16   :  { %p4435_p9 = pnand %p4434_p8, %p4428_p5 }
  0x18   :  { %4438 = shalt.err (!%p4435_p9)
}
  0x19   :  { %s4511_s15 = smov 64   ;;  %s4512_s16 = smov 4  }
  0x1a   :  { %28 = dma.hbm_to_vmem [thread:$0]  %s5420_s0, 4096, %s23_s13, [#allocation3], %s4511_s15, %s4511_s15, %s4512_s16  }
  0x1b   :  { %s4513_s19 = smov [#allocation7]   ;;  %s4514_s21 = smov [#allocation8]  }
  0x1c   :  { %s46_s20 = sshll.u32 %s4513_s19, 4  ;;  %s62_s1 = sshll.u32 %s4514_s21, 4  ;;  %s47_s20 = int_to_ptr.vmem [resolvable:$true] %s46_s20  ;;  %s63_s1 = int_to_ptr.vmem [resolvable:$true] %s62_s1 }
  0x1d   :  { %s4447_s22 = scalar_lea.vmem %s47_s20, 1024  ;;  %p4452_p11 = scmp.lt.s32.totalorder %s47_s20, %s47_s20 }
  0x1e   :  { %p4448_p10 = scmp.ne.s32.totalorder %s47_s20, %s4447_s22  ;;  %p4453_p12 = scmp.lt.s32.totalorder %s4447_s22, %s4447_s22 }
  0x20   :  { %p4454_p13 = por %p4453_p12, %p4452_p11 }
  0x22   :  { %p4455_p0 = pnand %p4454_p13, %p4448_p10 }
  0x24   :  { %4458 = shalt.err (!%p4455_p0)
}
  0x25   :  { %52 = dma.hbm_to_vmem [thread:$0]  %s5422_s2, 1024, %s47_s20, [#allocation6], %s4511_s15, %s4511_s15, %s4512_s16  }
  0x26   :  { %s4467_s25 = scalar_lea.vmem %s63_s1, 1024  ;;  %p4472_p2 = scmp.lt.s32.totalorder %s63_s1, %s63_s1 }
  0x27   :  { %p4468_p1 = scmp.ne.s32.totalorder %s63_s1, %s4467_s25  ;;  %p4473_p3 = scmp.lt.s32.totalorder %s4467_s25, %s4467_s25 }
  0x29   :  { %p4474_p4 = por %p4473_p3, %p4472_p2 }
  0x2b   :  { %p4475_p5 = pnand %p4474_p4, %p4468_p1 }
  0x2d   :  { %4478 = shalt.err (!%p4475_p5)
}
  0x2e   :  { %68 = dma.hbm_to_vmem [thread:$0]  %s5425_s5, 1024, %s63_s1, [#allocation9], %s4511_s15, %s4511_s15, %s4512_s16  }
  0x2f   :  { %4499 = dma.done.wait [#allocation3], 4096  }
  0x30   :  { %4500 = vsyncadd [#allocation3], 4294963200 }
  0x31   :  { %4501 = dma.done.wait [#allocation6], 17408  }
  0x32   :  { %4502 = vsyncadd [#allocation6], 4294949888 }
  0x33   :  { %4503 = dma.done.wait [#allocation9], 1024  }
  0x34   :  { %4504 = vsyncadd [#allocation9], 4294966272  ;;  %v4027_v0 = vld [vmem:[#allocation7 + $0x38] sm:$0xff]   ;;  %v4028_v1 = vld [vmem:[#allocation7 + $0x30] sm:$0xff]   ;;  %v4515_v35 = vmov 0  }
  0x35   :  { %3823 = vmatprep.subr.bf16.mxu0 %v4027_v0  ;;  %v4029_v2 = vld [vmem:[#allocation7 + $0x28] sm:$0xff]   ;;  %v4030_v3 = vld [vmem:[#allocation7 + $0x20] sm:$0xff]   ;;  %v4031_v5 = vld [vmem:[#allocation7 + $0x18] sm:$0xff]   ;;  %1502 = vmatprep.subr.bf16.mxu1 %v4515_v35 }
  0x36   :  { %3824 = vmatpush3.bf16.msra.mxu0 %v4027_v0  ;;  %v4035_v4 = vld [vmem:[#allocation2] sm:$0xff]   ;;  %v4032_v6 = vld [vmem:[#allocation7 + $0x10] sm:$0xff]   ;;  %v4033_v7 = vld [vmem:[#allocation7 + $0x8] sm:$0xff]  }
  0x37   :  { %3825 = vmatprep.subr.bf16.mxu0 %v4028_v1  ;;  %3839 = vmatprep.mubr.bf16.mxu0 %v4035_v4  ;;  %v4034_v8 = vld [vmem:[#allocation7] sm:$0xff]   ;;  %v4036_v9 = vld [vmem:[#allocation2 + $0x8] sm:$0xff]   ;;  %v4037_v10 = vld [vmem:[#allocation2 + $0x10] sm:$0xff]  }
  0x38   :  { %v4038_v11 = vld [vmem:[#allocation2 + $0x18] sm:$0xff]   ;;  %v4039_v12 = vld [vmem:[#allocation2 + $0x20] sm:$0xff]   ;;  %v4040_v13 = vld [vmem:[#allocation2 + $0x28] sm:$0xff]  }
  0x39   :  { %v4041_v14 = vld [vmem:[#allocation2 + $0x30] sm:$0xff]   ;;  %v4042_v15 = vld [vmem:[#allocation2 + $0x38] sm:$0xff]   ;;  %v4043_v16 = vld [vmem:[#allocation2 + $0x40] sm:$0xff]  }
  0x3a   :  { %3826 = vmatpush3.bf16.msra.mxu0 %v4028_v1  ;;  %v4044_v17 = vld [vmem:[#allocation2 + $0x48] sm:$0xff]   ;;  %v4045_v18 = vld [vmem:[#allocation2 + $0x50] sm:$0xff]   ;;  %v4046_v19 = vld [vmem:[#allocation2 + $0x58] sm:$0xff]  }
  0x3b   :  { %3827 = vmatprep.subr.bf16.mxu0 %v4029_v2  ;;  %v4047_v20 = vld [vmem:[#allocation2 + $0x60] sm:$0xff]   ;;  %v4048_v21 = vld [vmem:[#allocation2 + $0x68] sm:$0xff]   ;;  %v4049_v22 = vld [vmem:[#allocation2 + $0x70] sm:$0xff]  }
  0x3c   :  { %v4050_v23 = vld [vmem:[#allocation2 + $0x78] sm:$0xff]   ;;  %v4051_v24 = vld [vmem:[#allocation2 + $0x80] sm:$0xff]   ;;  %v4052_v25 = vld [vmem:[#allocation2 + $0x88] sm:$0xff]  }
  0x3d   :  { %v4053_v26 = vld [vmem:[#allocation2 + $0x90] sm:$0xff]   ;;  %v4054_v27 = vld [vmem:[#allocation2 + $0x98] sm:$0xff]   ;;  %v4055_v28 = vld [vmem:[#allocation2 + $0xa0] sm:$0xff]  }
  0x3e   :  { %3828 = vmatpush3.bf16.msra.mxu0 %v4029_v2  ;;  %v4056_v29 = vld [vmem:[#allocation2 + $0xa8] sm:$0xff]   ;;  %v4057_v30 = vld [vmem:[#allocation2 + $0xb0] sm:$0xff]   ;;  %v4058_v31 = vld [vmem:[#allocation2 + $0xb8] sm:$0xff]  }
  0x3f   :  { %3829 = vmatprep.subr.bf16.mxu0 %v4030_v3  ;;  %v4059_v32 = vld [vmem:[#allocation2 + $0xc0] sm:$0xff]   ;;  %v4060_v33 = vld [vmem:[#allocation2 + $0xc8] sm:$0xff]   ;;  %v4061_v34 = vld [vmem:[#allocation2 + $0xd0] sm:$0xff]  }
  0x40   :  { %v4062_v36 = vld [vmem:[#allocation2 + $0xd8] sm:$0xff]   ;;  %v4063_v37 = vld [vmem:[#allocation2 + $0xe0] sm:$0xff]   ;;  %v4064_v38 = vld [vmem:[#allocation2 + $0xe8] sm:$0xff]  }
  0x41   :  { %v4065_v39 = vld [vmem:[#allocation2 + $0xf0] sm:$0xff]   ;;  %v4066_v40 = vld [vmem:[#allocation2 + $0xf8] sm:$0xff]  }
  0x42   :  { %3830 = vmatpush3.bf16.msra.mxu0 %v4030_v3  ;;  %v4069_v41 = vld [vmem:[#allocation5 + $0x4] ss:$16 sps:$4 sm:$0xff]   ;;  %v4087_v56 = vld [vmem:[#allocation5 + $0xc] ss:$16 sps:$4 sm:$0xff]  }
  0x43   :  { %3831 = vmatprep.subr.bf16.mxu0 %v4031_v5  ;;  %1534 = vmatprep.mubr.bf16.mxu1 %v4069_v41 }
  0x46   :  { %3832 = vmatpush3.bf16.msra.mxu0 %v4031_v5 }
  0x47   :  { %3833 = vmatprep.subr.bf16.mxu0 %v4032_v6 }
  0x4a   :  { %3834 = vmatpush3.bf16.msra.mxu0 %v4032_v6 }
  0x4b   :  { %3835 = vmatprep.subr.bf16.mxu0 %v4033_v7 }
  0x4e   :  { %3836 = vmatpush3.bf16.msra.mxu0 %v4033_v7 }
  0x4f   :  { %3837 = vmatprep.subr.bf16.mxu0 %v4034_v8 }
  0x52   :  { %3838 = vmatpush3.bf16.msra.mxu0 %v4034_v8 }
  0x53   :  { %1791 = vmatprep.subr.bf16.mxu0 %v4515_v35 }
  0x55   :  { %3840 = vmatmul.mubr.bf16.vlgmr.msra.gmra.mxu0 %v4036_v9 }
  0x56   :  { %3843 = vmatprep.mubr.bf16.mxu0 %v4037_v10 }
  0x5d   :  { %3844 = vmatmul.mubr.bf16.gmra.mxu0 %v4038_v11 }
  0x5e   :  { %3847 = vmatprep.mubr.bf16.mxu0 %v4039_v12 }
  0x65   :  { %3848 = vmatmul.mubr.bf16.gmra.mxu0 %v4040_v13 }
  0x66   :  { %3851 = vmatprep.mubr.bf16.mxu0 %v4041_v14 }
  0x6d   :  { %3852 = vmatmul.mubr.bf16.gmra.mxu0 %v4042_v15 }
  0x6e   :  { %3855 = vmatprep.mubr.bf16.mxu0 %v4043_v16 }
  0x75   :  { %3856 = vmatmul.mubr.bf16.gmra.mxu0 %v4044_v17 }
  0x76   :  { %3859 = vmatprep.mubr.bf16.mxu0 %v4045_v18 }
  0x7d   :  { %3860 = vmatmul.mubr.bf16.gmra.mxu0 %v4046_v19 }
  0x7e   :  { %3863 = vmatprep.mubr.bf16.mxu0 %v4047_v20 }
  0x85   :  { %3864 = vmatmul.mubr.bf16.gmra.mxu0 %v4048_v21 }
  0x86   :  { %3867 = vmatprep.mubr.bf16.mxu0 %v4049_v22 }
  0x8d   :  { %3868 = vmatmul.mubr.bf16.gmra.mxu0 %v4050_v23 }
  0x8e   :  { %3871 = vmatprep.mubr.bf16.mxu0 %v4051_v24 }
  0x95   :  { %3872 = vmatmul.mubr.bf16.gmra.mxu0 %v4052_v25 }
  0x96   :  { %3875 = vmatprep.mubr.bf16.mxu0 %v4053_v26 }
  0x9d   :  { %3876 = vmatmul.mubr.bf16.gmra.mxu0 %v4054_v27 }
  0x9e   :  { %3879 = vmatprep.mubr.bf16.mxu0 %v4055_v28 }
  0xa5   :  { %3880 = vmatmul.mubr.bf16.gmra.mxu0 %v4056_v29 }
  0xa6   :  { %3883 = vmatprep.mubr.bf16.mxu0 %v4057_v30 }
  0xad   :  { %3884 = vmatmul.mubr.bf16.gmra.mxu0 %v4058_v31 }
  0xae   :  { %3887 = vmatprep.mubr.bf16.mxu0 %v4059_v32 }
  0xb5   :  { %3888 = vmatmul.mubr.bf16.gmra.mxu0 %v4060_v33 }
  0xb6   :  { %3891 = vmatprep.mubr.bf16.mxu0 %v4061_v34 }
  0xbd   :  { %3892 = vmatmul.mubr.bf16.gmra.mxu0 %v4062_v36 }
  0xbe   :  { %3895 = vmatprep.mubr.bf16.mxu0 %v4063_v37 }
  0xc5   :  { %3896 = vmatmul.mubr.bf16.gmra.mxu0 %v4064_v38 }
  0xc6   :  { %3899 = vmatprep.mubr.bf16.mxu0 %v4065_v39 }
  0xcd   :  { %3900 = vmatmul.mubr.bf16.gmra.mxu0 %v4066_v40 }
  0xce   :  { %1823 = vmatprep.mubr.bf16.mxu0 %v4087_v56 }
 0x115   :  { %v3841_v42 = vpop.f32.mrf.mxu0 }
 0x117   :  { %v440_v43 = vpop.f32.mrf.mxu0 }
 0x119   :  { %v3842_v44 = vpop.f32.mrf.mxu0 }
 0x11a   :  { %v824_v12 = vpack.c.bf16 %v3842_v44, %v3841_v42  ;;  %v4067_v42 = vld [vmem:[#allocation5] ss:$16 sps:$4 sm:$0xff]  }
 0x11b   :  { %v443_v45 = vpop.f32.mrf.mxu0 }
 0x11c   :  { %v823_v15 = vpack.c.bf16 %v443_v45, %v440_v43  ;;  %v4070_v43 = vld [vmem:[#allocation5 + $0x24] ss:$16 sps:$4 sm:$0xff]  }
 0x11d   :  { %v3845_v46 = vpop.f32.mrf.mxu0 }
 0x11f   :  { %v456_v47 = vpop.f32.mrf.mxu0 }
 0x121   :  { %v3846_v48 = vpop.f32.mrf.mxu0 }
 0x122   :  { %v826_v6 = vpack.c.bf16 %v3846_v48, %v3845_v46 }
 0x123   :  { %v459_v49 = vpop.f32.mrf.mxu0 }
 0x124   :  { %v825_v9 = vpack.c.bf16 %v459_v49, %v456_v47 }
 0x125   :  { %v3849_v50 = vpop.f32.mrf.mxu0 }
 0x127   :  { %v472_v51 = vpop.f32.mrf.mxu0 }
 0x129   :  { %v3850_v52 = vpop.f32.mrf.mxu0 }
 0x12a   :  { %v828_v0 = vpack.c.bf16 %v3850_v52, %v3849_v50  ;;  %v4072_v50 = vld [vmem:[#allocation5 + $0x20] ss:$16 sps:$4 sm:$0xff]  }
 0x12b   :  { %v475_v53 = vpop.f32.mrf.mxu0 }
 0x12c   :  { %v827_v3 = vpack.c.bf16 %v475_v53, %v472_v51  ;;  %v4073_v51 = vld [vmem:[#allocation5 + $0x44] ss:$16 sps:$4 sm:$0xff]  }
 0x12d   :  { %v3853_v54 = vpop.f32.mrf.mxu0 }
 0x12f   :  { %v488_v55 = vpop.f32.mrf.mxu0 }
 0x131   :  { %v3854_v57 = vpop.f32.mrf.mxu0 }
 0x132   :  { %v830_v58 = vpack.c.bf16 %v3854_v57, %v3853_v54 }
 0x133   :  { %v491_v59 = vpop.f32.mrf.mxu0 }
 0x134   :  { %1503 = vmatpush1.bf16.msra.mxu1 %v830_v58  ;;  %v829_v61 = vpack.c.bf16 %v491_v59, %v488_v55  ;;  %v4075_v58 = vld [vmem:[#allocation5 + $0x40] ss:$16 sps:$4 sm:$0xff]   ;;  %v4076_v59 = vld [vmem:[#allocation5 + $0x64] ss:$16 sps:$4 sm:$0xff]  }
 0x135   :  { %v4578_v60 = vpop.f32.mrf.mxu0  ;;  %1504 = vmatprep.subr.bf16.mxu1 %v4515_v35 }
 0x137   :  { %v4581_v62 = vpop.f32.mrf.mxu0 }
 0x138   :  { %1505 = vmatpush1.bf16.msra.mxu1 %v829_v61 }
 0x139   :  { %v4583_v63 = vpop.f32.mrf.mxu0  ;;  %1506 = vmatprep.subr.bf16.mxu1 %v4515_v35 }
 0x13a   :  { %v832_v37 = vpack.c.bf16 %v4583_v63, %v4578_v60 }
 0x13b   :  { %v4586_v1 = vpop.f32.mrf.mxu0 }
 0x13c   :  { %1507 = vmatpush1.bf16.msra.mxu1 %v828_v0  ;;  %v831_v40 = vpack.c.bf16 %v4586_v1, %v4581_v62 }
 0x13d   :  { %v3861_v2 = vpop.f32.mrf.mxu0  ;;  %1508 = vmatprep.subr.bf16.mxu1 %v4515_v35 }
 0x13f   :  { %v520_v4 = vpop.f32.mrf.mxu0 }
 0x140   :  { %1509 = vmatpush1.bf16.msra.mxu1 %v827_v3  ;;  %v4079_v3 = vld [vmem:[#allocation5 + $0x84] ss:$16 sps:$4 sm:$0xff]  }
 0x141   :  { %v3862_v5 = vpop.f32.mrf.mxu0  ;;  %1510 = vmatprep.subr.bf16.mxu1 %v4515_v35 }
 0x142   :  { %v834_v30 = vpack.c.bf16 %v3862_v5, %v3861_v2  ;;  %v4078_v2 = vld [vmem:[#allocation5 + $0x60] ss:$16 sps:$4 sm:$0xff]  }
 0x143   :  { %v523_v7 = vpop.f32.mrf.mxu0 }
 0x144   :  { %1511 = vmatpush1.bf16.msra.mxu1 %v826_v6  ;;  %v833_v33 = vpack.c.bf16 %v523_v7, %v520_v4 }
 0x145   :  { %v3865_v8 = vpop.f32.mrf.mxu0  ;;  %1512 = vmatprep.subr.bf16.mxu1 %v4515_v35 }
 0x147   :  { %v536_v10 = vpop.f32.mrf.mxu0 }
 0x148   :  { %1513 = vmatpush1.bf16.msra.mxu1 %v825_v9 }
 0x149   :  { %v3866_v11 = vpop.f32.mrf.mxu0  ;;  %1514 = vmatprep.subr.bf16.mxu1 %v4515_v35 }
 0x14a   :  { %v836_v24 = vpack.c.bf16 %v3866_v11, %v3865_v8  ;;  %v4082_v11 = vld [vmem:[#allocation5 + $0xa4] ss:$16 sps:$4 sm:$0xff]  }
 0x14b   :  { %v539_v13 = vpop.f32.mrf.mxu0 }
 0x14c   :  { %1515 = vmatpush1.bf16.msra.mxu1 %v824_v12  ;;  %v835_v27 = vpack.c.bf16 %v539_v13, %v536_v10  ;;  %v4081_v10 = vld [vmem:[#allocation5 + $0x80] ss:$16 sps:$4 sm:$0xff]  }
 0x14d   :  { %v3869_v14 = vpop.f32.mrf.mxu0  ;;  %1516 = vmatprep.subr.bf16.mxu1 %v4515_v35 }
 0x14f   :  { %v552_v16 = vpop.f32.mrf.mxu0 }
 0x150   :  { %1517 = vmatpush1.bf16.msra.mxu1 %v823_v15 }
 0x151   :  { %v3870_v17 = vpop.f32.mrf.mxu0  ;;  %1518 = vmatprep.subr.bf16.mxu1 %v4515_v35 }
 0x152   :  { %v838_v18 = vpack.c.bf16 %v3870_v17, %v3869_v14  ;;  %v4088_v17 = vld [vmem:[#allocation5 + $0xc4] ss:$16 sps:$4 sm:$0xff]  }
 0x153   :  { %v555_v19 = vpop.f32.mrf.mxu0 }
 0x154   :  { %1519 = vmatpush2.bf16.msra.mxu1 %v838_v18  ;;  %v837_v21 = vpack.c.bf16 %v555_v19, %v552_v16  ;;  %v4084_v16 = vld [vmem:[#allocation5 + $0xa0] ss:$16 sps:$4 sm:$0xff]  }
 0x155   :  { %v4594_v20 = vpop.f32.mrf.mxu0  ;;  %1520 = vmatprep.subr.bf16.mxu1 %v4515_v35 }
 0x157   :  { %v4597_v22 = vpop.f32.mrf.mxu0 }
 0x158   :  { %1521 = vmatpush2.bf16.msra.mxu1 %v837_v21  ;;  %v4094_v21 = vld [vmem:[#allocation5 + $0xe4] ss:$16 sps:$4 sm:$0xff]  }
 0x159   :  { %v4599_v23 = vpop.f32.mrf.mxu0  ;;  %1522 = vmatprep.subr.bf16.mxu1 %v4515_v35 }
 0x15a   :  { %v840_v5 = vpack.c.bf16 %v4599_v23, %v4594_v20  ;;  %v4090_v20 = vld [vmem:[#allocation5 + $0xc0] ss:$16 sps:$4 sm:$0xff]  }
 0x15b   :  { %v4602_v25 = vpop.f32.mrf.mxu0 }
 0x15c   :  { %1523 = vmatpush2.bf16.msra.mxu1 %v836_v24  ;;  %v839_v8 = vpack.c.bf16 %v4602_v25, %v4597_v22  ;;  %v4096_v24 = vld [vmem:[#allocation5 + $0xe0] ss:$16 sps:$4 sm:$0xff]   ;;  %v4100_v25 = vld [vmem:[#allocation5 + $0x104] ss:$16 sps:$4 sm:$0xff]  }
 0x15d   :  { %v3877_v26 = vpop.f32.mrf.mxu0  ;;  %1524 = vmatprep.subr.bf16.mxu1 %v4515_v35 }
 0x15f   :  { %v4605_v28 = vpop.f32.mrf.mxu0 }
 0x160   :  { %1525 = vmatpush2.bf16.msra.mxu1 %v835_v27 }
 0x161   :  { %v3878_v29 = vpop.f32.mrf.mxu0  ;;  %1526 = vmatprep.subr.bf16.mxu1 %v4515_v35 }
 0x162   :  { %v842_v61 = vpack.c.bf16 %v3878_v29, %v3877_v26  ;;  %v4102_v29 = vld [vmem:[#allocation5 + $0x100] ss:$16 sps:$4 sm:$0xff]  }
 0x163   :  { %v587_v31 = vpop.f32.mrf.mxu0 }
 0x164   :  { %1527 = vmatpush2.bf16.msra.mxu1 %v834_v30  ;;  %v841_v0 = vpack.c.bf16 %v587_v31, %v4605_v28  ;;  %v4085_v28 = vld [vmem:[#allocation5 + $0x8] ss:$16 sps:$4 sm:$0xff]   ;;  %v4091_v30 = vld [vmem:[#allocation5 + $0x2c] ss:$16 sps:$4 sm:$0xff]   ;;  %v4106_v31 = vld [vmem:[#allocation5 + $0x124] ss:$16 sps:$4 sm:$0xff]  }
 0x165   :  { %v3881_v32 = vpop.f32.mrf.mxu0  ;;  %1528 = vmatprep.subr.bf16.mxu1 %v4515_v35 }
 0x167   :  { %v600_v34 = vpop.f32.mrf.mxu0 }
 0x168   :  { %1529 = vmatpush2.bf16.msra.mxu1 %v833_v33  ;;  %v4108_v33 = vld [vmem:[#allocation5 + $0x120] ss:$16 sps:$4 sm:$0xff]  }
 0x169   :  { %v3882_v36 = vpop.f32.mrf.mxu0  ;;  %1530 = vmatprep.subr.bf16.mxu1 %v4515_v35 }
 0x16a   :  { %v844_v53 = vpack.c.bf16 %v3882_v36, %v3881_v32  ;;  %v4093_v32 = vld [vmem:[#allocation5 + $0x28] ss:$16 sps:$4 sm:$0xff]   ;;  %v4112_v36 = vld [vmem:[#allocation5 + $0x144] ss:$16 sps:$4 sm:$0xff]  }
 0x16b   :  { %v603_v38 = vpop.f32.mrf.mxu0 }
 0x16c   :  { %1531 = vmatpush2.bf16.msra.mxu1 %v832_v37  ;;  %v843_v56 = vpack.c.bf16 %v603_v38, %v600_v34  ;;  %v4097_v34 = vld [vmem:[#allocation5 + $0x4c] ss:$16 sps:$4 sm:$0xff]   ;;  %v4099_v38 = vld [vmem:[#allocation5 + $0x48] ss:$16 sps:$4 sm:$0xff]  }
 0x16d   :  { %v3885_v39 = vpop.f32.mrf.mxu0  ;;  %1532 = vmatprep.subr.bf16.mxu1 %v4515_v35  ;;  %v4193_v37 = vld [vmem:[#allocation8 + $0x38] sm:$0xff]  }
 0x16f   :  { %v616_v41 = vpop.f32.mrf.mxu0 }
 0x170   :  { %1533 = vmatpush2.bf16.msra.mxu1 %v831_v40  ;;  %v4103_v40 = vld [vmem:[#allocation5 + $0x6c] ss:$16 sps:$4 sm:$0xff]  }
 0x171   :  { %v3886_v44 = vpop.f32.mrf.mxu0  ;;  %3903 = vmatprep.subr.bf16.mxu1 %v4193_v37 }
 0x172   :  { %v846_v45 = vpack.c.bf16 %v3886_v44, %v3885_v39  ;;  %v4114_v39 = vld [vmem:[#allocation5 + $0x140] ss:$16 sps:$4 sm:$0xff]   ;;  %v4109_v44 = vld [vmem:[#allocation5 + $0x8c] ss:$16 sps:$4 sm:$0xff]  }
 0x173   :  { %v619_v46 = vpop.f32.mrf.mxu0  ;;  %1535 = vmatmul.mubr.bf16.vlgmr.msra.gmra.mxu1 %v4067_v42  ;;  %v4105_v42 = vld [vmem:[#allocation5 + $0x68] ss:$16 sps:$4 sm:$0xff]  }
 0x174   :  { %1792 = vmatpush1.bf16.msra.mxu0 %v846_v45  ;;  %1542 = vmatprep.mubr.bf16.mxu1 %v4070_v43  ;;  %v845_v48 = vpack.c.bf16 %v619_v46, %v616_v41  ;;  %v4118_v41 = vld [vmem:[#allocation5 + $0x164] ss:$16 sps:$4 sm:$0xff]   ;;  %v4120_v43 = vld [vmem:[#allocation5 + $0x160] ss:$16 sps:$4 sm:$0xff]   ;;  %v4111_v46 = vld [vmem:[#allocation5 + $0x88] ss:$16 sps:$4 sm:$0xff]  }
 0x175   :  { %v4615_v47 = vpop.f32.mrf.mxu0  ;;  %1793 = vmatprep.subr.bf16.mxu0 %v4515_v35  ;;  %3904 = vmatpush3.bf16.msra.mxu1 %v4193_v37  ;;  %v4124_v45 = vld [vmem:[#allocation5 + $0x184] ss:$16 sps:$4 sm:$0xff]  }
 0x176   :  { %v4197_v37 = vld [vmem:[#allocation5 + $0x304] ss:$16 sps:$4 sm:$0xff]  }
 0x177   :  { %v4618_v49 = vpop.f32.mrf.mxu0 }
 0x178   :  { %1794 = vmatpush1.bf16.msra.mxu0 %v845_v48  ;;  %v4115_v48 = vld [vmem:[#allocation5 + $0xac] ss:$16 sps:$4 sm:$0xff]  }
 0x179   :  { %v4620_v52 = vpop.f32.mrf.mxu0  ;;  %1795 = vmatprep.subr.bf16.mxu0 %v4515_v35 }
 0x17a   :  { %v848_v26 = vpack.c.bf16 %v4620_v52, %v4615_v47  ;;  %v4126_v47 = vld [vmem:[#allocation5 + $0x180] ss:$16 sps:$4 sm:$0xff]   ;;  %v4121_v52 = vld [vmem:[#allocation5 + $0xcc] ss:$16 sps:$4 sm:$0xff]  }
 0x17b   :  { %v4623_v54 = vpop.f32.mrf.mxu0  ;;  %1543 = vmatmul.mubr.bf16.gmra.mxu1 %v4072_v50  ;;  %v4117_v50 = vld [vmem:[#allocation5 + $0xa8] ss:$16 sps:$4 sm:$0xff]  }
 0x17c   :  { %1796 = vmatpush1.bf16.msra.mxu0 %v844_v53  ;;  %1550 = vmatprep.mubr.bf16.mxu1 %v4073_v51  ;;  %v847_v27 = vpack.c.bf16 %v4623_v54, %v4618_v49  ;;  %v4130_v49 = vld [vmem:[#allocation5 + $0x1a4] ss:$16 sps:$4 sm:$0xff]   ;;  %v4132_v51 = vld [vmem:[#allocation5 + $0x1a0] ss:$16 sps:$4 sm:$0xff]  }
 0x17d   :  { %v3893_v55 = vpop.f32.mrf.mxu0  ;;  %1797 = vmatprep.subr.bf16.mxu0 %v4515_v35  ;;  %v4136_v53 = vld [vmem:[#allocation5 + $0x1c4] ss:$16 sps:$4 sm:$0xff]  }
 0x17e   :  { %v4218_v54 = vld [vmem:[#allocation8 + $0x30] sm:$0xff]  }
 0x17f   :  { %v648_v57 = vpop.f32.mrf.mxu0  ;;  %3905 = vmatprep.subr.bf16.mxu1 %v4218_v54 }
 0x180   :  { %1798 = vmatpush1.bf16.msra.mxu0 %v843_v56  ;;  %3906 = vmatpush3.bf16.msra.mxu1 %v4218_v54  ;;  %v4138_v56 = vld [vmem:[#allocation5 + $0x1c0] ss:$16 sps:$4 sm:$0xff]  }
 0x181   :  { %v3894_v60 = vpop.f32.mrf.mxu0  ;;  %1799 = vmatprep.subr.bf16.mxu0 %v4515_v35  ;;  %v4211_v54 = vld [vmem:[#allocation5 + $0x340] ss:$16 sps:$4 sm:$0xff]  }
 0x182   :  { %v850_v22 = vpack.c.bf16 %v3894_v60, %v3893_v55  ;;  %v4123_v55 = vld [vmem:[#allocation5 + $0xc8] ss:$16 sps:$4 sm:$0xff]   ;;  %v4144_v60 = vld [vmem:[#allocation5 + $0x1e0] ss:$16 sps:$4 sm:$0xff]  }
 0x183   :  { %v651_v62 = vpop.f32.mrf.mxu0  ;;  %1551 = vmatmul.mubr.bf16.gmra.mxu1 %v4075_v58  ;;  %v4142_v58 = vld [vmem:[#allocation5 + $0x1e4] ss:$16 sps:$4 sm:$0xff]  }
 0x184   :  { %1800 = vmatpush1.bf16.msra.mxu0 %v842_v61  ;;  %1558 = vmatprep.mubr.bf16.mxu1 %v4076_v59  ;;  %v849_v23 = vpack.c.bf16 %v651_v62, %v648_v57  ;;  %v4127_v57 = vld [vmem:[#allocation5 + $0xec] ss:$16 sps:$4 sm:$0xff]   ;;  %v4129_v59 = vld [vmem:[#allocation5 + $0xe8] ss:$16 sps:$4 sm:$0xff]   ;;  %v4148_v62 = vld [vmem:[#allocation5 + $0x204] ss:$16 sps:$4 sm:$0xff]  }
 0x185   :  { %v3897_v63 = vpop.f32.mrf.mxu0  ;;  %1801 = vmatprep.subr.bf16.mxu0 %v4515_v35  ;;  %v4133_v61 = vld [vmem:[#allocation5 + $0x10c] ss:$16 sps:$4 sm:$0xff]  }
 0x187   :  { %v664_v1 = vpop.f32.mrf.mxu0 }
 0x188   :  { %1802 = vmatpush1.bf16.msra.mxu0 %v841_v0  ;;  %v4135_v0 = vld [vmem:[#allocation5 + $0x108] ss:$16 sps:$4 sm:$0xff]  }
 0x189   :  { %v3898_v4 = vpop.f32.mrf.mxu0  ;;  %1803 = vmatprep.subr.bf16.mxu0 %v4515_v35 }
 0x18a   :  { %v852_v18 = vpack.c.bf16 %v3898_v4, %v3897_v63  ;;  %v4231_v63 = vld [vmem:[#allocation8 + $0x28] sm:$0xff]   ;;  %v4235_v4 = vld [vmem:[#allocation8 + $0x20] sm:$0xff]  }
 0x18b   :  { %v667_v6 = vpop.f32.mrf.mxu0  ;;  %1559 = vmatmul.mubr.bf16.gmra.mxu1 %v4078_v2  ;;  %3907 = vmatprep.subr.bf16.mxu1 %v4231_v63  ;;  %v4139_v2 = vld [vmem:[#allocation5 + $0x12c] ss:$16 sps:$4 sm:$0xff]  }
 0x18c   :  { %1804 = vmatpush1.bf16.msra.mxu0 %v840_v5  ;;  %1566 = vmatprep.mubr.bf16.mxu1 %v4079_v3  ;;  %v851_v19 = vpack.c.bf16 %v667_v6, %v664_v1  ;;  %v4150_v1 = vld [vmem:[#allocation5 + $0x200] ss:$16 sps:$4 sm:$0xff]   ;;  %v4154_v3 = vld [vmem:[#allocation5 + $0x224] ss:$16 sps:$4 sm:$0xff]   ;;  %v4239_v5 = vld [vmem:[#allocation8 + $0x18] sm:$0xff]  }
 0x18d   :  { %v3901_v7 = vpop.f32.mrf.mxu0  ;;  %1805 = vmatprep.subr.bf16.mxu0 %v4515_v35  ;;  %3908 = vmatpush3.bf16.msra.mxu1 %v4231_v63  ;;  %v4141_v6 = vld [vmem:[#allocation5 + $0x128] ss:$16 sps:$4 sm:$0xff]   ;;  %v4208_v63 = vld [vmem:[#allocation5 + $0x28c] ss:$16 sps:$4 sm:$0xff]  }
 0x18e   :  { %3909 = vmatprep.subr.bf16.mxu1 %v4235_v4 }
 0x18f   :  { %v680_v9 = vpop.f32.mrf.mxu0 }
 0x190   :  { %1806 = vmatpush1.bf16.msra.mxu0 %v839_v8  ;;  %v4145_v8 = vld [vmem:[#allocation5 + $0x14c] ss:$16 sps:$4 sm:$0xff]  }
 0x191   :  { %v3902_v12 = vpop.f32.mrf.mxu0  ;;  %1807 = vmatprep.subr.bf16.mxu0 %v4515_v35  ;;  %3910 = vmatpush3.bf16.msra.mxu1 %v4235_v4  ;;  %v4206_v4 = vld [vmem:[#allocation5 + $0x288] ss:$16 sps:$4 sm:$0xff]  }
 0x192   :  { %v854_v13 = vpack.c.bf16 %v3902_v12, %v3901_v7  ;;  %v4156_v7 = vld [vmem:[#allocation5 + $0x220] ss:$16 sps:$4 sm:$0xff]   ;;  %3911 = vmatprep.subr.bf16.mxu1 %v4239_v5  ;;  %v4147_v12 = vld [vmem:[#allocation5 + $0x148] ss:$16 sps:$4 sm:$0xff]  }
 0x193   :  { %v683_v14 = vpop.f32.mrf.mxu0  ;;  %1567 = vmatmul.mubr.bf16.gmra.mxu1 %v4081_v10  ;;  %v4243_v10 = vld [vmem:[#allocation8 + $0x10] sm:$0xff]  }
 0x194   :  { %1808 = vmatpush2.bf16.msra.mxu0 %v854_v13  ;;  %1574 = vmatprep.mubr.bf16.mxu1 %v4082_v11  ;;  %v853_v15 = vpack.c.bf16 %v683_v14, %v680_v9  ;;  %v4160_v9 = vld [vmem:[#allocation5 + $0x244] ss:$16 sps:$4 sm:$0xff]   ;;  %v4247_v11 = vld [vmem:[#allocation8 + $0x8] sm:$0xff]   ;;  %v4162_v13 = vld [vmem:[#allocation5 + $0x240] ss:$16 sps:$4 sm:$0xff]  }
 0x195   :  { %1809 = vmatprep.subr.bf16.mxu0 %v4515_v35  ;;  %3912 = vmatpush3.bf16.msra.mxu1 %v4239_v5  ;;  %v4151_v14 = vld [vmem:[#allocation5 + $0x16c] ss:$16 sps:$4 sm:$0xff]  }
 0x196   :  { %3913 = vmatprep.subr.bf16.mxu1 %v4243_v10 }
 0x198   :  { %1810 = vmatpush2.bf16.msra.mxu0 %v853_v15  ;;  %v4166_v15 = vld [vmem:[#allocation5 + $0x264] ss:$16 sps:$4 sm:$0xff]  }
 0x199   :  { %1811 = vmatprep.subr.bf16.mxu0 %v4515_v35  ;;  %3914 = vmatpush3.bf16.msra.mxu1 %v4243_v10 }
 0x19a   :  { %3915 = vmatprep.subr.bf16.mxu1 %v4247_v11 }
 0x19b   :  { %1575 = vmatmul.mubr.bf16.gmra.mxu1 %v4084_v16  ;;  %v4251_v16 = vld [vmem:[#allocation8] sm:$0xff]  }
 0x19c   :  { %1812 = vmatpush2.bf16.msra.mxu0 %v852_v18  ;;  %1582 = vmatprep.mubr.bf16.mxu1 %v4088_v17  ;;  %v4153_v17 = vld [vmem:[#allocation5 + $0x168] ss:$16 sps:$4 sm:$0xff]   ;;  %v4168_v18 = vld [vmem:[#allocation5 + $0x260] ss:$16 sps:$4 sm:$0xff]  }
 0x19d   :  { %1813 = vmatprep.subr.bf16.mxu0 %v4515_v35  ;;  %3916 = vmatpush3.bf16.msra.mxu1 %v4247_v11 }
 0x19e   :  { %3917 = vmatprep.subr.bf16.mxu1 %v4251_v16 }
 0x1a0   :  { %1814 = vmatpush2.bf16.msra.mxu0 %v851_v19  ;;  %v4159_v19 = vld [vmem:[#allocation5 + $0x18c] ss:$16 sps:$4 sm:$0xff]  }
 0x1a1   :  { %1815 = vmatprep.subr.bf16.mxu0 %v4515_v35  ;;  %3918 = vmatpush3.bf16.msra.mxu1 %v4251_v16  ;;  %v4238_v16 = vld [vmem:[#allocation5 + $0x3c4] ss:$16 sps:$4 sm:$0xff]  }
 0x1a2   :  { %3983 = vmatprep.subr.bf16.mxu1 %v4515_v35 }
 0x1a3   :  { %1583 = vmatmul.mubr.bf16.gmra.mxu1 %v4090_v20  ;;  %v4172_v20 = vld [vmem:[#allocation5 + $0x284] ss:$16 sps:$4 sm:$0xff]  }
 0x1a4   :  { %1816 = vmatpush2.bf16.msra.mxu0 %v850_v22  ;;  %1590 = vmatprep.mubr.bf16.mxu1 %v4094_v21  ;;  %v4157_v21 = vld [vmem:[#allocation5 + $0x188] ss:$16 sps:$4 sm:$0xff]   ;;  %v4174_v22 = vld [vmem:[#allocation5 + $0x280] ss:$16 sps:$4 sm:$0xff]  }
 0x1a5   :  { %1817 = vmatprep.subr.bf16.mxu0 %v4515_v35 }
 0x1a8   :  { %1818 = vmatpush2.bf16.msra.mxu0 %v849_v23  ;;  %v4165_v23 = vld [vmem:[#allocation5 + $0x1ac] ss:$16 sps:$4 sm:$0xff]  }
 0x1a9   :  { %1819 = vmatprep.subr.bf16.mxu0 %v4515_v35 }
 0x1ab   :  { %1591 = vmatmul.mubr.bf16.gmra.mxu1 %v4096_v24  ;;  %v4178_v24 = vld [vmem:[#allocation5 + $0x2a4] ss:$16 sps:$4 sm:$0xff]  }
 0x1ac   :  { %1820 = vmatpush2.bf16.msra.mxu0 %v848_v26  ;;  %1598 = vmatprep.mubr.bf16.mxu1 %v4100_v25  ;;  %v4163_v25 = vld [vmem:[#allocation5 + $0x1a8] ss:$16 sps:$4 sm:$0xff]   ;;  %v4180_v26 = vld [vmem:[#allocation5 + $0x2a0] ss:$16 sps:$4 sm:$0xff]  }
 0x1ad   :  { %1821 = vmatprep.subr.bf16.mxu0 %v4515_v35 }
 0x1b0   :  { %1822 = vmatpush2.bf16.msra.mxu0 %v847_v27  ;;  %v4171_v27 = vld [vmem:[#allocation5 + $0x1cc] ss:$16 sps:$4 sm:$0xff]  }
 0x1b1   :  { %2703 = vmatprep.subr.bf16.mxu0 %v4515_v35 }
 0x1b3   :  { %1824 = vmatmul.mubr.bf16.vlgmr.msra.gmra.mxu0 %v4085_v28  ;;  %1599 = vmatmul.mubr.bf16.gmra.mxu1 %v4102_v29  ;;  %v4184_v28 = vld [vmem:[#allocation5 + $0x2c4] ss:$16 sps:$4 sm:$0xff]   ;;  %v4169_v29 = vld [vmem:[#allocation5 + $0x1c8] ss:$16 sps:$4 sm:$0xff]  }
 0x1b4   :  { %1831 = vmatprep.mubr.bf16.mxu0 %v4091_v30  ;;  %1606 = vmatprep.mubr.bf16.mxu1 %v4106_v31  ;;  %v4186_v30 = vld [vmem:[#allocation5 + $0x2c0] ss:$16 sps:$4 sm:$0xff]   ;;  %v4177_v31 = vld [vmem:[#allocation5 + $0x1ec] ss:$16 sps:$4 sm:$0xff]  }
 0x1bb   :  { %1832 = vmatmul.mubr.bf16.gmra.mxu0 %v4093_v32  ;;  %1607 = vmatmul.mubr.bf16.gmra.mxu1 %v4108_v33  ;;  %v4190_v32 = vld [vmem:[#allocation5 + $0x2e4] ss:$16 sps:$4 sm:$0xff]   ;;  %v4175_v33 = vld [vmem:[#allocation5 + $0x1e8] ss:$16 sps:$4 sm:$0xff]  }
 0x1bc   :  { %1839 = vmatprep.mubr.bf16.mxu0 %v4097_v34  ;;  %1614 = vmatprep.mubr.bf16.mxu1 %v4112_v36  ;;  %v4192_v34 = vld [vmem:[#allocation5 + $0x2e0] ss:$16 sps:$4 sm:$0xff]   ;;  %v4183_v36 = vld [vmem:[#allocation5 + $0x20c] ss:$16 sps:$4 sm:$0xff]  }
 0x1c3   :  { %1840 = vmatmul.mubr.bf16.gmra.mxu0 %v4099_v38  ;;  %1615 = vmatmul.mubr.bf16.gmra.mxu1 %v4114_v39  ;;  %v4181_v38 = vld [vmem:[#allocation5 + $0x208] ss:$16 sps:$4 sm:$0xff]   ;;  %v4199_v39 = vld [vmem:[#allocation5 + $0x300] ss:$16 sps:$4 sm:$0xff]  }
 0x1c4   :  { %1847 = vmatprep.mubr.bf16.mxu0 %v4103_v40  ;;  %1622 = vmatprep.mubr.bf16.mxu1 %v4118_v41  ;;  %v4189_v40 = vld [vmem:[#allocation5 + $0x22c] ss:$16 sps:$4 sm:$0xff]   ;;  %v4203_v41 = vld [vmem:[#allocation5 + $0x324] ss:$16 sps:$4 sm:$0xff]  }
 0x1cb   :  { %1848 = vmatmul.mubr.bf16.gmra.mxu0 %v4105_v42  ;;  %1623 = vmatmul.mubr.bf16.gmra.mxu1 %v4120_v43 }
 0x1cc   :  { %1855 = vmatprep.mubr.bf16.mxu0 %v4109_v44  ;;  %1630 = vmatprep.mubr.bf16.mxu1 %v4124_v45  ;;  %v4187_v44 = vld [vmem:[#allocation5 + $0x228] ss:$16 sps:$4 sm:$0xff]  }
 0x1d3   :  { %1856 = vmatmul.mubr.bf16.gmra.mxu0 %v4111_v46  ;;  %1631 = vmatmul.mubr.bf16.gmra.mxu1 %v4126_v47  ;;  %v4205_v46 = vld [vmem:[#allocation5 + $0x320] ss:$16 sps:$4 sm:$0xff]   ;;  %v4196_v47 = vld [vmem:[#allocation5 + $0x24c] ss:$16 sps:$4 sm:$0xff]  }
 0x1d4   :  { %1863 = vmatprep.mubr.bf16.mxu0 %v4115_v48  ;;  %1638 = vmatprep.mubr.bf16.mxu1 %v4130_v49  ;;  %v4209_v48 = vld [vmem:[#allocation5 + $0x344] ss:$16 sps:$4 sm:$0xff]  }
 0x1db   :  { %1864 = vmatmul.mubr.bf16.gmra.mxu0 %v4117_v50  ;;  %1639 = vmatmul.mubr.bf16.gmra.mxu1 %v4132_v51 }
 0x1dc   :  { %1871 = vmatprep.mubr.bf16.mxu0 %v4121_v52  ;;  %1646 = vmatprep.mubr.bf16.mxu1 %v4136_v53  ;;  %v4194_v52 = vld [vmem:[#allocation5 + $0x248] ss:$16 sps:$4 sm:$0xff]  }
 0x1e3   :  { %1872 = vmatmul.mubr.bf16.gmra.mxu0 %v4123_v55  ;;  %1647 = vmatmul.mubr.bf16.gmra.mxu1 %v4138_v56  ;;  %v4202_v55 = vld [vmem:[#allocation5 + $0x26c] ss:$16 sps:$4 sm:$0xff]   ;;  %v4215_v56 = vld [vmem:[#allocation5 + $0x364] ss:$16 sps:$4 sm:$0xff]  }
 0x1e4   :  { %1879 = vmatprep.mubr.bf16.mxu0 %v4127_v57  ;;  %1654 = vmatprep.mubr.bf16.mxu1 %v4142_v58 }
 0x1eb   :  { %1880 = vmatmul.mubr.bf16.gmra.mxu0 %v4129_v59  ;;  %1655 = vmatmul.mubr.bf16.gmra.mxu1 %v4144_v60  ;;  %v4200_v60 = vld [vmem:[#allocation5 + $0x268] ss:$16 sps:$4 sm:$0xff]  }
 0x1ec   :  { %1887 = vmatprep.mubr.bf16.mxu0 %v4133_v61  ;;  %1662 = vmatprep.mubr.bf16.mxu1 %v4148_v62  ;;  %v4217_v62 = vld [vmem:[#allocation5 + $0x360] ss:$16 sps:$4 sm:$0xff]  }
 0x1f3   :  { %1888 = vmatmul.mubr.bf16.gmra.mxu0 %v4135_v0  ;;  %1663 = vmatmul.mubr.bf16.gmra.mxu1 %v4150_v1  ;;  %v4224_v0 = vld [vmem:[#allocation5 + $0x384] ss:$16 sps:$4 sm:$0xff]  }
 0x1f4   :  { %1895 = vmatprep.mubr.bf16.mxu0 %v4139_v2  ;;  %1670 = vmatprep.mubr.bf16.mxu1 %v4154_v3 }
 0x1fb   :  { %1896 = vmatmul.mubr.bf16.gmra.mxu0 %v4141_v6  ;;  %1671 = vmatmul.mubr.bf16.gmra.mxu1 %v4156_v7  ;;  %v4222_v6 = vld [vmem:[#allocation5 + $0x380] ss:$16 sps:$4 sm:$0xff]   ;;  %v4214_v7 = vld [vmem:[#allocation5 + $0x2ac] ss:$16 sps:$4 sm:$0xff]  }
 0x1fc   :  { %1903 = vmatprep.mubr.bf16.mxu0 %v4145_v8  ;;  %1678 = vmatprep.mubr.bf16.mxu1 %v4160_v9  ;;  %v4230_v8 = vld [vmem:[#allocation5 + $0x3a4] ss:$16 sps:$4 sm:$0xff]  }
 0x203   :  { %1904 = vmatmul.mubr.bf16.gmra.mxu0 %v4147_v12  ;;  %1679 = vmatmul.mubr.bf16.gmra.mxu1 %v4162_v13  ;;  %v4212_v12 = vld [vmem:[#allocation5 + $0x2a8] ss:$16 sps:$4 sm:$0xff]  }
 0x204   :  { %1911 = vmatprep.mubr.bf16.mxu0 %v4151_v14  ;;  %1686 = vmatprep.mubr.bf16.mxu1 %v4166_v15  ;;  %v4228_v14 = vld [vmem:[#allocation5 + $0x3a0] ss:$16 sps:$4 sm:$0xff]   ;;  %v4221_v15 = vld [vmem:[#allocation5 + $0x2cc] ss:$16 sps:$4 sm:$0xff]  }
 0x20b   :  { %1912 = vmatmul.mubr.bf16.gmra.mxu0 %v4153_v17  ;;  %1687 = vmatmul.mubr.bf16.gmra.mxu1 %v4168_v18 }
 0x20c   :  { %1919 = vmatprep.mubr.bf16.mxu0 %v4159_v19  ;;  %1694 = vmatprep.mubr.bf16.mxu1 %v4172_v20  ;;  %v4219_v20 = vld [vmem:[#allocation5 + $0x2c8] ss:$16 sps:$4 sm:$0xff]  }
 0x213   :  { %1920 = vmatmul.mubr.bf16.gmra.mxu0 %v4157_v21  ;;  %1695 = vmatmul.mubr.bf16.gmra.mxu1 %v4174_v22  ;;  %v4236_v22 = vld [vmem:[#allocation5 + $0x3c0] ss:$16 sps:$4 sm:$0xff]  }
 0x214   :  { %1927 = vmatprep.mubr.bf16.mxu0 %v4165_v23  ;;  %1702 = vmatprep.mubr.bf16.mxu1 %v4178_v24  ;;  %v4227_v23 = vld [vmem:[#allocation5 + $0x2ec] ss:$16 sps:$4 sm:$0xff]   ;;  %v4246_v24 = vld [vmem:[#allocation5 + $0x3e4] ss:$16 sps:$4 sm:$0xff]  }
 0x21b   :  { %1928 = vmatmul.mubr.bf16.gmra.mxu0 %v4163_v25  ;;  %1703 = vmatmul.mubr.bf16.gmra.mxu1 %v4180_v26 }
 0x21c   :  { %1935 = vmatprep.mubr.bf16.mxu0 %v4171_v27  ;;  %1710 = vmatprep.mubr.bf16.mxu1 %v4184_v28  ;;  %v4225_v28 = vld [vmem:[#allocation5 + $0x2e8] ss:$16 sps:$4 sm:$0xff]  }
 0x223   :  { %1936 = vmatmul.mubr.bf16.gmra.mxu0 %v4169_v29  ;;  %1711 = vmatmul.mubr.bf16.gmra.mxu1 %v4186_v30  ;;  %v4244_v30 = vld [vmem:[#allocation5 + $0x3e0] ss:$16 sps:$4 sm:$0xff]  }
 0x224   :  { %1943 = vmatprep.mubr.bf16.mxu0 %v4177_v31  ;;  %1718 = vmatprep.mubr.bf16.mxu1 %v4190_v32  ;;  %v4234_v31 = vld [vmem:[#allocation5 + $0x30c] ss:$16 sps:$4 sm:$0xff]  }
 0x22b   :  { %1944 = vmatmul.mubr.bf16.gmra.mxu0 %v4175_v33  ;;  %1719 = vmatmul.mubr.bf16.gmra.mxu1 %v4192_v34  ;;  %v4682_v34 = vld [vmem:[%s5423_s3] ss:$0 sm:$0xff] }
 0x22c   :  { %1951 = vmatprep.mubr.bf16.mxu0 %v4183_v36  ;;  %1726 = vmatprep.mubr.bf16.mxu1 %v4197_v37  ;;  %v4232_v37 = vld [vmem:[#allocation5 + $0x308] ss:$16 sps:$4 sm:$0xff]  }
 0x233   :  { %1952 = vmatmul.mubr.bf16.gmra.mxu0 %v4181_v38  ;;  %1727 = vmatmul.mubr.bf16.gmra.mxu1 %v4199_v39  ;;  %v4649_v42 = vpop.f32.mrf.mxu1 }
 0x234   :  { %1959 = vmatprep.mubr.bf16.mxu0 %v4189_v40  ;;  %1734 = vmatprep.mubr.bf16.mxu1 %v4203_v41  ;;  %v1537_v39 = vadd.f32 %v4682_v34, %v4649_v42  ;;  %v4242_v40 = vld [vmem:[#allocation5 + $0x32c] ss:$16 sps:$4 sm:$0xff]   ;;  %v4240_v42 = vld [vmem:[#allocation5 + $0x328] ss:$16 sps:$4 sm:$0xff]  }
 0x235   :  { %v1538_v43 = vpop.f32.mrf.mxu1 }
 0x237   :  { %v4651_v45 = vpop.f32.mrf.mxu1 }
 0x239   :  { %v1541_v49 = vpop.f32.mrf.mxu1 }
 0x23b   :  { %1960 = vmatmul.mubr.bf16.gmra.mxu0 %v4187_v44  ;;  %1735 = vmatmul.mubr.bf16.gmra.mxu1 %v4205_v46  ;;  %v4653_v50 = vpop.f32.mrf.mxu1 }
 0x23c   :  { %1967 = vmatprep.mubr.bf16.mxu0 %v4196_v47  ;;  %1742 = vmatprep.mubr.bf16.mxu1 %v4209_v48  ;;  %v4693_v47 = vld [vmem:[%s5424_s4] ss:$0 sm:$0xff] }
 0x23d   :  { %v1546_v51 = vpop.f32.mrf.mxu1 }
 0x23e   :  { %v1540_v51 = vadd.f32 %v4682_v34, %v4651_v45 }
 0x23f   :  { %v4655_v53 = vpop.f32.mrf.mxu1 }
 0x241   :  { %v1549_v57 = vpop.f32.mrf.mxu1 }
 0x243   :  { %1968 = vmatmul.mubr.bf16.gmra.mxu0 %v4194_v52  ;;  %1743 = vmatmul.mubr.bf16.gmra.mxu1 %v4211_v54  ;;  %v4657_v58 = vpop.f32.mrf.mxu1 }
 0x244   :  { %1975 = vmatprep.mubr.bf16.mxu0 %v4202_v55  ;;  %1750 = vmatprep.mubr.bf16.mxu1 %v4215_v56  ;;  %v1545_v55 = vadd.f32 %v4682_v34, %v4653_v50 }
 0x245   :  { %v1554_v59 = vpop.f32.mrf.mxu1 }
 0x246   :  { %v4250_v59 = vld [vmem:[#allocation5 + $0x34c] ss:$16 sps:$4 sm:$0xff]  }
 0x247   :  { %v4659_v61 = vpop.f32.mrf.mxu1 }
 0x249   :  { %v1557_v1 = vpop.f32.mrf.mxu1 }
 0x24b   :  { %1976 = vmatmul.mubr.bf16.gmra.mxu0 %v4200_v60  ;;  %1751 = vmatmul.mubr.bf16.gmra.mxu1 %v4217_v62  ;;  %v4661_v2 = vpop.f32.mrf.mxu1 }
 0x24c   :  { %1983 = vmatprep.mubr.bf16.mxu0 %v4208_v63  ;;  %1758 = vmatprep.mubr.bf16.mxu1 %v4224_v0 }
 0x24d   :  { %v1562_v3 = vpop.f32.mrf.mxu1 }
 0x24f   :  { %v4663_v5 = vpop.f32.mrf.mxu1 }
 0x251   :  { %v1565_v9 = vpop.f32.mrf.mxu1 }
 0x253   :  { %1984 = vmatmul.mubr.bf16.gmra.mxu0 %v4206_v4  ;;  %1759 = vmatmul.mubr.bf16.gmra.mxu1 %v4222_v6  ;;  %v4665_v10 = vpop.f32.mrf.mxu1 }
 0x254   :  { %1991 = vmatprep.mubr.bf16.mxu0 %v4214_v7  ;;  %1766 = vmatprep.mubr.bf16.mxu1 %v4230_v8  ;;  %v1548_v8 = vadd.f32 %v4682_v34, %v4655_v53 }
 0x255   :  { %v1570_v11 = vpop.f32.mrf.mxu1 }
 0x256   :  { %v4248_v11 = vld [vmem:[#allocation5 + $0x348] ss:$16 sps:$4 sm:$0xff]  }
 0x257   :  { %v4667_v13 = vpop.f32.mrf.mxu1 }
 0x259   :  { %v1573_v17 = vpop.f32.mrf.mxu1 }
 0x25a   :  { %v4254_v17 = vld [vmem:[#allocation5 + $0x36c] ss:$16 sps:$4 sm:$0xff]  }
 0x25b   :  { %1992 = vmatmul.mubr.bf16.gmra.mxu0 %v4212_v12  ;;  %1767 = vmatmul.mubr.bf16.gmra.mxu1 %v4228_v14  ;;  %v4669_v18 = vpop.f32.mrf.mxu1  ;;  %v1553_v14 = vadd.f32 %v4682_v34, %v4657_v58 }
 0x25c   :  { %1999 = vmatprep.mubr.bf16.mxu0 %v4221_v15  ;;  %1774 = vmatprep.mubr.bf16.mxu1 %v4238_v16 }
 0x25d   :  { %v1578_v19 = vpop.f32.mrf.mxu1 }
 0x25f   :  { %v4671_v21 = vpop.f32.mrf.mxu1 }
 0x261   :  { %v1581_v25 = vpop.f32.mrf.mxu1 }
 0x263   :  { %2000 = vmatmul.mubr.bf16.gmra.mxu0 %v4219_v20  ;;  %1775 = vmatmul.mubr.bf16.gmra.mxu1 %v4236_v22  ;;  %v4673_v26 = vpop.f32.mrf.mxu1 }
 0x264   :  { %2007 = vmatprep.mubr.bf16.mxu0 %v4227_v23  ;;  %1782 = vmatprep.mubr.bf16.mxu1 %v4246_v24 }
 0x265   :  { %v1586_v27 = vpop.f32.mrf.mxu1 }
 0x267   :  { %v4675_v29 = vpop.f32.mrf.mxu1 }
 0x269   :  { %v1589_v32 = vpop.f32.mrf.mxu1 }
 0x26b   :  { %2008 = vmatmul.mubr.bf16.gmra.mxu0 %v4225_v28  ;;  %1783 = vmatmul.mubr.bf16.gmra.mxu1 %v4244_v30  ;;  %v4677_v33 = vpop.f32.mrf.mxu1 }
 0x26c   :  { %2015 = vmatprep.mubr.bf16.mxu0 %v4234_v31  ;;  %v1556_v31 = vadd.f32 %v4682_v34, %v4659_v61 }
 0x26d   :  { %v1594_v36 = vpop.f32.mrf.mxu1 }
 0x26e   :  { %v4252_v36 = vld [vmem:[#allocation5 + $0x368] ss:$16 sps:$4 sm:$0xff]  }
 0x26f   :  { %v4684_v38 = vpop.f32.mrf.mxu1 }
 0x271   :  { %v1597_v41 = vpop.f32.mrf.mxu1 }
 0x273   :  { %v1825_v43 = vpop.f32.mrf.mxu0  ;;  %2016 = vmatmul.mubr.bf16.gmra.mxu0 %v4232_v37  ;;  %v4688_v44 = vpop.f32.mrf.mxu1 }
 0x274   :  { %v1826_v46 = vadd.f32 %v1825_v43, %v1537_v39  ;;  %2023 = vmatprep.mubr.bf16.mxu0 %v4242_v40  ;;  %v1561_v39 = vadd.f32 %v4682_v34, %v4661_v2  ;;  %v4257_v43 = vld [vmem:[#allocation5 + $0x38c] ss:$16 sps:$4 sm:$0xff]  }
 0x275   :  { %v1827_v48 = vpop.f32.mrf.mxu0  ;;  %v1602_v49 = vpop.f32.mrf.mxu1 }
 0x276   :  { %v2151_v56 = vmul.f32 %v4693_v47, %v1826_v46  ;;  %vm2080_vm0 = vcmp.gt.f32.partialorder %v1826_v46, 0.0 }
 0x277   :  { %v1828_v52 = vpop.f32.mrf.mxu0  ;;  %v4697_v54 = vpop.f32.mrf.mxu1 }
 0x278   :  { %v1829_v57 = vadd.f32 %v1828_v52, %v1540_v51  ;;  %v2215_v3 = vsel %vm2080_vm0, %v1826_v46, %v2151_v56 }
 0x279   :  { %v1830_v60 = vpop.f32.mrf.mxu0  ;;  %v1605_v62 = vpop.f32.mrf.mxu1 }
 0x27a   :  { %vm2081_vm1 = vcmp.gt.f32.partialorder %v1829_v57, 0.0  ;;  %v2152_v63 = vmul.f32 %v4693_v47, %v1829_v57  ;;  %v4255_v62 = vld [vmem:[#allocation5 + $0x388] ss:$16 sps:$4 sm:$0xff]  }
 0x27b   :  { %v1833_v0 = vpop.f32.mrf.mxu0  ;;  %2024 = vmatmul.mubr.bf16.gmra.mxu0 %v4240_v42  ;;  %v4703_v45 = vpop.f32.mrf.mxu1 }
 0x27c   :  { %v1834_v1 = vadd.f32 %v1833_v0, %v1545_v55  ;;  %v2216_v4 = vsel %vm2081_vm1, %v1829_v57, %v2152_v63  ;;  %2031 = vmatprep.mubr.bf16.mxu0 %v4250_v59  ;;  %v1564_v59 = vadd.f32 %v4682_v34, %v4663_v5  ;;  %v1569_v0 = vadd.f32 %v4682_v34, %v4665_v10 }
 0x27d   :  { %v1835_v6 = vpop.f32.mrf.mxu0  ;;  %v2279_v50 = vpack.c.bf16 %v2216_v4, %v2215_v3  ;;  %v1610_v7 = vpop.f32.mrf.mxu1  ;;  %v4260_v4 = vld [vmem:[#allocation5 + $0x3ac] ss:$16 sps:$4 sm:$0xff]  }
 0x27e   :  { %v2153_v15 = vmul.f32 %v4693_v47, %v1834_v1  ;;  %vm2082_vm2 = vcmp.gt.f32.partialorder %v1834_v1, 0.0 }
 0x27f   :  { %v1836_v9 = vpop.f32.mrf.mxu0  ;;  %3919 = vmatprep.mubr.bf16.mxu1 %v2279_v50  ;;  %v4707_v12 = vpop.f32.mrf.mxu1 }
 0x280   :  { %v1837_v16 = vadd.f32 %v1836_v9, %v1548_v8  ;;  %v2217_v24 = vsel %vm2082_vm2, %v1834_v1, %v2153_v15 }
 0x281   :  { %v1838_v19 = vpop.f32.mrf.mxu0  ;;  %v1613_v20 = vpop.f32.mrf.mxu1 }
 0x282   :  { %vm2083_vm3 = vcmp.gt.f32.partialorder %v1837_v16, 0.0  ;;  %v2154_v22 = vmul.f32 %v4693_v47, %v1837_v16  ;;  %v4258_v20 = vld [vmem:[#allocation5 + $0x3a8] ss:$16 sps:$4 sm:$0xff]  }
 0x283   :  { %v1841_v23 = vpop.f32.mrf.mxu0  ;;  %2032 = vmatmul.mubr.bf16.gmra.mxu0 %v4248_v11  ;;  %v4713_v53 = vpop.f32.mrf.mxu1 }
 0x284   :  { %v2218_v25 = vsel %vm2083_vm3, %v1837_v16, %v2154_v22  ;;  %v1842_v27 = vadd.f32 %v1841_v23, %v1553_v14  ;;  %2039 = vmatprep.mubr.bf16.mxu0 %v4254_v17  ;;  %v1572_v17 = vadd.f32 %v4682_v34, %v4667_v13  ;;  %v1577_v23 = vadd.f32 %v4682_v34, %v4669_v18 }
 0x285   :  { %v2280_v28 = vpack.c.bf16 %v2218_v25, %v2217_v24  ;;  %v1843_v58 = vpop.f32.mrf.mxu0  ;;  %v1618_v30 = vpop.f32.mrf.mxu1 }
 0x286   :  { %v2155_v40 = vmul.f32 %v4693_v47, %v1842_v27  ;;  %vm2084_vm4 = vcmp.gt.f32.partialorder %v1842_v27, 0.0 }
 0x287   :  { %v1844_v32 = vpop.f32.mrf.mxu0  ;;  %3920 = vmatmul.mubr.bf16.vlgmr.msra.gmra.mxu1 %v2280_v28  ;;  %v4717_v37 = vpop.f32.mrf.mxu1 }
 0x288   :  { %v1845_v41 = vadd.f32 %v1844_v32, %v1556_v31  ;;  %v2219_v42 = vsel %vm2084_vm4, %v1842_v27, %v2155_v40  ;;  %v4263_v27 = vld [vmem:[#allocation5 + $0x3cc] ss:$16 sps:$4 sm:$0xff]  }
 0x289   :  { %v1846_v46 = vpop.f32.mrf.mxu0  ;;  %v1621_v48 = vpop.f32.mrf.mxu1 }
 0x28a   :  { %vm2085_vm5 = vcmp.gt.f32.partialorder %v1845_v41, 0.0  ;;  %v2156_v49 = vmul.f32 %v4693_v47, %v1845_v41  ;;  %v4261_v48 = vld [vmem:[#allocation5 + $0x3c8] ss:$16 sps:$4 sm:$0xff]  }
 0x28b   :  { %v1849_v51 = vpop.f32.mrf.mxu0  ;;  %2040 = vmatmul.mubr.bf16.gmra.mxu0 %v4252_v36  ;;  %v4723_v61 = vpop.f32.mrf.mxu1 }
 0x28c   :  { %v1850_v52 = vadd.f32 %v1849_v51, %v1561_v39  ;;  %v2220_v55 = vsel %vm2085_vm5, %v1845_v41, %v2156_v49  ;;  %2047 = vmatprep.mubr.bf16.mxu0 %v4257_v43  ;;  %v1580_v43 = vadd.f32 %v4682_v34, %v4671_v21  ;;  %v1585_v51 = vadd.f32 %v4682_v34, %v4673_v26 }
 0x28d   :  { %v1851_v56 = vpop.f32.mrf.mxu0  ;;  %v2281_v2 = vpack.c.bf16 %v2220_v55, %v2219_v42  ;;  %v1626_v57 = vpop.f32.mrf.mxu1  ;;  %v4266_v55 = vld [vmem:[#allocation5 + $0x3ec] ss:$16 sps:$4 sm:$0xff]  }
 0x28e   :  { %v2157_v1 = vmul.f32 %v4693_v47, %v1850_v52  ;;  %vm2086_vm6 = vcmp.gt.f32.partialorder %v1850_v52, 0.0 }
 0x28f   :  { %v1852_v60 = vpop.f32.mrf.mxu0  ;;  %3923 = vmatprep.mubr.bf16.mxu1 %v2281_v2  ;;  %v4727_v63 = vpop.f32.mrf.mxu1 }
 0x290   :  { %v1853_v3 = vadd.f32 %v1852_v60, %v1564_v59  ;;  %v2221_v9 = vsel %vm2086_vm6, %v1850_v52, %v2157_v1 }
 0x291   :  { %v1854_v6 = vpop.f32.mrf.mxu0  ;;  %v1629_v50 = vpop.f32.mrf.mxu1 }
 0x292   :  { %vm2087_vm7 = vcmp.gt.f32.partialorder %v1853_v3, 0.0  ;;  %v2158_v7 = vmul.f32 %v4693_v47, %v1853_v3  ;;  %v4264_v50 = vld [vmem:[#allocation5 + $0x3e8] ss:$16 sps:$4 sm:$0xff]  }
 0x293   :  { %v1857_v8 = vpop.f32.mrf.mxu0  ;;  %2048 = vmatmul.mubr.bf16.gmra.mxu0 %v4255_v62  ;;  %v4733_v5 = vpop.f32.mrf.mxu1 }
 0x294   :  { %v2222_v11 = vsel %vm2087_vm7, %v1853_v3, %v2158_v7  ;;  %v1858_v14 = vadd.f32 %v1857_v8, %v1569_v0  ;;  %2055 = vmatprep.mubr.bf16.mxu0 %v4260_v4  ;;  %v1588_v4 = vadd.f32 %v4682_v34, %v4675_v29  ;;  %v1593_v8 = vadd.f32 %v4682_v34, %v4677_v33 }
 0x295   :  { %v2282_v15 = vpack.c.bf16 %v2222_v11, %v2221_v9  ;;  %v1859_v10 = vpop.f32.mrf.mxu0  ;;  %v1634_v16 = vpop.f32.mrf.mxu1 }
 0x296   :  { %v2159_v24 = vmul.f32 %v4693_v47, %v1858_v14  ;;  %vm2088_vm8 = vcmp.gt.f32.partialorder %v1858_v14, 0.0 }
 0x297   :  { %v1860_v19 = vpop.f32.mrf.mxu0  ;;  %3924 = vmatmul.mubr.bf16.gmra.mxu1 %v2282_v15  ;;  %v4737_v22 = vpop.f32.mrf.mxu1 }
 0x298   :  { %v1861_v25 = vadd.f32 %v1860_v19, %v1572_v17  ;;  %v2223_v36 = vsel %vm2088_vm8, %v1858_v14, %v2159_v24 }
 0x299   :  { %v1862_v28 = vpop.f32.mrf.mxu0  ;;  %v1637_v58 = vpop.f32.mrf.mxu1 }
 0x29a   :  { %vm2089_vm9 = vcmp.gt.f32.partialorder %v1861_v25, 0.0  ;;  %v2160_v30 = vmul.f32 %v4693_v47, %v1861_v25 }
 0x29b   :  { %v1865_v31 = vpop.f32.mrf.mxu0  ;;  %2056 = vmatmul.mubr.bf16.gmra.mxu0 %v4258_v20  ;;  %v4743_v13 = vpop.f32.mrf.mxu1 }
 0x29c   :  { %v1866_v32 = vadd.f32 %v1865_v31, %v1577_v23  ;;  %v2224_v39 = vsel %vm2089_vm9, %v1861_v25, %v2160_v30  ;;  %2063 = vmatprep.mubr.bf16.mxu0 %v4263_v27  ;;  %v4267_v23 = vld [vmem:[#allocation5 + $0x4] ss:$16 sps:$4 sm:$0xff]   ;;  %v1596_v27 = vadd.f32 %v4682_v34, %v4684_v38  ;;  %v1601_v30 = vadd.f32 %v4682_v34, %v4688_v44 }
 0x29d   :  { %v1867_v40 = vpop.f32.mrf.mxu0  ;;  %v2283_v18 = vpack.c.bf16 %v2224_v39, %v2223_v36  ;;  %v1642_v41 = vpop.f32.mrf.mxu1  ;;  %v1604_v44 = vadd.f32 %v4682_v34, %v4697_v54 }
 0x29e   :  { %v2161_v52 = vmul.f32 %v4693_v47, %v1866_v32  ;;  %vm2090_vm10 = vcmp.gt.f32.partialorder %v1866_v32, 0.0 }
 0x29f   :  { %v1868_v46 = vpop.f32.mrf.mxu0  ;;  %3927 = vmatprep.mubr.bf16.mxu1 %v2283_v18  ;;  %v4747_v49 = vpop.f32.mrf.mxu1 }
 0x2a0   :  { %v1869_v42 = vadd.f32 %v1868_v46, %v1580_v43  ;;  %v2225_v60 = vsel %vm2090_vm10, %v1866_v32, %v2161_v52 }
 0x2a1   :  { %v1870_v56 = vpop.f32.mrf.mxu0  ;;  %v1645_v2 = vpop.f32.mrf.mxu1 }
 0x2a2   :  { %vm2091_vm11 = vcmp.gt.f32.partialorder %v1869_v42, 0.0  ;;  %v2162_v57 = vmul.f32 %v4693_v47, %v1869_v42  ;;  %v1609_v56 = vadd.f32 %v4682_v34, %v4703_v45  ;;  %v1612_v45 = vadd.f32 %v4682_v34, %v4707_v12 }
 0x2a3   :  { %v1873_v59 = vpop.f32.mrf.mxu0  ;;  %2064 = vmatmul.mubr.bf16.gmra.mxu0 %v4261_v48  ;;  %v4753_v21 = vpop.f32.mrf.mxu1 }
 0x2a4   :  { %v2226_v62 = vsel %vm2091_vm11, %v1869_v42, %v2162_v57  ;;  %v1874_v0 = vadd.f32 %v1873_v59, %v1585_v51  ;;  %2071 = vmatprep.mubr.bf16.mxu0 %v4266_v55 }
 0x2a5   :  { %v2284_v1 = vpack.c.bf16 %v2226_v62, %v2225_v60  ;;  %v1875_v26 = vpop.f32.mrf.mxu0  ;;  %v1650_v3 = vpop.f32.mrf.mxu1 }
 0x2a6   :  { %v2163_v9 = vmul.f32 %v4693_v47, %v1874_v0  ;;  %vm2092_vm12 = vcmp.gt.f32.partialorder %v1874_v0, 0.0 }
 0x2a7   :  { %v1876_v6 = vpop.f32.mrf.mxu0  ;;  %3928 = vmatmul.mubr.bf16.gmra.mxu1 %v2284_v1  ;;  %v4757_v7 = vpop.f32.mrf.mxu1 }
 0x2a8   :  { %v1877_v11 = vadd.f32 %v1876_v6, %v1588_v4  ;;  %v2227_v19 = vsel %vm2092_vm12, %v1874_v0, %v2163_v9 }
 0x2a9   :  { %v1878_v14 = vpop.f32.mrf.mxu0  ;;  %v1653_v15 = vpop.f32.mrf.mxu1 }
 0x2aa   :  { %vm2093_vm13 = vcmp.gt.f32.partialorder %v1877_v11, 0.0  ;;  %v2164_v10 = vmul.f32 %v4693_v47, %v1877_v11 }
 0x2ab   :  { %v1881_v16 = vpop.f32.mrf.mxu0  ;;  %2072 = vmatmul.mubr.bf16.gmra.mxu0 %v4264_v50  ;;  %v4763_v29 = vpop.f32.mrf.mxu1 }
 0x2ac   :  { %v1882_v17 = vadd.f32 %v1881_v16, %v1593_v8  ;;  %v2228_v20 = vsel %vm2093_vm13, %v1877_v11, %v2164_v10  ;;  %2735 = vmatprep.mubr.bf16.mxu0 %v4267_v23  ;;  %v1617_v11 = vadd.f32 %v4682_v34, %v4713_v53  ;;  %v1620_v53 = vadd.f32 %v4682_v34, %v4717_v37 }
 0x2ad   :  { %v1883_v24 = vpop.f32.mrf.mxu0  ;;  %v2285_v33 = vpack.c.bf16 %v2228_v20, %v2227_v19  ;;  %v1658_v25 = vpop.f32.mrf.mxu1 }
 0x2ae   :  { %v2165_v31 = vmul.f32 %v4693_v47, %v1882_v17  ;;  %vm2094_vm14 = vcmp.gt.f32.partialorder %v1882_v17, 0.0 }
 0x2af   :  { %v1884_v28 = vpop.f32.mrf.mxu0  ;;  %3931 = vmatprep.mubr.bf16.mxu1 %v2285_v33  ;;  %v4767_v58 = vpop.f32.mrf.mxu1 }
 0x2b0   :  { %v1885_v32 = vadd.f32 %v1884_v28, %v1596_v27  ;;  %v2229_v38 = vsel %vm2094_vm14, %v1882_v17, %v2165_v31  ;;  %v1625_v31 = vadd.f32 %v4682_v34, %v4723_v61  ;;  %v1628_v61 = vadd.f32 %v4682_v34, %v4727_v63 }
 0x2b1   :  { %v1886_v36 = vpop.f32.mrf.mxu0  ;;  %v1661_v39 = vpop.f32.mrf.mxu1 }
 0x2b2   :  { %vm2095_vm15 = vcmp.gt.f32.partialorder %v1885_v32, 0.0  ;;  %v2166_v40 = vmul.f32 %v4693_v47, %v1885_v32 }
 0x2b3   :  { %v1889_v18 = vpop.f32.mrf.mxu0  ;;  %v4773_v41 = vpop.f32.mrf.mxu1 }
 0x2b4   :  { %v2230_v43 = vsel %vm2095_vm15, %v1885_v32, %v2166_v40  ;;  %v1890_v46 = vadd.f32 %v1889_v18, %v1601_v30 }
 0x2b5   :  { %v2286_v48 = vpack.c.bf16 %v2230_v43, %v2229_v38  ;;  %v1891_v51 = vpop.f32.mrf.mxu0  ;;  %v1666_v52 = vpop.f32.mrf.mxu1 }
 0x2b6   :  { %v2167_v2 = vmul.f32 %v4693_v47, %v1890_v46  ;;  %vm2096_vm0 = vcmp.gt.f32.partialorder %v1890_v46, 0.0 }
 0x2b7   :  { %v1892_v42 = vpop.f32.mrf.mxu0  ;;  %3932 = vmatmul.mubr.bf16.gmra.mxu1 %v2286_v48  ;;  %v4777_v55 = vpop.f32.mrf.mxu1 }
 0x2b8   :  { %v1893_v57 = vadd.f32 %v1892_v42, %v1604_v44  ;;  %v2231_v26 = vsel %vm2096_vm0, %v1890_v46, %v2167_v2  ;;  %v1633_v2 = vadd.f32 %v4682_v34, %v4733_v5  ;;  %v1636_v5 = vadd.f32 %v4682_v34, %v4737_v22 }
 0x2b9   :  { %v1894_v59 = vpop.f32.mrf.mxu0  ;;  %v1669_v60 = vpop.f32.mrf.mxu1 }
 0x2ba   :  { %vm2097_vm1 = vcmp.gt.f32.partialorder %v1893_v57, 0.0  ;;  %v2168_v62 = vmul.f32 %v4693_v47, %v1893_v57 }
 0x2bb   :  { %v1897_v0 = vpop.f32.mrf.mxu0  ;;  %v4783_v1 = vpop.f32.mrf.mxu1 }
 0x2bc   :  { %v1898_v54 = vadd.f32 %v1897_v0, %v1609_v56  ;;  %v2232_v3 = vsel %vm2097_vm1, %v1893_v57, %v2168_v62 }
 0x2bd   :  { %v1899_v4 = vpop.f32.mrf.mxu0  ;;  %v2287_v6 = vpack.c.bf16 %v2232_v3, %v2231_v26  ;;  %v1674_v50 = vpop.f32.mrf.mxu1 }
 0x2be   :  { %v2169_v14 = vmul.f32 %v4693_v47, %v1898_v54  ;;  %vm2098_vm2 = vcmp.gt.f32.partialorder %v1898_v54, 0.0 }
 0x2bf   :  { %v1900_v8 = vpop.f32.mrf.mxu0  ;;  %3935 = vmatprep.mubr.bf16.mxu1 %v2287_v6  ;;  %v4787_v9 = vpop.f32.mrf.mxu1 }
 0x2c0   :  { %v1901_v15 = vadd.f32 %v1900_v8, %v1612_v45  ;;  %v2233_v12 = vsel %vm2098_vm2, %v1898_v54, %v2169_v14  ;;  %v1641_v14 = vadd.f32 %v4682_v34, %v4743_v13  ;;  %v1644_v13 = vadd.f32 %v4682_v34, %v4747_v49 }
 0x2c1   :  { %v1902_v10 = vpop.f32.mrf.mxu0  ;;  %v1677_v16 = vpop.f32.mrf.mxu1 }
 0x2c2   :  { %vm2099_vm3 = vcmp.gt.f32.partialorder %v1901_v15, 0.0  ;;  %v2170_v17 = vmul.f32 %v4693_v47, %v1901_v15 }
 0x2c3   :  { %v1905_v19 = vpop.f32.mrf.mxu0  ;;  %v4793_v20 = vpop.f32.mrf.mxu1 }
 0x2c4   :  { %v2234_v23 = vsel %vm2099_vm3, %v1901_v15, %v2170_v17  ;;  %v1906_v24 = vadd.f32 %v1905_v19, %v1617_v11 }
 0x2c5   :  { %v2288_v33 = vpack.c.bf16 %v2234_v23, %v2233_v12  ;;  %v1907_v25 = vpop.f32.mrf.mxu0  ;;  %v1682_v27 = vpop.f32.mrf.mxu1 }
 0x2c6   :  { %v2171_v32 = vmul.f32 %v4693_v47, %v1906_v24  ;;  %vm2100_vm4 = vcmp.gt.f32.partialorder %v1906_v24, 0.0 }
 0x2c7   :  { %v1908_v28 = vpop.f32.mrf.mxu0  ;;  %3936 = vmatmul.mubr.bf16.gmra.mxu1 %v2288_v33  ;;  %v4797_v30 = vpop.f32.mrf.mxu1 }
 0x2c8   :  { %v1909_v36 = vadd.f32 %v1908_v28, %v1620_v53  ;;  %v2235_v46 = vsel %vm2100_vm4, %v1906_v24, %v2171_v32  ;;  %v1649_v32 = vadd.f32 %v4682_v34, %v4753_v21  ;;  %v1652_v21 = vadd.f32 %v4682_v34, %v4757_v7 }
 0x2c9   :  { %v1910_v39 = vpop.f32.mrf.mxu0  ;;  %v1685_v40 = vpop.f32.mrf.mxu1 }
 0x2ca   :  { %vm2101_vm5 = vcmp.gt.f32.partialorder %v1909_v36, 0.0  ;;  %v2172_v18 = vmul.f32 %v4693_v47, %v1909_v36 }
 0x2cb   :  { %v1913_v38 = vpop.f32.mrf.mxu0  ;;  %v4803_v43 = vpop.f32.mrf.mxu1 }
 0x2cc   :  { %v1914_v37 = vadd.f32 %v1913_v38, %v1625_v31  ;;  %v2236_v48 = vsel %vm2101_vm5, %v1909_v36, %v2172_v18 }
 0x2cd   :  { %v1915_v51 = vpop.f32.mrf.mxu0  ;;  %v2289_v52 = vpack.c.bf16 %v2236_v48, %v2235_v46  ;;  %v1690_v44 = vpop.f32.mrf.mxu1 }
 0x2ce   :  { %v2173_v57 = vmul.f32 %v4693_v47, %v1914_v37  ;;  %vm2102_vm6 = vcmp.gt.f32.partialorder %v1914_v37, 0.0 }
 0x2cf   :  { %v1916_v42 = vpop.f32.mrf.mxu0  ;;  %3939 = vmatprep.mubr.bf16.mxu1 %v2289_v52  ;;  %v4807_v56 = vpop.f32.mrf.mxu1 }
 0x2d0   :  { %v1917_v59 = vadd.f32 %v1916_v42, %v1628_v61  ;;  %v2237_v63 = vsel %vm2102_vm6, %v1914_v37, %v2173_v57  ;;  %v1657_v57 = vadd.f32 %v4682_v34, %v4763_v29  ;;  %v1660_v29 = vadd.f32 %v4682_v34, %v4767_v58 }
 0x2d1   :  { %v1918_v60 = vpop.f32.mrf.mxu0  ;;  %v1693_v62 = vpop.f32.mrf.mxu1 }
 0x2d2   :  { %vm2103_vm7 = vcmp.gt.f32.partialorder %v1917_v59, 0.0  ;;  %v2174_v0 = vmul.f32 %v4693_v47, %v1917_v59 }
 0x2d3   :  { %v1921_v54 = vpop.f32.mrf.mxu0  ;;  %v4813_v26 = vpop.f32.mrf.mxu1 }
 0x2d4   :  { %v2238_v3 = vsel %vm2103_vm7, %v1917_v59, %v2174_v0  ;;  %v1922_v4 = vadd.f32 %v1921_v54, %v1633_v2 }
 0x2d5   :  { %v2290_v6 = vpack.c.bf16 %v2238_v3, %v2237_v63  ;;  %v1923_v50 = vpop.f32.mrf.mxu0  ;;  %v1698_v45 = vpop.f32.mrf.mxu1 }
 0x2d6   :  { %v2175_v15 = vmul.f32 %v4693_v47, %v1922_v4  ;;  %vm2104_vm8 = vcmp.gt.f32.partialorder %v1922_v4, 0.0 }
 0x2d7   :  { %v1924_v8 = vpop.f32.mrf.mxu0  ;;  %3940 = vmatmul.mubr.bf16.gmra.mxu1 %v2290_v6  ;;  %v4817_v11 = vpop.f32.mrf.mxu1 }
 0x2d8   :  { %v1925_v10 = vadd.f32 %v1924_v8, %v1636_v5  ;;  %v2239_v24 = vsel %vm2104_vm8, %v1922_v4, %v2175_v15  ;;  %v1665_v15 = vadd.f32 %v4682_v34, %v4773_v41  ;;  %v1668_v41 = vadd.f32 %v4682_v34, %v4777_v55 }
 0x2d9   :  { %v1926_v16 = vpop.f32.mrf.mxu0  ;;  %v1701_v17 = vpop.f32.mrf.mxu1 }
 0x2da   :  { %vm2105_vm9 = vcmp.gt.f32.partialorder %v1925_v10, 0.0  ;;  %v2176_v19 = vmul.f32 %v4693_v47, %v1925_v10 }
 0x2db   :  { %v1929_v12 = vpop.f32.mrf.mxu0  ;;  %v4823_v23 = vpop.f32.mrf.mxu1 }
 0x2dc   :  { %v1930_v22 = vadd.f32 %v1929_v12, %v1641_v14  ;;  %v2240_v33 = vsel %vm2105_vm9, %v1925_v10, %v2176_v19 }
 0x2dd   :  { %v1931_v25 = vpop.f32.mrf.mxu0  ;;  %v2291_v27 = vpack.c.bf16 %v2240_v33, %v2239_v24  ;;  %v1706_v53 = vpop.f32.mrf.mxu1 }
 0x2de   :  { %v2177_v36 = vmul.f32 %v4693_v47, %v1930_v22  ;;  %vm2106_vm10 = vcmp.gt.f32.partialorder %v1930_v22, 0.0 }
 0x2df   :  { %v1932_v28 = vpop.f32.mrf.mxu0  ;;  %3943 = vmatprep.mubr.bf16.mxu1 %v2291_v27  ;;  %v4827_v31 = vpop.f32.mrf.mxu1 }
 0x2e0   :  { %v1933_v39 = vadd.f32 %v1932_v28, %v1644_v13  ;;  %v2241_v49 = vsel %vm2106_vm10, %v1930_v22, %v2177_v36  ;;  %v1673_v36 = vadd.f32 %v4682_v34, %v4783_v1  ;;  %v1676_v1 = vadd.f32 %v4682_v34, %v4787_v9 }
 0x2e1   :  { %v1934_v40 = vpop.f32.mrf.mxu0  ;;  %v1709_v18 = vpop.f32.mrf.mxu1 }
 0x2e2   :  { %vm2107_vm11 = vcmp.gt.f32.partialorder %v1933_v39, 0.0  ;;  %v2178_v38 = vmul.f32 %v4693_v47, %v1933_v39 }
 0x2e3   :  { %v1937_v37 = vpop.f32.mrf.mxu0  ;;  %v4833_v46 = vpop.f32.mrf.mxu1 }
 0x2e4   :  { %v2242_v48 = vsel %vm2107_vm11, %v1933_v39, %v2178_v38  ;;  %v1938_v51 = vadd.f32 %v1937_v37, %v1649_v32 }
 0x2e5   :  { %v2292_v52 = vpack.c.bf16 %v2242_v48, %v2241_v49  ;;  %v1939_v44 = vpop.f32.mrf.mxu0  ;;  %v1714_v61 = vpop.f32.mrf.mxu1 }
 0x2e6   :  { %v2179_v59 = vmul.f32 %v4693_v47, %v1938_v51  ;;  %vm2108_vm12 = vcmp.gt.f32.partialorder %v1938_v51, 0.0 }
 0x2e7   :  { %v1940_v42 = vpop.f32.mrf.mxu0  ;;  %3944 = vmatmul.mubr.bf16.gmra.mxu1 %v2292_v52  ;;  %v4837_v2 = vpop.f32.mrf.mxu1 }
 0x2e8   :  { %v1941_v60 = vadd.f32 %v1940_v42, %v1652_v21  ;;  %v2243_v4 = vsel %vm2108_vm12, %v1938_v51, %v2179_v59  ;;  %v1681_v59 = vadd.f32 %v4682_v34, %v4793_v20  ;;  %v1684_v20 = vadd.f32 %v4682_v34, %v4797_v30 }
 0x2e9   :  { %v1942_v62 = vpop.f32.mrf.mxu0  ;;  %v1717_v0 = vpop.f32.mrf.mxu1 }
 0x2ea   :  { %vm2109_vm13 = vcmp.gt.f32.partialorder %v1941_v60, 0.0  ;;  %v2180_v54 = vmul.f32 %v4693_v47, %v1941_v60 }
 0x2eb   :  { %v1945_v63 = vpop.f32.mrf.mxu0  ;;  %v4843_v3 = vpop.f32.mrf.mxu1 }
 0x2ec   :  { %v1946_v7 = vadd.f32 %v1945_v63, %v1657_v57  ;;  %v2244_v6 = vsel %vm2109_vm13, %v1941_v60, %v2180_v54 }
 0x2ed   :  { %v1947_v50 = vpop.f32.mrf.mxu0  ;;  %v2293_v45 = vpack.c.bf16 %v2244_v6, %v2243_v4  ;;  %v1722_v5 = vpop.f32.mrf.mxu1 }
 0x2ee   :  { %v2181_v10 = vmul.f32 %v4693_v47, %v1946_v7  ;;  %vm2110_vm14 = vcmp.gt.f32.partialorder %v1946_v7, 0.0 }
 0x2ef   :  { %v1948_v8 = vpop.f32.mrf.mxu0  ;;  %3947 = vmatprep.mubr.bf16.mxu1 %v2293_v45  ;;  %v4847_v14 = vpop.f32.mrf.mxu1 }
 0x2f0   :  { %v1949_v16 = vadd.f32 %v1948_v8, %v1660_v29  ;;  %v2245_v58 = vsel %vm2110_vm14, %v1946_v7, %v2181_v10  ;;  %v1689_v10 = vadd.f32 %v4682_v34, %v4803_v43  ;;  %v1692_v43 = vadd.f32 %v4682_v34, %v4807_v56 }
 0x2f1   :  { %v1950_v17 = vpop.f32.mrf.mxu0  ;;  %v1725_v19 = vpop.f32.mrf.mxu1 }
 0x2f2   :  { %vm2111_vm15 = vcmp.gt.f32.partialorder %v1949_v16, 0.0  ;;  %v2182_v12 = vmul.f32 %v4693_v47, %v1949_v16 }
 0x2f3   :  { %v1953_v22 = vpop.f32.mrf.mxu0  ;;  %v4853_v24 = vpop.f32.mrf.mxu1 }
 0x2f4   :  { %v2246_v33 = vsel %vm2111_vm15, %v1949_v16, %v2182_v12  ;;  %v1954_v25 = vadd.f32 %v1953_v22, %v1665_v15 }
 0x2f5   :  { %v2294_v27 = vpack.c.bf16 %v2246_v33, %v2245_v58  ;;  %v1955_v53 = vpop.f32.mrf.mxu0  ;;  %v1730_v13 = vpop.f32.mrf.mxu1 }
 0x2f6   :  { %v2183_v39 = vmul.f32 %v4693_v47, %v1954_v25  ;;  %vm2112_vm0 = vcmp.gt.f32.partialorder %v1954_v25, 0.0 }
 0x2f7   :  { %v1956_v28 = vpop.f32.mrf.mxu0  ;;  %3948 = vmatmul.mubr.bf16.gmra.mxu1 %v2294_v27  ;;  %v4857_v32 = vpop.f32.mrf.mxu1 }
 0x2f8   :  { %v1957_v40 = vadd.f32 %v1956_v28, %v1668_v41  ;;  %v2247_v51 = vsel %vm2112_vm0, %v1954_v25, %v2183_v39  ;;  %v1697_v39 = vadd.f32 %v4682_v34, %v4813_v26  ;;  %v1700_v26 = vadd.f32 %v4682_v34, %v4817_v11 }
 0x2f9   :  { %v1958_v18 = vpop.f32.mrf.mxu0  ;;  %v1733_v38 = vpop.f32.mrf.mxu1 }
 0x2fa   :  { %vm2113_vm1 = vcmp.gt.f32.partialorder %v1957_v40, 0.0  ;;  %v2184_v37 = vmul.f32 %v4693_v47, %v1957_v40 }
 0x2fb   :  { %v1961_v49 = vpop.f32.mrf.mxu0  ;;  %v4863_v48 = vpop.f32.mrf.mxu1 }
 0x2fc   :  { %v1962_v55 = vadd.f32 %v1961_v49, %v1673_v36  ;;  %v2248_v52 = vsel %vm2113_vm1, %v1957_v40, %v2184_v37 }
 0x2fd   :  { %v1963_v44 = vpop.f32.mrf.mxu0  ;;  %v2295_v61 = vpack.c.bf16 %v2248_v52, %v2247_v51  ;;  %v1738_v21 = vpop.f32.mrf.mxu1 }
 0x2fe   :  { %v2185_v60 = vmul.f32 %v4693_v47, %v1962_v55  ;;  %vm2114_vm2 = vcmp.gt.f32.partialorder %v1962_v55, 0.0 }
 0x2ff   :  { %v1964_v42 = vpop.f32.mrf.mxu0  ;;  %3951 = vmatprep.mubr.bf16.mxu1 %v2295_v61  ;;  %v4867_v57 = vpop.f32.mrf.mxu1 }
 0x300   :  { %v1965_v62 = vadd.f32 %v1964_v42, %v1676_v1  ;;  %v2249_v9 = vsel %vm2114_vm2, %v1962_v55, %v2185_v60  ;;  %v1705_v60 = vadd.f32 %v4682_v34, %v4823_v23  ;;  %v1708_v23 = vadd.f32 %v4682_v34, %v4827_v31 }
 0x301   :  { %v1966_v0 = vpop.f32.mrf.mxu0  ;;  %v1741_v54 = vpop.f32.mrf.mxu1 }
 0x302   :  { %vm2115_vm3 = vcmp.gt.f32.partialorder %v1965_v62, 0.0  ;;  %v2186_v63 = vmul.f32 %v4693_v47, %v1965_v62 }
 0x303   :  { %v1969_v7 = vpop.f32.mrf.mxu0  ;;  %v4873_v4 = vpop.f32.mrf.mxu1 }
 0x304   :  { %v2250_v6 = vsel %vm2115_vm3, %v1965_v62, %v2186_v63  ;;  %v1970_v50 = vadd.f32 %v1969_v7, %v1681_v59 }
 0x305   :  { %v2296_v45 = vpack.c.bf16 %v2250_v6, %v2249_v9  ;;  %v1971_v5 = vpop.f32.mrf.mxu0  ;;  %v1746_v29 = vpop.f32.mrf.mxu1 }
 0x306   :  { %v2187_v16 = vmul.f32 %v4693_v47, %v1970_v50  ;;  %vm2116_vm4 = vcmp.gt.f32.partialorder %v1970_v50, 0.0 }
 0x307   :  { %v1972_v8 = vpop.f32.mrf.mxu0  ;;  %3952 = vmatmul.mubr.bf16.gmra.mxu1 %v2296_v45  ;;  %v4877_v15 = vpop.f32.mrf.mxu1 }
 0x308   :  { %v1973_v17 = vadd.f32 %v1972_v8, %v1684_v20  ;;  %v2251_v25 = vsel %vm2116_vm4, %v1970_v50, %v2187_v16  ;;  %v1713_v16 = vadd.f32 %v4682_v34, %v4833_v46  ;;  %v1716_v46 = vadd.f32 %v4682_v34, %v4837_v2 }
 0x309   :  { %v1974_v19 = vpop.f32.mrf.mxu0  ;;  %v1749_v12 = vpop.f32.mrf.mxu1 }
 0x30a   :  { %vm2117_vm5 = vcmp.gt.f32.partialorder %v1973_v17, 0.0  ;;  %v2188_v22 = vmul.f32 %v4693_v47, %v1973_v17 }
 0x30b   :  { %v1977_v58 = vpop.f32.mrf.mxu0  ;;  %v4883_v33 = vpop.f32.mrf.mxu1 }
 0x30c   :  { %v1978_v30 = vadd.f32 %v1977_v58, %v1689_v10  ;;  %v2252_v27 = vsel %vm2117_vm5, %v1973_v17, %v2188_v22 }
 0x30d   :  { %v1979_v53 = vpop.f32.mrf.mxu0  ;;  %v2297_v13 = vpack.c.bf16 %v2252_v27, %v2251_v25  ;;  %v1754_v41 = vpop.f32.mrf.mxu1 }
 0x30e   :  { %v2189_v40 = vmul.f32 %v4693_v47, %v1978_v30  ;;  %vm2118_vm6 = vcmp.gt.f32.partialorder %v1978_v30, 0.0 }
 0x30f   :  { %v1980_v28 = vpop.f32.mrf.mxu0  ;;  %3955 = vmatprep.mubr.bf16.mxu1 %v2297_v13  ;;  %v4887_v36 = vpop.f32.mrf.mxu1 }
 0x310   :  { %v1981_v18 = vadd.f32 %v1980_v28, %v1692_v43  ;;  %v2253_v56 = vsel %vm2118_vm6, %v1978_v30, %v2189_v40  ;;  %v1721_v40 = vadd.f32 %v4682_v34, %v4843_v3  ;;  %v1724_v3 = vadd.f32 %v4682_v34, %v4847_v14 }
 0x311   :  { %v1982_v38 = vpop.f32.mrf.mxu0  ;;  %v1757_v37 = vpop.f32.mrf.mxu1 }
 0x312   :  { %vm2119_vm7 = vcmp.gt.f32.partialorder %v1981_v18, 0.0  ;;  %v2190_v49 = vmul.f32 %v4693_v47, %v1981_v18 }
 0x313   :  { %v1985_v55 = vpop.f32.mrf.mxu0  ;;  %v4893_v51 = vpop.f32.mrf.mxu1 }
 0x314   :  { %v2254_v52 = vsel %vm2119_vm7, %v1981_v18, %v2190_v49  ;;  %v1986_v44 = vadd.f32 %v1985_v55, %v1697_v39 }
 0x315   :  { %v2298_v61 = vpack.c.bf16 %v2254_v52, %v2253_v56  ;;  %v1987_v21 = vpop.f32.mrf.mxu0  ;;  %v1762_v1 = vpop.f32.mrf.mxu1 }
 0x316   :  { %v2191_v62 = vmul.f32 %v4693_v47, %v1986_v44  ;;  %vm2120_vm8 = vcmp.gt.f32.partialorder %v1986_v44, 0.0 }
 0x317   :  { %v1988_v42 = vpop.f32.mrf.mxu0  ;;  %3956 = vmatmul.mubr.bf16.gmra.mxu1 %v2298_v61  ;;  %v4897_v59 = vpop.f32.mrf.mxu1 }
 0x318   :  { %v1989_v0 = vadd.f32 %v1988_v42, %v1700_v26  ;;  %v2255_v50 = vsel %vm2120_vm8, %v1986_v44, %v2191_v62  ;;  %v1729_v62 = vadd.f32 %v4682_v34, %v4853_v24 }
 0x319   :  { %v1990_v54 = vpop.f32.mrf.mxu0  ;;  %v1765_v63 = vpop.f32.mrf.mxu1 }
 0x31a   :  { %vm2121_vm9 = vcmp.gt.f32.partialorder %v1989_v0, 0.0  ;;  %v2192_v7 = vmul.f32 %v4693_v47, %v1989_v0 }
 0x31b   :  { %v1993_v9 = vpop.f32.mrf.mxu0  ;;  %v4903_v6 = vpop.f32.mrf.mxu1 }
 0x31c   :  { %v1994_v11 = vadd.f32 %v1993_v9, %v1705_v60  ;;  %v2256_v45 = vsel %vm2121_vm9, %v1989_v0, %v2192_v7 }
 0x31d   :  { %v1995_v5 = vpop.f32.mrf.mxu0  ;;  %v2299_v29 = vpack.c.bf16 %v2256_v45, %v2255_v50  ;;  %v1770_v20 = vpop.f32.mrf.mxu1 }
 0x31e   :  { %v2193_v17 = vmul.f32 %v4693_v47, %v1994_v11  ;;  %vm2122_vm10 = vcmp.gt.f32.partialorder %v1994_v11, 0.0  ;;  %v4936_v20 = vld [vmem:[%s5423_s3] ss:$0 sm:$0xff] }
 0x31f   :  { %v1996_v8 = vpop.f32.mrf.mxu0  ;;  %3959 = vmatprep.mubr.bf16.mxu1 %v2299_v29  ;;  %v4907_v10 = vpop.f32.mrf.mxu1  ;;  %v1732_v34 = vadd.f32 %v4936_v20, %v4857_v32 }
 0x320   :  { %v1997_v19 = vadd.f32 %v1996_v8, %v1708_v23  ;;  %v2257_v31 = vsel %vm2122_vm10, %v1994_v11, %v2193_v17  ;;  %v1737_v23 = vadd.f32 %v4936_v20, %v4863_v48 }
 0x321   :  { %v1998_v12 = vpop.f32.mrf.mxu0  ;;  %v1773_v22 = vpop.f32.mrf.mxu1 }
 0x322   :  { %vm2123_vm11 = vcmp.gt.f32.partialorder %v1997_v19, 0.0  ;;  %v2194_v58 = vmul.f32 %v4693_v47, %v1997_v19 }
 0x323   :  { %v2001_v30 = vpop.f32.mrf.mxu0  ;;  %v4913_v25 = vpop.f32.mrf.mxu1 }
 0x324   :  { %v2258_v27 = vsel %vm2123_vm11, %v1997_v19, %v2194_v58  ;;  %v2002_v53 = vadd.f32 %v2001_v30, %v1713_v16  ;;  %v4946_v19 = vld [vmem:[%s5424_s4] ss:$0 sm:$0xff] }
 0x325   :  { %v2300_v13 = vpack.c.bf16 %v2258_v27, %v2257_v31  ;;  %v2003_v41 = vpop.f32.mrf.mxu0  ;;  %v1778_v43 = vpop.f32.mrf.mxu1 }
 0x326   :  { %v2195_v18 = vmul.f32 %v4693_v47, %v2002_v53  ;;  %vm2124_vm12 = vcmp.gt.f32.partialorder %v2002_v53, 0.0 }
 0x327   :  { %v2004_v28 = vpop.f32.mrf.mxu0  ;;  %3960 = vmatmul.mubr.bf16.gmra.mxu1 %v2300_v13  ;;  %v4917_v39 = vpop.f32.mrf.mxu1 }
 0x328   :  { %v2005_v38 = vadd.f32 %v2004_v28, %v1716_v46  ;;  %v2259_v44 = vsel %vm2124_vm12, %v2002_v53, %v2195_v18  ;;  %v1745_v53 = vadd.f32 %v4936_v20, %v4873_v4  ;;  %v1753_v4 = vadd.f32 %v4936_v20, %v4883_v33 }
 0x329   :  { %v2006_v37 = vpop.f32.mrf.mxu0  ;;  %v1781_v49 = vpop.f32.mrf.mxu1 }
 0x32a   :  { %vm2125_vm13 = vcmp.gt.f32.partialorder %v2005_v38, 0.0  ;;  %v2196_v55 = vmul.f32 %v4693_v47, %v2005_v38 }
 0x32b   :  { %v2009_v56 = vpop.f32.mrf.mxu0  ;;  %v4923_v52 = vpop.f32.mrf.mxu1 }
 0x32c   :  { %v2010_v2 = vadd.f32 %v2009_v56, %v1721_v40  ;;  %v2260_v61 = vsel %vm2125_vm13, %v2005_v38, %v2196_v55 }
 0x32d   :  { %v2011_v21 = vpop.f32.mrf.mxu0  ;;  %v2301_v1 = vpack.c.bf16 %v2260_v61, %v2259_v44  ;;  %v1786_v26 = vpop.f32.mrf.mxu1 }
 0x32e   :  { %v2197_v0 = vmul.f32 %v4693_v47, %v2010_v2  ;;  %vm2126_vm14 = vcmp.gt.f32.partialorder %v2010_v2, 0.0 }
 0x32f   :  { %v2012_v42 = vpop.f32.mrf.mxu0  ;;  %3963 = vmatprep.mubr.bf16.mxu1 %v2301_v1  ;;  %v4927_v60 = vpop.f32.mrf.mxu1 }
 0x330   :  { %v2013_v54 = vadd.f32 %v2012_v42, %v1724_v3  ;;  %v2261_v50 = vsel %vm2126_vm14, %v2010_v2, %v2197_v0  ;;  %v1756_v0 = vadd.f32 %v4936_v20, %v4887_v36 }
 0x331   :  { %v2014_v63 = vpop.f32.mrf.mxu0  ;;  %v1789_v7 = vpop.f32.mrf.mxu1 }
 0x332   :  { %vm2127_vm15 = vcmp.gt.f32.partialorder %v2013_v54, 0.0  ;;  %v2198_v9 = vmul.f32 %v4693_v47, %v2013_v54 }
 0x333   :  { %v2017_v11 = vpop.f32.mrf.mxu0 }
 0x334   :  { %v2262_v45 = vsel %vm2127_vm15, %v2013_v54, %v2198_v9  ;;  %v2018_v14 = vadd.f32 %v2017_v11, %v1729_v62  ;;  %v1761_v54 = vadd.f32 %v4936_v20, %v4893_v51  ;;  %v1764_v51 = vadd.f32 %v4936_v20, %v4897_v59 }
 0x335   :  { %v2302_v5 = vpack.c.bf16 %v2262_v45, %v2261_v50  ;;  %v2019_v29 = vpop.f32.mrf.mxu0 }
 0x336   :  { %v2199_v8 = vmul.f32 %v4693_v47, %v2018_v14  ;;  %vm2128_vm0 = vcmp.gt.f32.partialorder %v2018_v14, 0.0  ;;  %v1740_v47 = vadd.f32 %v4936_v20, %v4867_v57  ;;  %v1748_v57 = vadd.f32 %v4936_v20, %v4877_v15 }
 0x337   :  { %v2020_v24 = vpop.f32.mrf.mxu0  ;;  %3964 = vmatmul.mubr.bf16.gmra.mxu1 %v2302_v5 }
 0x338   :  { %v2021_v16 = vadd.f32 %v2020_v24, %v1732_v34  ;;  %v2263_v58 = vsel %vm2128_vm0, %v2018_v14, %v2199_v8  ;;  %v1769_v8 = vadd.f32 %v4936_v20, %v4903_v6  ;;  %v1772_v6 = vadd.f32 %v4936_v20, %v4907_v10 }
 0x339   :  { %v2022_v17 = vpop.f32.mrf.mxu0 }
 0x33a   :  { %vm2129_vm1 = vcmp.gt.f32.partialorder %v2021_v16, 0.0  ;;  %v2200_v12 = vmul.f32 %v4946_v19, %v2021_v16 }
 0x33b   :  { %v2025_v22 = vpop.f32.mrf.mxu0 }
 0x33c   :  { %v2026_v32 = vadd.f32 %v2025_v22, %v1737_v23  ;;  %v2264_v30 = vsel %vm2129_vm1, %v2021_v16, %v2200_v12 }
 0x33d   :  { %v2027_v31 = vpop.f32.mrf.mxu0  ;;  %v2303_v27 = vpack.c.bf16 %v2264_v30, %v2263_v58 }
 0x33e   :  { %v2201_v13 = vmul.f32 %v4946_v19, %v2026_v32  ;;  %vm2130_vm2 = vcmp.gt.f32.partialorder %v2026_v32, 0.0 }
 0x33f   :  { %v2028_v48 = vpop.f32.mrf.mxu0  ;;  %3967 = vmatprep.mubr.bf16.mxu1 %v2303_v27 }
 0x340   :  { %v2029_v41 = vadd.f32 %v2028_v48, %v1740_v47  ;;  %v2265_v40 = vsel %vm2130_vm2, %v2026_v32, %v2201_v13 }
 0x341   :  { %v2030_v43 = vpop.f32.mrf.mxu0 }
 0x342   :  { %vm2131_vm3 = vcmp.gt.f32.partialorder %v2029_v41, 0.0  ;;  %v2202_v46 = vmul.f32 %v4946_v19, %v2029_v41 }
 0x343   :  { %v2033_v28 = vpop.f32.mrf.mxu0 }
 0x344   :  { %v2266_v18 = vsel %vm2131_vm3, %v2029_v41, %v2202_v46  ;;  %v2034_v38 = vadd.f32 %v2033_v28, %v1745_v53  ;;  %v1777_v41 = vadd.f32 %v4936_v20, %v4913_v25 }
 0x345   :  { %v2304_v37 = vpack.c.bf16 %v2266_v18, %v2265_v40  ;;  %v2035_v49 = vpop.f32.mrf.mxu0 }
 0x346   :  { %v2203_v56 = vmul.f32 %v4946_v19, %v2034_v38  ;;  %vm2132_vm4 = vcmp.gt.f32.partialorder %v2034_v38, 0.0 }
 0x347   :  { %v2036_v55 = vpop.f32.mrf.mxu0  ;;  %3968 = vmatmul.mubr.bf16.gmra.mxu1 %v2304_v37  ;;  %v4961_v42 = vpop.f32.mrf.mxu1 }
 0x348   :  { %v2037_v2 = vadd.f32 %v2036_v55, %v1748_v57  ;;  %v2267_v26 = vsel %vm2132_vm4, %v2034_v38, %v2203_v56 }
 0x349   :  { %v2038_v44 = vpop.f32.mrf.mxu0  ;;  %v4968_v9 = vpop.f32.mrf.mxu1 }
 0x34a   :  { %vm2133_vm5 = vcmp.gt.f32.partialorder %v2037_v2, 0.0  ;;  %v2204_v61 = vmul.f32 %v4946_v19, %v2037_v2 }
 0x34b   :  { %v2041_v21 = vpop.f32.mrf.mxu0  ;;  %v4971_v36 = vpop.f32.mrf.mxu1 }
 0x34c   :  { %v2042_v1 = vadd.f32 %v2041_v21, %v1753_v4  ;;  %v2268_v3 = vsel %vm2133_vm5, %v2037_v2, %v2204_v61  ;;  %v1780_v4 = vadd.f32 %v4936_v20, %v4917_v39  ;;  %v1785_v2 = vadd.f32 %v4936_v20, %v4923_v52 }
 0x34d   :  { %v2043_v15 = vpop.f32.mrf.mxu0  ;;  %v2305_v62 = vpack.c.bf16 %v2268_v3, %v2267_v26  ;;  %v4978_v12 = vpop.f32.mrf.mxu1 }
 0x34e   :  { %v2205_v63 = vmul.f32 %v4946_v19, %v2042_v1  ;;  %vm2134_vm6 = vcmp.gt.f32.partialorder %v2042_v1, 0.0 }
 0x34f   :  { %v2044_v33 = vpop.f32.mrf.mxu0  ;;  %3971 = vmatprep.mubr.bf16.mxu1 %v2305_v62 }
 0x350   :  { %v2045_v7 = vadd.f32 %v2044_v33, %v1756_v0  ;;  %v2269_v14 = vsel %vm2134_vm6, %v2042_v1, %v2205_v63  ;;  %v1788_v63 = vadd.f32 %v4936_v20, %v4927_v60 }
 0x351   :  { %v2046_v11 = vpop.f32.mrf.mxu0 }
 0x352   :  { %vm2135_vm7 = vcmp.gt.f32.partialorder %v2045_v7, 0.0  ;;  %v2206_v50 = vmul.f32 %v4946_v19, %v2045_v7 }
 0x353   :  { %v2049_v45 = vpop.f32.mrf.mxu0 }
 0x354   :  { %v2270_v5 = vsel %vm2135_vm7, %v2045_v7, %v2206_v50  ;;  %v2050_v29 = vadd.f32 %v2049_v45, %v1761_v54 }
 0x355   :  { %v2306_v34 = vpack.c.bf16 %v2270_v5, %v2269_v14  ;;  %v2051_v24 = vpop.f32.mrf.mxu0 }
 0x356   :  { %v2207_v16 = vmul.f32 %v4946_v19, %v2050_v29  ;;  %vm2136_vm8 = vcmp.gt.f32.partialorder %v2050_v29, 0.0 }
 0x357   :  { %v2052_v23 = vpop.f32.mrf.mxu0  ;;  %3972 = vmatmul.mubr.bf16.gmra.mxu1 %v2306_v34  ;;  %v4981_v58 = vpop.f32.mrf.mxu1 }
 0x358   :  { %v2053_v17 = vadd.f32 %v2052_v23, %v1764_v51  ;;  %v2271_v59 = vsel %vm2136_vm8, %v2050_v29, %v2207_v16  ;;  %v4270_v23 = vld [vmem:[#allocation5 + $0x4c] ss:$16 sps:$4 sm:$0xff]  }
 0x359   :  { %v2054_v22 = vpop.f32.mrf.mxu0  ;;  %v4985_v53 = vpop.f32.mrf.mxu1 }
 0x35a   :  { %vm2137_vm9 = vcmp.gt.f32.partialorder %v2053_v17, 0.0  ;;  %v2208_v32 = vmul.f32 %v4946_v19, %v2053_v17 }
 0x35b   :  { %v2057_v30 = vpop.f32.mrf.mxu0  ;;  %v3926_v18 = vpop.f32.mrf.mxu1 }
 0x35c   :  { %v2058_v31 = vadd.f32 %v2057_v30, %v1769_v8  ;;  %v2272_v27 = vsel %vm2137_vm9, %v2053_v17, %v2208_v32  ;;  %v2667_v32 = vpack.c.bf16 %v3926_v18, %v4981_v58  ;;  %v2664_v58 = vpack.c.bf16 %v4978_v12, %v4968_v9 }
 0x35d   :  { %v2059_v47 = vpop.f32.mrf.mxu0  ;;  %v2307_v48 = vpack.c.bf16 %v2272_v27, %v2271_v59  ;;  %v2428_v56 = vpop.f32.mrf.mxu1  ;;  %v2665_v27 = vpack.c.bf16 %v4971_v36, %v4961_v42 }
 0x35e   :  { %v2209_v43 = vmul.f32 %v4946_v19, %v2058_v31  ;;  %vm2138_vm10 = vcmp.gt.f32.partialorder %v2058_v31, 0.0 }
 0x35f   :  { %v2060_v13 = vpop.f32.mrf.mxu0  ;;  %3975 = vmatprep.mubr.bf16.mxu1 %v2307_v48 }
 0x360   :  { %v2061_v46 = vadd.f32 %v2060_v13, %v1772_v6  ;;  %v2273_v37 = vsel %vm2138_vm10, %v2058_v31, %v2209_v43  ;;  %v2666_v31 = vpack.c.bf16 %v2428_v56, %v4985_v53 }
 0x361   :  { %v2062_v28 = vpop.f32.mrf.mxu0 }
 0x362   :  { %vm2139_vm11 = vcmp.gt.f32.partialorder %v2061_v46, 0.0  ;;  %v2210_v40 = vmul.f32 %v4946_v19, %v2061_v46 }
 0x363   :  { %v2065_v38 = vpop.f32.mrf.mxu0 }
 0x364   :  { %v2274_v49 = vsel %vm2139_vm11, %v2061_v46, %v2210_v40  ;;  %v2066_v10 = vadd.f32 %v2065_v38, %v1777_v41 }
 0x365   :  { %v2308_v57 = vpack.c.bf16 %v2274_v49, %v2273_v37  ;;  %v2067_v55 = vpop.f32.mrf.mxu0 }
 0x366   :  { %v2211_v44 = vmul.f32 %v4946_v19, %v2066_v10  ;;  %vm2140_vm12 = vcmp.gt.f32.partialorder %v2066_v10, 0.0 }
 0x367   :  { %v2068_v25 = vpop.f32.mrf.mxu0  ;;  %3976 = vmatmul.mubr.bf16.gmra.mxu1 %v2308_v57  ;;  %v3929_v21 = vpop.f32.mrf.mxu1 }
 0x368   :  { %v2069_v61 = vadd.f32 %v2068_v25, %v1780_v4  ;;  %v2275_v62 = vsel %vm2140_vm12, %v2066_v10, %v2211_v44 }
 0x369   :  { %v2070_v1 = vpop.f32.mrf.mxu0  ;;  %v2441_v39 = vpop.f32.mrf.mxu1 }
 0x36a   :  { %vm2141_vm13 = vcmp.gt.f32.partialorder %v2069_v61, 0.0  ;;  %v2212_v26 = vmul.f32 %v4946_v19, %v2069_v61  ;;  %v4272_v1 = vld [vmem:[#allocation5 + $0x24] ss:$16 sps:$4 sm:$0xff]  }
 0x36b   :  { %v2073_v3 = vpop.f32.mrf.mxu0  ;;  %v3930_v50 = vpop.f32.mrf.mxu1 }
 0x36c   :  { %v2074_v15 = vadd.f32 %v2073_v3, %v1785_v2  ;;  %v2276_v0 = vsel %vm2141_vm13, %v2069_v61, %v2212_v26 }
 0x36d   :  { %v2075_v33 = vpop.f32.mrf.mxu0  ;;  %v2309_v54 = vpack.c.bf16 %v2276_v0, %v2275_v62  ;;  %v2444_v34 = vpop.f32.mrf.mxu1  ;;  %v4274_v62 = vld [vmem:[#allocation5 + $0x44] ss:$16 sps:$4 sm:$0xff]  }
 0x36e   :  { %v2213_v7 = vmul.f32 %v4946_v19, %v2074_v15  ;;  %vm2142_vm14 = vcmp.gt.f32.partialorder %v2074_v15, 0.0  ;;  %v2668_v22 = vpack.c.bf16 %v2444_v34, %v2441_v39 }
 0x36f   :  { %v2076_v52 = vpop.f32.mrf.mxu0  ;;  %3979 = vmatprep.mubr.bf16.mxu1 %v2309_v54  ;;  %v4275_v54 = vld [vmem:[#allocation5 + $0x40] ss:$16 sps:$4 sm:$0xff]  }
 0x370   :  { %v2077_v11 = vadd.f32 %v2076_v52, %v1788_v63  ;;  %v2277_v5 = vsel %vm2142_vm14, %v2074_v15, %v2213_v7  ;;  %v4273_v15 = vld [vmem:[#allocation5 + $0x20] ss:$16 sps:$4 sm:$0xff]   ;;  %v4276_v63 = vld [vmem:[#allocation5 + $0x64] ss:$16 sps:$4 sm:$0xff]  }
 0x371   :  { %v2078_v45 = vpop.f32.mrf.mxu0 }
 0x372   :  { %vm2143_vm15 = vcmp.gt.f32.partialorder %v2077_v11, 0.0  ;;  %v2214_v14 = vmul.f32 %v4946_v19, %v2077_v11  ;;  %v2669_v19 = vpack.c.bf16 %v3930_v50, %v3929_v21  ;;  %v4271_v21 = vld [vmem:[#allocation5] ss:$16 sps:$4 sm:$0xff]   ;;  %v4278_v50 = vld [vmem:[#allocation5 + $0x84] ss:$16 sps:$4 sm:$0xff]  }
 0x374   :  { %v2278_v29 = vsel %vm2143_vm15, %v2077_v11, %v2214_v14  ;;  %v4277_v11 = vld [vmem:[#allocation5 + $0x60] ss:$16 sps:$4 sm:$0xff]  }
 0x375   :  { %v2310_v24 = vpack.c.bf16 %v2278_v29, %v2277_v5 }
 0x377   :  { %v3933_v51 = vpop.f32.mrf.mxu1  ;;  %3980 = vmatmul.mubr.bf16.gmra.mxu1 %v2310_v24  ;;  %v4279_v24 = vld [vmem:[#allocation5 + $0x80] ss:$16 sps:$4 sm:$0xff]  }
 0x378   :  { %3040 = vmatprep.mubr.bf16.mxu1 %v4270_v23  ;;  %v4280_v23 = vld [vmem:[#allocation5 + $0xa4] ss:$16 sps:$4 sm:$0xff]  }
 0x379   :  { %v2457_v60 = vpop.f32.mrf.mxu1 }
 0x37b   :  { %v3934_v20 = vpop.f32.mrf.mxu1 }
 0x37c   :  { %v2671_v8 = vpack.c.bf16 %v3934_v20, %v3933_v51  ;;  %v4281_v20 = vld [vmem:[#allocation5 + $0xa0] ss:$16 sps:$4 sm:$0xff]  }
 0x37d   :  { %v2460_v16 = vpop.f32.mrf.mxu1 }
 0x37e   :  { %2704 = vmatpush1.bf16.msra.mxu0 %v2671_v8  ;;  %v2670_v17 = vpack.c.bf16 %v2460_v16, %v2457_v60  ;;  %v4282_v16 = vld [vmem:[#allocation5 + $0xc4] ss:$16 sps:$4 sm:$0xff]  }
 0x37f   :  { %2705 = vmatprep.subr.bf16.mxu0 %v4515_v35 }
 0x382   :  { %2706 = vmatpush1.bf16.msra.mxu0 %v2670_v17 }
 0x383   :  { %2707 = vmatprep.subr.bf16.mxu0 %v4515_v35 }
 0x386   :  { %2708 = vmatpush1.bf16.msra.mxu0 %v2669_v19 }
 0x387   :  { %2709 = vmatprep.subr.bf16.mxu0 %v4515_v35  ;;  %v3937_v30 = vpop.f32.mrf.mxu1 }
 0x389   :  { %v2473_v59 = vpop.f32.mrf.mxu1 }
 0x38a   :  { %2710 = vmatpush1.bf16.msra.mxu0 %v2668_v22  ;;  %v4283_v22 = vld [vmem:[#allocation5 + $0xc0] ss:$16 sps:$4 sm:$0xff]  }
 0x38b   :  { %2711 = vmatprep.subr.bf16.mxu0 %v4515_v35  ;;  %v3938_v47 = vpop.f32.mrf.mxu1 }
 0x38c   :  { %v2673_v56 = vpack.c.bf16 %v3938_v47, %v3937_v30  ;;  %v4284_v30 = vld [vmem:[#allocation5 + $0xe4] ss:$16 sps:$4 sm:$0xff]   ;;  %v4285_v47 = vld [vmem:[#allocation5 + $0xe0] ss:$16 sps:$4 sm:$0xff]  }
 0x38d   :  { %v2476_v48 = vpop.f32.mrf.mxu1 }
 0x38e   :  { %2712 = vmatpush1.bf16.msra.mxu0 %v2667_v32  ;;  %v2672_v2 = vpack.c.bf16 %v2476_v48, %v2473_v59  ;;  %v4286_v48 = vld [vmem:[#allocation5 + $0x104] ss:$16 sps:$4 sm:$0xff]  }
 0x38f   :  { %2713 = vmatprep.subr.bf16.mxu0 %v4515_v35 }
 0x392   :  { %2714 = vmatpush1.bf16.msra.mxu0 %v2666_v31 }
 0x393   :  { %2715 = vmatprep.subr.bf16.mxu0 %v4515_v35 }
 0x396   :  { %2716 = vmatpush1.bf16.msra.mxu0 %v2665_v27 }
 0x397   :  { %2717 = vmatprep.subr.bf16.mxu0 %v4515_v35  ;;  %v3941_v6 = vpop.f32.mrf.mxu1 }
 0x399   :  { %v2489_v53 = vpop.f32.mrf.mxu1 }
 0x39a   :  { %2718 = vmatpush1.bf16.msra.mxu0 %v2664_v58 }
 0x39b   :  { %2719 = vmatprep.subr.bf16.mxu0 %v4515_v35  ;;  %v3942_v13 = vpop.f32.mrf.mxu1 }
 0x39c   :  { %v2675_v10 = vpack.c.bf16 %v3942_v13, %v3941_v6  ;;  %v4287_v13 = vld [vmem:[#allocation5 + $0x100] ss:$16 sps:$4 sm:$0xff]  }
 0x39d   :  { %v2492_v41 = vpop.f32.mrf.mxu1 }
 0x39e   :  { %v2674_v55 = vpack.c.bf16 %v2492_v41, %v2489_v53  ;;  %v4288_v41 = vld [vmem:[#allocation5 + $0x124] ss:$16 sps:$4 sm:$0xff]  }
 0x3a7   :  { %v3945_v43 = vpop.f32.mrf.mxu1 }
 0x3a9   :  { %v2505_v46 = vpop.f32.mrf.mxu1 }
 0x3ab   :  { %v3946_v28 = vpop.f32.mrf.mxu1 }
 0x3ac   :  { %v2677_v12 = vpack.c.bf16 %v3946_v28, %v3945_v43  ;;  %v4289_v28 = vld [vmem:[#allocation5 + $0x120] ss:$16 sps:$4 sm:$0xff]  }
 0x3ad   :  { %v2508_v40 = vpop.f32.mrf.mxu1 }
 0x3ae   :  { %v2676_v49 = vpack.c.bf16 %v2508_v40, %v2505_v46  ;;  %v4290_v40 = vld [vmem:[#allocation5 + $0x144] ss:$16 sps:$4 sm:$0xff]  }
 0x3b7   :  { %v3949_v42 = vpop.f32.mrf.mxu1 }
 0x3b9   :  { %v2521_v36 = vpop.f32.mrf.mxu1 }
 0x3bb   :  { %v3950_v18 = vpop.f32.mrf.mxu1 }
 0x3bc   :  { %v2679_v38 = vpack.c.bf16 %v3950_v18, %v3949_v42 }
 0x3bd   :  { %v2524_v37 = vpop.f32.mrf.mxu1 }
 0x3be   :  { %2720 = vmatpush2.bf16.msra.mxu0 %v2679_v38  ;;  %v2678_v9 = vpack.c.bf16 %v2524_v37, %v2521_v36  ;;  %v4291_v38 = vld [vmem:[#allocation5 + $0x140] ss:$16 sps:$4 sm:$0xff]   ;;  %v4292_v37 = vld [vmem:[#allocation5 + $0x164] ss:$16 sps:$4 sm:$0xff]  }
 0x3bf   :  { %2721 = vmatprep.subr.bf16.mxu0 %v4515_v35 }
 0x3c2   :  { %2722 = vmatpush2.bf16.msra.mxu0 %v2678_v9 }
 0x3c3   :  { %2723 = vmatprep.subr.bf16.mxu0 %v4515_v35 }
 0x3c6   :  { %2724 = vmatpush2.bf16.msra.mxu0 %v2677_v12 }
 0x3c7   :  { %2725 = vmatprep.subr.bf16.mxu0 %v4515_v35  ;;  %v5019_v57 = vpop.f32.mrf.mxu1 }
 0x3c9   :  { %v5022_v4 = vpop.f32.mrf.mxu1 }
 0x3ca   :  { %2726 = vmatpush2.bf16.msra.mxu0 %v2676_v49  ;;  %v4293_v49 = vld [vmem:[#allocation5 + $0x160] ss:$16 sps:$4 sm:$0xff]  }
 0x3cb   :  { %2727 = vmatprep.subr.bf16.mxu0 %v4515_v35  ;;  %v5025_v25 = vpop.f32.mrf.mxu1 }
 0x3cc   :  { %v2681_v59 = vpack.c.bf16 %v5025_v25, %v5019_v57 }
 0x3cd   :  { %v5028_v44 = vpop.f32.mrf.mxu1 }
 0x3ce   :  { %2728 = vmatpush2.bf16.msra.mxu0 %v2675_v10  ;;  %v2680_v58 = vpack.c.bf16 %v5028_v44, %v5022_v4  ;;  %v4294_v10 = vld [vmem:[#allocation5 + $0x184] ss:$16 sps:$4 sm:$0xff]  }
 0x3cf   :  { %2729 = vmatprep.subr.bf16.mxu0 %v4515_v35 }
 0x3d2   :  { %2730 = vmatpush2.bf16.msra.mxu0 %v2674_v55 }
 0x3d3   :  { %2731 = vmatprep.subr.bf16.mxu0 %v4515_v35 }
 0x3d6   :  { %2732 = vmatpush2.bf16.msra.mxu0 %v2673_v56 }
 0x3d7   :  { %2733 = vmatprep.subr.bf16.mxu0 %v4515_v35  ;;  %v3957_v61 = vpop.f32.mrf.mxu1 }
 0x3d9   :  { %v2553_v26 = vpop.f32.mrf.mxu1 }
 0x3da   :  { %2734 = vmatpush2.bf16.msra.mxu0 %v2672_v2  ;;  %v4295_v2 = vld [vmem:[#allocation5 + $0x180] ss:$16 sps:$4 sm:$0xff]  }
 0x3db   :  { %2992 = vmatprep.subr.bf16.mxu0 %v4515_v35  ;;  %v3958_v3 = vpop.f32.mrf.mxu1 }
 0x3dc   :  { %v2683_v17 = vpack.c.bf16 %v3958_v3, %v3957_v61  ;;  %v4296_v61 = vld [vmem:[#allocation5 + $0x1a4] ss:$16 sps:$4 sm:$0xff]  }
 0x3dd   :  { %2736 = vmatmul.mubr.bf16.vlgmr.msra.gmra.mxu0 %v4271_v21  ;;  %v2556_v0 = vpop.f32.mrf.mxu1  ;;  %v4298_v3 = vld [vmem:[#allocation5 + $0x1c4] ss:$16 sps:$4 sm:$0xff]  }
 0x3de   :  { %2743 = vmatprep.mubr.bf16.mxu0 %v4272_v1  ;;  %v2682_v32 = vpack.c.bf16 %v2556_v0, %v2553_v26  ;;  %v4297_v1 = vld [vmem:[#allocation5 + $0x1a0] ss:$16 sps:$4 sm:$0xff]  }
 0x3e5   :  { %2744 = vmatmul.mubr.bf16.gmra.mxu0 %v4273_v15 }
 0x3e6   :  { %2751 = vmatprep.mubr.bf16.mxu0 %v4274_v62  ;;  %v4299_v62 = vld [vmem:[#allocation5 + $0x1c0] ss:$16 sps:$4 sm:$0xff]  }
 0x3e7   :  { %v3961_v39 = vpop.f32.mrf.mxu1 }
 0x3e9   :  { %v2569_v33 = vpop.f32.mrf.mxu1 }
 0x3eb   :  { %v3962_v52 = vpop.f32.mrf.mxu1 }
 0x3ec   :  { %v2685_v60 = vpack.c.bf16 %v3962_v52, %v3961_v39  ;;  %v4300_v39 = vld [vmem:[#allocation5 + $0x1e4] ss:$16 sps:$4 sm:$0xff]  }
 0x3ed   :  { %2752 = vmatmul.mubr.bf16.gmra.mxu0 %v4275_v54  ;;  %v2572_v7 = vpop.f32.mrf.mxu1  ;;  %v4301_v54 = vld [vmem:[#allocation5 + $0x1e0] ss:$16 sps:$4 sm:$0xff]   ;;  %v4302_v52 = vld [vmem:[#allocation5 + $0x204] ss:$16 sps:$4 sm:$0xff]  }
 0x3ee   :  { %2759 = vmatprep.mubr.bf16.mxu0 %v4276_v63  ;;  %v2684_v8 = vpack.c.bf16 %v2572_v7, %v2569_v33  ;;  %v4303_v7 = vld [vmem:[#allocation5 + $0x200] ss:$16 sps:$4 sm:$0xff]  }
 0x3f5   :  { %2760 = vmatmul.mubr.bf16.gmra.mxu0 %v4277_v11  ;;  %v4304_v11 = vld [vmem:[#allocation5 + $0x48] ss:$16 sps:$4 sm:$0xff]  }
 0x3f6   :  { %2767 = vmatprep.mubr.bf16.mxu0 %v4278_v50  ;;  %v4305_v50 = vld [vmem:[#allocation5 + $0x224] ss:$16 sps:$4 sm:$0xff]  }
 0x3f7   :  { %v3965_v45 = vpop.f32.mrf.mxu1 }
 0x3f9   :  { %v2585_v14 = vpop.f32.mrf.mxu1 }
 0x3fb   :  { %v3966_v5 = vpop.f32.mrf.mxu1 }
 0x3fc   :  { %v2687_v29 = vpack.c.bf16 %v3966_v5, %v3965_v45  ;;  %v4306_v45 = vld [vmem:[#allocation5 + $0x6c] ss:$16 sps:$4 sm:$0xff]   ;;  %v4308_v5 = vld [vmem:[#allocation5 + $0x68] ss:$16 sps:$4 sm:$0xff]  }
 0x3fd   :  { %v2588_v34 = vpop.f32.mrf.mxu1  ;;  %2768 = vmatmul.mubr.bf16.gmra.mxu0 %v4279_v24  ;;  %v4312_v24 = vld [vmem:[#allocation5 + $0x88] ss:$16 sps:$4 sm:$0xff]  }
 0x3fe   :  { %2993 = vmatpush1.bf16.msra.mxu0 %v2687_v29  ;;  %3999 = vmatpush1.bf16.msra.mxu1 %v2687_v29  ;;  %v2686_v51 = vpack.c.bf16 %v2588_v34, %v2585_v14  ;;  %v4307_v14 = vld [vmem:[#allocation5 + $0x220] ss:$16 sps:$4 sm:$0xff]   ;;  %v4310_v29 = vld [vmem:[#allocation5 + $0x8c] ss:$16 sps:$4 sm:$0xff]  }
 0x3ff   :  { %2994 = vmatprep.subr.bf16.mxu0 %v4515_v35  ;;  %3984 = vmatprep.subr.bf16.mxu1 %v4515_v35  ;;  %v4311_v34 = vld [vmem:[#allocation5 + $0x240] ss:$16 sps:$4 sm:$0xff]  }
 0x400   :  { %2775 = vmatprep.mubr.bf16.mxu0 %v4280_v23  ;;  %v4314_v23 = vld [vmem:[#allocation5 + $0xac] ss:$16 sps:$4 sm:$0xff]  }
 0x402   :  { %2995 = vmatpush1.bf16.msra.mxu0 %v2686_v51  ;;  %4000 = vmatpush1.bf16.msra.mxu1 %v2686_v51  ;;  %v4313_v51 = vld [vmem:[#allocation5 + $0x264] ss:$16 sps:$4 sm:$0xff]  }
 0x403   :  { %2996 = vmatprep.subr.bf16.mxu0 %v4515_v35  ;;  %3985 = vmatprep.subr.bf16.mxu1 %v4515_v35 }
 0x405   :  { %2776 = vmatmul.mubr.bf16.gmra.mxu0 %v4281_v20  ;;  %v4316_v20 = vld [vmem:[#allocation5 + $0xa8] ss:$16 sps:$4 sm:$0xff]  }
 0x406   :  { %2997 = vmatpush1.bf16.msra.mxu0 %v2685_v60  ;;  %4001 = vmatpush1.bf16.msra.mxu1 %v2685_v60  ;;  %v4315_v60 = vld [vmem:[#allocation5 + $0x260] ss:$16 sps:$4 sm:$0xff]  }
 0x407   :  { %2998 = vmatprep.subr.bf16.mxu0 %v4515_v35  ;;  %3986 = vmatprep.subr.bf16.mxu1 %v4515_v35  ;;  %v5039_v19 = vpop.f32.mrf.mxu1 }
 0x408   :  { %2783 = vmatprep.mubr.bf16.mxu0 %v4282_v16  ;;  %v4318_v16 = vld [vmem:[#allocation5 + $0xcc] ss:$16 sps:$4 sm:$0xff]  }
 0x409   :  { %v5043_v31 = vpop.f32.mrf.mxu1 }
 0x40a   :  { %2999 = vmatpush1.bf16.msra.mxu0 %v2684_v8  ;;  %4002 = vmatpush1.bf16.msra.mxu1 %v2684_v8  ;;  %v4317_v8 = vld [vmem:[#allocation5 + $0x284] ss:$16 sps:$4 sm:$0xff]  }
 0x40b   :  { %3000 = vmatprep.subr.bf16.mxu0 %v4515_v35  ;;  %3987 = vmatprep.subr.bf16.mxu1 %v4515_v35  ;;  %v5049_v27 = vpop.f32.mrf.mxu1 }
 0x40c   :  { %v2689_v33 = vpack.c.bf16 %v5049_v27, %v5039_v19  ;;  %v4320_v19 = vld [vmem:[#allocation5 + $0xc8] ss:$16 sps:$4 sm:$0xff]   ;;  %v4326_v27 = vld [vmem:[#allocation5 + $0x10c] ss:$16 sps:$4 sm:$0xff]  }
 0x40d   :  { %2784 = vmatmul.mubr.bf16.gmra.mxu0 %v4283_v22  ;;  %v5055_v6 = vpop.f32.mrf.mxu1  ;;  %v4321_v22 = vld [vmem:[#allocation5 + $0x2a4] ss:$16 sps:$4 sm:$0xff]  }
 0x40e   :  { %3001 = vmatpush1.bf16.msra.mxu0 %v2683_v17  ;;  %4003 = vmatpush1.bf16.msra.mxu1 %v2683_v17  ;;  %v2688_v63 = vpack.c.bf16 %v5055_v6, %v5043_v31  ;;  %v4319_v17 = vld [vmem:[#allocation5 + $0x280] ss:$16 sps:$4 sm:$0xff]   ;;  %v4324_v31 = vld [vmem:[#allocation5 + $0xe8] ss:$16 sps:$4 sm:$0xff]   ;;  %v4330_v6 = vld [vmem:[#allocation5 + $0x12c] ss:$16 sps:$4 sm:$0xff]  }
 0x40f   :  { %3002 = vmatprep.subr.bf16.mxu0 %v4515_v35  ;;  %3988 = vmatprep.subr.bf16.mxu1 %v4515_v35 }
 0x410   :  { %2791 = vmatprep.mubr.bf16.mxu0 %v4284_v30  ;;  %v4323_v30 = vld [vmem:[#allocation5 + $0x2a0] ss:$16 sps:$4 sm:$0xff]  }
 0x412   :  { %3003 = vmatpush1.bf16.msra.mxu0 %v2682_v32  ;;  %4004 = vmatpush1.bf16.msra.mxu1 %v2682_v32  ;;  %v4322_v32 = vld [vmem:[#allocation5 + $0xec] ss:$16 sps:$4 sm:$0xff]  }
 0x413   :  { %3004 = vmatprep.subr.bf16.mxu0 %v4515_v35  ;;  %3989 = vmatprep.subr.bf16.mxu1 %v4515_v35 }
 0x415   :  { %2792 = vmatmul.mubr.bf16.gmra.mxu0 %v4285_v47  ;;  %v4327_v47 = vld [vmem:[#allocation5 + $0x2c0] ss:$16 sps:$4 sm:$0xff]  }
 0x416   :  { %3005 = vmatpush1.bf16.msra.mxu0 %v2681_v59  ;;  %4005 = vmatpush1.bf16.msra.mxu1 %v2681_v59  ;;  %v4325_v59 = vld [vmem:[#allocation5 + $0x2c4] ss:$16 sps:$4 sm:$0xff]  }
 0x417   :  { %3006 = vmatprep.subr.bf16.mxu0 %v4515_v35  ;;  %3990 = vmatprep.subr.bf16.mxu1 %v4515_v35  ;;  %v3973_v53 = vpop.f32.mrf.mxu1 }
 0x418   :  { %2799 = vmatprep.mubr.bf16.mxu0 %v4286_v48  ;;  %v4329_v48 = vld [vmem:[#allocation5 + $0x2e4] ss:$16 sps:$4 sm:$0xff]  }
 0x419   :  { %v2617_v43 = vpop.f32.mrf.mxu1 }
 0x41a   :  { %3007 = vmatpush1.bf16.msra.mxu0 %v2680_v58  ;;  %4006 = vmatpush1.bf16.msra.mxu1 %v2680_v58  ;;  %v4328_v58 = vld [vmem:[#allocation5 + $0x108] ss:$16 sps:$4 sm:$0xff]  }
 0x41b   :  { %3008 = vmatprep.subr.bf16.mxu0 %v4515_v35  ;;  %3991 = vmatprep.subr.bf16.mxu1 %v4515_v35  ;;  %v3974_v46 = vpop.f32.mrf.mxu1 }
 0x41c   :  { %v2691_v15 = vpack.c.bf16 %v3974_v46, %v3973_v53  ;;  %v4331_v53 = vld [vmem:[#allocation5 + $0x2e0] ss:$16 sps:$4 sm:$0xff]  }
 0x41d   :  { %2800 = vmatmul.mubr.bf16.gmra.mxu0 %v4287_v13  ;;  %v2620_v42 = vpop.f32.mrf.mxu1  ;;  %v4332_v13 = vld [vmem:[#allocation5 + $0x128] ss:$16 sps:$4 sm:$0xff]  }
 0x41e   :  { %2807 = vmatprep.mubr.bf16.mxu0 %v4288_v41  ;;  %v2690_v0 = vpack.c.bf16 %v2620_v42, %v2617_v43  ;;  %v4333_v41 = vld [vmem:[#allocation5 + $0x304] ss:$16 sps:$4 sm:$0xff]   ;;  %v4334_v43 = vld [vmem:[#allocation5 + $0x14c] ss:$16 sps:$4 sm:$0xff]  }
 0x41f   :  { %v4337_v42 = vld [vmem:[#allocation5 + $0x324] ss:$16 sps:$4 sm:$0xff]  }
 0x425   :  { %2808 = vmatmul.mubr.bf16.gmra.mxu0 %v4289_v28  ;;  %v4335_v28 = vld [vmem:[#allocation5 + $0x300] ss:$16 sps:$4 sm:$0xff]  }
 0x426   :  { %2815 = vmatprep.mubr.bf16.mxu0 %v4290_v40  ;;  %v4336_v40 = vld [vmem:[#allocation5 + $0x148] ss:$16 sps:$4 sm:$0xff]  }
 0x427   :  { %v3977_v36 = vpop.f32.mrf.mxu1 }
 0x429   :  { %v2633_v18 = vpop.f32.mrf.mxu1 }
 0x42b   :  { %v3978_v9 = vpop.f32.mrf.mxu1 }
 0x42c   :  { %v2693_v21 = vpack.c.bf16 %v3978_v9, %v3977_v36  ;;  %v4338_v36 = vld [vmem:[#allocation5 + $0x16c] ss:$16 sps:$4 sm:$0xff]  }
 0x42d   :  { %2816 = vmatmul.mubr.bf16.gmra.mxu0 %v4291_v38  ;;  %v2636_v12 = vpop.f32.mrf.mxu1 }
 0x42e   :  { %2823 = vmatprep.mubr.bf16.mxu0 %v4292_v37  ;;  %v2692_v26 = vpack.c.bf16 %v2636_v12, %v2633_v18  ;;  %v4339_v12 = vld [vmem:[#allocation5 + $0x320] ss:$16 sps:$4 sm:$0xff]  }
 0x435   :  { %2824 = vmatmul.mubr.bf16.gmra.mxu0 %v4293_v49  ;;  %v4340_v49 = vld [vmem:[#allocation5 + $0x168] ss:$16 sps:$4 sm:$0xff]  }
 0x436   :  { %2831 = vmatprep.mubr.bf16.mxu0 %v4294_v10  ;;  %v4341_v10 = vld [vmem:[#allocation5 + $0x344] ss:$16 sps:$4 sm:$0xff]  }
 0x437   :  { %v3981_v57 = vpop.f32.mrf.mxu1 }
 0x439   :  { %v2649_v55 = vpop.f32.mrf.mxu1 }
 0x43b   :  { %v3982_v4 = vpop.f32.mrf.mxu1 }
 0x43c   :  { %v2695_v56 = vpack.c.bf16 %v3982_v4, %v3981_v57  ;;  %v4342_v57 = vld [vmem:[#allocation5 + $0x18c] ss:$16 sps:$4 sm:$0xff]  }
 0x43d   :  { %v2652_v25 = vpop.f32.mrf.mxu1  ;;  %2832 = vmatmul.mubr.bf16.gmra.mxu0 %v4295_v2  ;;  %v4343_v2 = vld [vmem:[#allocation5 + $0x340] ss:$16 sps:$4 sm:$0xff]  }
 0x43e   :  { %3009 = vmatpush2.bf16.msra.mxu0 %v2695_v56  ;;  %4007 = vmatpush2.bf16.msra.mxu1 %v2695_v56  ;;  %v2694_v44 = vpack.c.bf16 %v2652_v25, %v2649_v55 }
 0x43f   :  { %3010 = vmatprep.subr.bf16.mxu0 %v4515_v35  ;;  %3992 = vmatprep.subr.bf16.mxu1 %v4515_v35 }
 0x440   :  { %2839 = vmatprep.mubr.bf16.mxu0 %v4296_v61  ;;  %v4345_v61 = vld [vmem:[#allocation5 + $0x364] ss:$16 sps:$4 sm:$0xff]  }
 0x442   :  { %3011 = vmatpush2.bf16.msra.mxu0 %v2694_v44  ;;  %4008 = vmatpush2.bf16.msra.mxu1 %v2694_v44  ;;  %v4344_v44 = vld [vmem:[#allocation5 + $0x188] ss:$16 sps:$4 sm:$0xff]  }
 0x443   :  { %3012 = vmatprep.subr.bf16.mxu0 %v4515_v35  ;;  %3993 = vmatprep.subr.bf16.mxu1 %v4515_v35 }
 0x445   :  { %2840 = vmatmul.mubr.bf16.gmra.mxu0 %v4297_v1 }
 0x446   :  { %3013 = vmatpush2.bf16.msra.mxu0 %v2693_v21  ;;  %4009 = vmatpush2.bf16.msra.mxu1 %v2693_v21  ;;  %v4346_v21 = vld [vmem:[#allocation5 + $0x1ac] ss:$16 sps:$4 sm:$0xff]  }
 0x447   :  { %3014 = vmatprep.subr.bf16.mxu0 %v4515_v35  ;;  %3994 = vmatprep.subr.bf16.mxu1 %v4515_v35 }
 0x448   :  { %2847 = vmatprep.mubr.bf16.mxu0 %v4298_v3 }
 0x44a   :  { %3015 = vmatpush2.bf16.msra.mxu0 %v2692_v26  ;;  %4010 = vmatpush2.bf16.msra.mxu1 %v2692_v26 }
 0x44b   :  { %3016 = vmatprep.subr.bf16.mxu0 %v4515_v35  ;;  %3995 = vmatprep.subr.bf16.mxu1 %v4515_v35 }
 0x44d   :  { %2848 = vmatmul.mubr.bf16.gmra.mxu0 %v4299_v62  ;;  %v4347_v62 = vld [vmem:[#allocation5 + $0x360] ss:$16 sps:$4 sm:$0xff]  }
 0x44e   :  { %3017 = vmatpush2.bf16.msra.mxu0 %v2691_v15  ;;  %4011 = vmatpush2.bf16.msra.mxu1 %v2691_v15 }
 0x44f   :  { %3018 = vmatprep.subr.bf16.mxu0 %v4515_v35  ;;  %3996 = vmatprep.subr.bf16.mxu1 %v4515_v35 }
 0x450   :  { %2855 = vmatprep.mubr.bf16.mxu0 %v4300_v39  ;;  %v4349_v39 = vld [vmem:[#allocation5 + $0x384] ss:$16 sps:$4 sm:$0xff]  }
 0x452   :  { %3019 = vmatpush2.bf16.msra.mxu0 %v2690_v0  ;;  %4012 = vmatpush2.bf16.msra.mxu1 %v2690_v0  ;;  %v4348_v0 = vld [vmem:[#allocation5 + $0x1a8] ss:$16 sps:$4 sm:$0xff]  }
 0x453   :  { %3020 = vmatprep.subr.bf16.mxu0 %v4515_v35  ;;  %3997 = vmatprep.subr.bf16.mxu1 %v4515_v35 }
 0x455   :  { %2856 = vmatmul.mubr.bf16.gmra.mxu0 %v4301_v54 }
 0x456   :  { %3021 = vmatpush2.bf16.msra.mxu0 %v2689_v33  ;;  %4013 = vmatpush2.bf16.msra.mxu1 %v2689_v33  ;;  %v4350_v33 = vld [vmem:[#allocation5 + $0x1cc] ss:$16 sps:$4 sm:$0xff]  }
 0x457   :  { %3022 = vmatprep.subr.bf16.mxu0 %v4515_v35  ;;  %3998 = vmatprep.subr.bf16.mxu1 %v4515_v35  ;;  %v4309_v35 = vld [vmem:[#allocation5 + $0x244] ss:$16 sps:$4 sm:$0xff]  }
 0x458   :  { %2863 = vmatprep.mubr.bf16.mxu0 %v4302_v52 }
 0x45a   :  { %3023 = vmatpush2.bf16.msra.mxu0 %v2688_v63  ;;  %4014 = vmatpush2.bf16.msra.mxu1 %v2688_v63 }
 0x45d   :  { %2864 = vmatmul.mubr.bf16.gmra.mxu0 %v4303_v7  ;;  %3041 = vmatmul.mubr.bf16.vlgmr.msra.gmra.mxu1 %v4304_v11  ;;  %v4351_v11 = vld [vmem:[#allocation5 + $0x380] ss:$16 sps:$4 sm:$0xff]  }
 0x45e   :  { %2871 = vmatprep.mubr.bf16.mxu0 %v4305_v50  ;;  %3048 = vmatprep.mubr.bf16.mxu1 %v4306_v45  ;;  %v4352_v50 = vld [vmem:[#allocation5 + $0x1c8] ss:$16 sps:$4 sm:$0xff]   ;;  %v4353_v45 = vld [vmem:[#allocation5 + $0x3a4] ss:$16 sps:$4 sm:$0xff]  }
 0x465   :  { %2872 = vmatmul.mubr.bf16.gmra.mxu0 %v4307_v14  ;;  %3049 = vmatmul.mubr.bf16.gmra.mxu1 %v4308_v5  ;;  %v4354_v14 = vld [vmem:[#allocation5 + $0x1ec] ss:$16 sps:$4 sm:$0xff]  }
 0x466   :  { %2879 = vmatprep.mubr.bf16.mxu0 %v4309_v35  ;;  %3056 = vmatprep.mubr.bf16.mxu1 %v4310_v29 }
 0x46d   :  { %2880 = vmatmul.mubr.bf16.gmra.mxu0 %v4311_v34  ;;  %3057 = vmatmul.mubr.bf16.gmra.mxu1 %v4312_v24  ;;  %v4355_v24 = vld [vmem:[#allocation5 + $0x3a0] ss:$16 sps:$4 sm:$0xff]  }
 0x46e   :  { %2887 = vmatprep.mubr.bf16.mxu0 %v4313_v51  ;;  %3064 = vmatprep.mubr.bf16.mxu1 %v4314_v23  ;;  %v4356_v51 = vld [vmem:[#allocation5 + $0x1e8] ss:$16 sps:$4 sm:$0xff]   ;;  %v4357_v23 = vld [vmem:[#allocation5 + $0x3c4] ss:$16 sps:$4 sm:$0xff]  }
 0x475   :  { %2888 = vmatmul.mubr.bf16.gmra.mxu0 %v4315_v60  ;;  %3065 = vmatmul.mubr.bf16.gmra.mxu1 %v4316_v20  ;;  %v4358_v60 = vld [vmem:[#allocation5 + $0x20c] ss:$16 sps:$4 sm:$0xff]  }
 0x476   :  { %2895 = vmatprep.mubr.bf16.mxu0 %v4317_v8  ;;  %3072 = vmatprep.mubr.bf16.mxu1 %v4318_v16 }
 0x47d   :  { %2896 = vmatmul.mubr.bf16.gmra.mxu0 %v4319_v17  ;;  %3073 = vmatmul.mubr.bf16.gmra.mxu1 %v4320_v19  ;;  %v4359_v19 = vld [vmem:[#allocation5 + $0x3c0] ss:$16 sps:$4 sm:$0xff]  }
 0x47e   :  { %2903 = vmatprep.mubr.bf16.mxu0 %v4321_v22  ;;  %3080 = vmatprep.mubr.bf16.mxu1 %v4322_v32  ;;  %v4360_v22 = vld [vmem:[#allocation5 + $0x208] ss:$16 sps:$4 sm:$0xff]   ;;  %v4361_v32 = vld [vmem:[#allocation5 + $0x3e4] ss:$16 sps:$4 sm:$0xff]  }
 0x485   :  { %2904 = vmatmul.mubr.bf16.gmra.mxu0 %v4323_v30  ;;  %3081 = vmatmul.mubr.bf16.gmra.mxu1 %v4324_v31  ;;  %v4362_v30 = vld [vmem:[#allocation5 + $0x22c] ss:$16 sps:$4 sm:$0xff]  }
 0x486   :  { %2911 = vmatprep.mubr.bf16.mxu0 %v4325_v59  ;;  %3088 = vmatprep.mubr.bf16.mxu1 %v4326_v27 }
 0x48d   :  { %2912 = vmatmul.mubr.bf16.gmra.mxu0 %v4327_v47  ;;  %3089 = vmatmul.mubr.bf16.gmra.mxu1 %v4328_v58  ;;  %v4363_v58 = vld [vmem:[#allocation5 + $0x3e0] ss:$16 sps:$4 sm:$0xff]  }
 0x48e   :  { %2919 = vmatprep.mubr.bf16.mxu0 %v4329_v48  ;;  %3096 = vmatprep.mubr.bf16.mxu1 %v4330_v6  ;;  %v4364_v48 = vld [vmem:[#allocation5 + $0x228] ss:$16 sps:$4 sm:$0xff]   ;;  %v4365_v6 = vld [vmem:[#allocation5 + $0xc] ss:$16 sps:$4 sm:$0xff]  }
 0x495   :  { %2920 = vmatmul.mubr.bf16.gmra.mxu0 %v4331_v53  ;;  %3097 = vmatmul.mubr.bf16.gmra.mxu1 %v4332_v13  ;;  %v4366_v53 = vld [vmem:[#allocation5 + $0x24c] ss:$16 sps:$4 sm:$0xff]  }
 0x496   :  { %2927 = vmatprep.mubr.bf16.mxu0 %v4333_v41  ;;  %3104 = vmatprep.mubr.bf16.mxu1 %v4334_v43 }
 0x49d   :  { %v5077_v46 = vpop.f32.mrf.mxu0  ;;  %2928 = vmatmul.mubr.bf16.gmra.mxu0 %v4335_v28  ;;  %3105 = vmatmul.mubr.bf16.gmra.mxu1 %v4336_v40  ;;  %v4367_v40 = vld [vmem:[#allocation5 + $0x8] ss:$16 sps:$4 sm:$0xff]  }
 0x49e   :  { %2935 = vmatprep.mubr.bf16.mxu0 %v4337_v42  ;;  %3112 = vmatprep.mubr.bf16.mxu1 %v4338_v36  ;;  %v4368_v42 = vld [vmem:[#allocation5 + $0x248] ss:$16 sps:$4 sm:$0xff]   ;;  %v4369_v36 = vld [vmem:[#allocation5 + $0x2c] ss:$16 sps:$4 sm:$0xff]  }
 0x49f   :  { %v2739_v18 = vpop.f32.mrf.mxu0 }
 0x4a0   :  { %v4370_v18 = vld [vmem:[#allocation5 + $0x26c] ss:$16 sps:$4 sm:$0xff]  }
 0x4a1   :  { %v5079_v38 = vpop.f32.mrf.mxu0 }
 0x4a3   :  { %v2742_v37 = vpop.f32.mrf.mxu0 }
 0x4a5   :  { %v5081_v9 = vpop.f32.mrf.mxu0  ;;  %2936 = vmatmul.mubr.bf16.gmra.mxu0 %v4339_v12  ;;  %3113 = vmatmul.mubr.bf16.gmra.mxu1 %v4340_v49 }
 0x4a6   :  { %2943 = vmatprep.mubr.bf16.mxu0 %v4341_v10  ;;  %3120 = vmatprep.mubr.bf16.mxu1 %v4342_v57  ;;  %v4371_v57 = vld [vmem:[#allocation5 + $0x28] ss:$16 sps:$4 sm:$0xff]  }
 0x4a7   :  { %v2747_v55 = vpop.f32.mrf.mxu0 }
 0x4a8   :  { %v4372_v55 = vld [vmem:[#allocation5 + $0x268] ss:$16 sps:$4 sm:$0xff]  }
 0x4a9   :  { %v5083_v4 = vpop.f32.mrf.mxu0 }
 0x4ab   :  { %v2750_v56 = vpop.f32.mrf.mxu0 }
 0x4ac   :  { %v4373_v56 = vld [vmem:[#allocation5 + $0x28c] ss:$16 sps:$4 sm:$0xff]  }
 0x4ad   :  { %v5085_v25 = vpop.f32.mrf.mxu0  ;;  %2944 = vmatmul.mubr.bf16.gmra.mxu0 %v4343_v2  ;;  %3121 = vmatmul.mubr.bf16.gmra.mxu1 %v4344_v44 }
 0x4ae   :  { %2951 = vmatprep.mubr.bf16.mxu0 %v4345_v61  ;;  %3128 = vmatprep.mubr.bf16.mxu1 %v4346_v21 }
 0x4af   :  { %v2755_v1 = vpop.f32.mrf.mxu0 }
 0x4b0   :  { %v4374_v1 = vld [vmem:[#allocation5 + $0x288] ss:$16 sps:$4 sm:$0xff]  }
 0x4b1   :  { %v5087_v26 = vpop.f32.mrf.mxu0 }
 0x4b3   :  { %v2758_v3 = vpop.f32.mrf.mxu0 }
 0x4b4   :  { %v4375_v3 = vld [vmem:[#allocation5 + $0x2ac] ss:$16 sps:$4 sm:$0xff]  }
 0x4b5   :  { %v5089_v15 = vpop.f32.mrf.mxu0  ;;  %2952 = vmatmul.mubr.bf16.gmra.mxu0 %v4347_v62  ;;  %3129 = vmatmul.mubr.bf16.gmra.mxu1 %v4348_v0 }
 0x4b6   :  { %2959 = vmatprep.mubr.bf16.mxu0 %v4349_v39  ;;  %3136 = vmatprep.mubr.bf16.mxu1 %v4350_v33 }
 0x4b7   :  { %v2763_v54 = vpop.f32.mrf.mxu0 }
 0x4b8   :  { %v4376_v54 = vld [vmem:[#allocation5 + $0x2a8] ss:$16 sps:$4 sm:$0xff]  }
 0x4b9   :  { %v5091_v63 = vpop.f32.mrf.mxu0 }
 0x4bb   :  { %v2766_v52 = vpop.f32.mrf.mxu0 }
 0x4bc   :  { %v4377_v52 = vld [vmem:[#allocation5 + $0x2cc] ss:$16 sps:$4 sm:$0xff]  }
 0x4bd   :  { %v5093_v7 = vpop.f32.mrf.mxu0  ;;  %2960 = vmatmul.mubr.bf16.gmra.mxu0 %v4351_v11  ;;  %3137 = vmatmul.mubr.bf16.gmra.mxu1 %v4352_v50 }
 0x4be   :  { %2967 = vmatprep.mubr.bf16.mxu0 %v4353_v45  ;;  %3144 = vmatprep.mubr.bf16.mxu1 %v4354_v14 }
 0x4bf   :  { %v2771_v5 = vpop.f32.mrf.mxu0 }
 0x4c0   :  { %v4378_v5 = vld [vmem:[#allocation5 + $0x2c8] ss:$16 sps:$4 sm:$0xff]  }
 0x4c1   :  { %v5095_v35 = vpop.f32.mrf.mxu0 }
 0x4c3   :  { %v2774_v29 = vpop.f32.mrf.mxu0 }
 0x4c4   :  { %v4379_v29 = vld [vmem:[#allocation5 + $0x2ec] ss:$16 sps:$4 sm:$0xff]  }
 0x4c5   :  { %v5097_v34 = vpop.f32.mrf.mxu0  ;;  %2968 = vmatmul.mubr.bf16.gmra.mxu0 %v4355_v24  ;;  %3145 = vmatmul.mubr.bf16.gmra.mxu1 %v4356_v51 }
 0x4c6   :  { %2975 = vmatprep.mubr.bf16.mxu0 %v4357_v23  ;;  %3152 = vmatprep.mubr.bf16.mxu1 %v4358_v60 }
 0x4c7   :  { %v2779_v20 = vpop.f32.mrf.mxu0 }
 0x4c8   :  { %v4380_v20 = vld [vmem:[#allocation5 + $0x2e8] ss:$16 sps:$4 sm:$0xff]  }
 0x4c9   :  { %v5099_v8 = vpop.f32.mrf.mxu0 }
 0x4cb   :  { %v2782_v16 = vpop.f32.mrf.mxu0 }
 0x4cc   :  { %v4381_v16 = vld [vmem:[#allocation5 + $0x30c] ss:$16 sps:$4 sm:$0xff]  }
 0x4cd   :  { %v5101_v17 = vpop.f32.mrf.mxu0  ;;  %2976 = vmatmul.mubr.bf16.gmra.mxu0 %v4359_v19  ;;  %3153 = vmatmul.mubr.bf16.gmra.mxu1 %v4360_v22 }
 0x4ce   :  { %2983 = vmatprep.mubr.bf16.mxu0 %v4361_v32  ;;  %3160 = vmatprep.mubr.bf16.mxu1 %v4362_v30 }
 0x4cf   :  { %v2787_v31 = vpop.f32.mrf.mxu0 }
 0x4d0   :  { %v4382_v31 = vld [vmem:[#allocation5 + $0x308] ss:$16 sps:$4 sm:$0xff]  }
 0x4d1   :  { %v5103_v59 = vpop.f32.mrf.mxu0 }
 0x4d3   :  { %v2790_v27 = vpop.f32.mrf.mxu0 }
 0x4d4   :  { %v4383_v27 = vld [vmem:[#allocation5 + $0x32c] ss:$16 sps:$4 sm:$0xff]  }
 0x4d5   :  { %v5105_v47 = vpop.f32.mrf.mxu0  ;;  %2984 = vmatmul.mubr.bf16.gmra.mxu0 %v4363_v58  ;;  %3161 = vmatmul.mubr.bf16.gmra.mxu1 %v4364_v48 }
 0x4d6   :  { %3024 = vmatprep.mubr.bf16.mxu0 %v4365_v6  ;;  %3168 = vmatprep.mubr.bf16.mxu1 %v4366_v53 }
 0x4d7   :  { %v2795_v13 = vpop.f32.mrf.mxu0 }
 0x4d8   :  { %v4384_v13 = vld [vmem:[#allocation5 + $0x328] ss:$16 sps:$4 sm:$0xff]  }
 0x4d9   :  { %v5107_v41 = vpop.f32.mrf.mxu0 }
 0x4db   :  { %v2798_v43 = vpop.f32.mrf.mxu0 }
 0x4dc   :  { %v4385_v43 = vld [vmem:[#allocation5 + $0x34c] ss:$16 sps:$4 sm:$0xff]  }
 0x4dd   :  { %v5109_v28 = vpop.f32.mrf.mxu0  ;;  %3025 = vmatmul.mubr.bf16.vlgmr.msra.gmra.mxu0 %v4367_v40  ;;  %3169 = vmatmul.mubr.bf16.gmra.mxu1 %v4368_v42 }
 0x4de   :  { %3032 = vmatprep.mubr.bf16.mxu0 %v4369_v36  ;;  %3176 = vmatprep.mubr.bf16.mxu1 %v4370_v18  ;;  %v5144_v36 = vld [vmem:[%s5426_s6] ss:$0 sm:$0xff] }
 0x4df   :  { %v2803_v37 = vpop.f32.mrf.mxu0 }
 0x4e0   :  { %v2754_v37 = vadd.f32 %v5144_v36, %v5085_v25 }
 0x4e1   :  { %v5111_v12 = vpop.f32.mrf.mxu0 }
 0x4e3   :  { %v2806_v49 = vpop.f32.mrf.mxu0 }
 0x4e5   :  { %v5113_v10 = vpop.f32.mrf.mxu0  ;;  %3033 = vmatmul.mubr.bf16.gmra.mxu0 %v4371_v57  ;;  %3177 = vmatmul.mubr.bf16.gmra.mxu1 %v4372_v55  ;;  %v5153_v55 = vld [vmem:[%s5427_s7] ss:$0 sm:$0xff] }
 0x4e6   :  { %3184 = vmatprep.mubr.bf16.mxu1 %v4373_v56  ;;  %v4386_v56 = vld [vmem:[#allocation5 + $0x348] ss:$16 sps:$4 sm:$0xff]  }
 0x4e7   :  { %v2811_v2 = vpop.f32.mrf.mxu0 }
 0x4e9   :  { %v5115_v44 = vpop.f32.mrf.mxu0 }
 0x4eb   :  { %v2814_v61 = vpop.f32.mrf.mxu0 }
 0x4ec   :  { %v4387_v61 = vld [vmem:[#allocation5 + $0x36c] ss:$16 sps:$4 sm:$0xff]  }
 0x4ed   :  { %v5117_v21 = vpop.f32.mrf.mxu0  ;;  %3185 = vmatmul.mubr.bf16.gmra.mxu1 %v4374_v1 }
 0x4ee   :  { %3192 = vmatprep.mubr.bf16.mxu1 %v4375_v3 }
 0x4ef   :  { %v2819_v62 = vpop.f32.mrf.mxu0 }
 0x4f0   :  { %v2757_v62 = vadd.f32 %v5144_v36, %v5087_v26 }
 0x4f1   :  { %v5119_v0 = vpop.f32.mrf.mxu0 }
 0x4f3   :  { %v2822_v39 = vpop.f32.mrf.mxu0 }
 0x4f5   :  { %v5121_v33 = vpop.f32.mrf.mxu0  ;;  %3193 = vmatmul.mubr.bf16.gmra.mxu1 %v4376_v54 }
 0x4f6   :  { %3200 = vmatprep.mubr.bf16.mxu1 %v4377_v52 }
 0x4f7   :  { %v2827_v11 = vpop.f32.mrf.mxu0 }
 0x4f9   :  { %v5123_v50 = vpop.f32.mrf.mxu0 }
 0x4fb   :  { %v2830_v45 = vpop.f32.mrf.mxu0 }
 0x4fd   :  { %v5125_v14 = vpop.f32.mrf.mxu0  ;;  %3201 = vmatmul.mubr.bf16.gmra.mxu1 %v4378_v5 }
 0x4fe   :  { %3208 = vmatprep.mubr.bf16.mxu1 %v4379_v29  ;;  %v2762_v29 = vadd.f32 %v5144_v36, %v5089_v15 }
 0x4ff   :  { %v2835_v24 = vpop.f32.mrf.mxu0 }
 0x501   :  { %v5127_v51 = vpop.f32.mrf.mxu0 }
 0x503   :  { %v2838_v23 = vpop.f32.mrf.mxu0 }
 0x505   :  { %v5129_v60 = vpop.f32.mrf.mxu0  ;;  %3209 = vmatmul.mubr.bf16.gmra.mxu1 %v4380_v20  ;;  %v4388_v20 = vld [vmem:[#allocation5 + $0x368] ss:$16 sps:$4 sm:$0xff]  }
 0x506   :  { %3216 = vmatprep.mubr.bf16.mxu1 %v4381_v16 }
 0x507   :  { %v2843_v19 = vpop.f32.mrf.mxu0 }
 0x509   :  { %v5131_v22 = vpop.f32.mrf.mxu0 }
 0x50b   :  { %v2846_v32 = vpop.f32.mrf.mxu0 }
 0x50c   :  { %v4389_v32 = vld [vmem:[#allocation5 + $0x38c] ss:$16 sps:$4 sm:$0xff]  }
 0x50d   :  { %v5133_v30 = vpop.f32.mrf.mxu0  ;;  %3217 = vmatmul.mubr.bf16.gmra.mxu1 %v4382_v31 }
 0x50e   :  { %3224 = vmatprep.mubr.bf16.mxu1 %v4383_v27 }
 0x50f   :  { %v2851_v58 = vpop.f32.mrf.mxu0 }
 0x510   :  { %v2765_v58 = vadd.f32 %v5144_v36, %v5091_v63 }
 0x511   :  { %v5135_v48 = vpop.f32.mrf.mxu0 }
 0x513   :  { %v2854_v6 = vpop.f32.mrf.mxu0 }
 0x515   :  { %v5137_v53 = vpop.f32.mrf.mxu0  ;;  %3225 = vmatmul.mubr.bf16.gmra.mxu1 %v4384_v13 }
 0x516   :  { %3232 = vmatprep.mubr.bf16.mxu1 %v4385_v43 }
 0x517   :  { %v2859_v40 = vpop.f32.mrf.mxu0 }
 0x519   :  { %v5139_v42 = vpop.f32.mrf.mxu0 }
 0x51b   :  { %v2862_v18 = vpop.f32.mrf.mxu0 }
 0x51d   :  { %v5148_v49 = vpop.f32.mrf.mxu0  ;;  %v3042_v57 = vpop.f32.mrf.mxu1  ;;  %3233 = vmatmul.mubr.bf16.gmra.mxu1 %v4386_v56 }
 0x51e   :  { %v3043_v2 = vadd.f32 %v3042_v57, %v2754_v37  ;;  %3240 = vmatprep.mubr.bf16.mxu1 %v4387_v61  ;;  %v2770_v57 = vadd.f32 %v5144_v36, %v5093_v7  ;;  %v4390_v61 = vld [vmem:[#allocation5 + $0x388] ss:$16 sps:$4 sm:$0xff]  }
 0x51f   :  { %v2867_v1 = vpop.f32.mrf.mxu0  ;;  %v3044_v3 = vpop.f32.mrf.mxu1 }
 0x520   :  { %vm3285_vm0 = vcmp.gt.f32.partialorder %v3043_v2, 0.0  ;;  %v3356_v25 = vmul.f32 %v5153_v55, %v3043_v2 }
 0x521   :  { %v5158_v39 = vpop.f32.mrf.mxu0  ;;  %v3045_v54 = vpop.f32.mrf.mxu1 }
 0x522   :  { %v3420_v52 = vsel %vm3285_vm0, %v3043_v2, %v3356_v25  ;;  %v3046_v11 = vadd.f32 %v3045_v54, %v2757_v62  ;;  %v4391_v62 = vld [vmem:[#allocation5 + $0x3ac] ss:$16 sps:$4 sm:$0xff]  }
 0x523   :  { %v2870_v45 = vpop.f32.mrf.mxu0  ;;  %3484 = vst [vmem:[#allocation10 + $0x20] sm:$0xff] %v3420_v52  ;;  %v3047_v5 = vpop.f32.mrf.mxu1  ;;  %v2773_v52 = vadd.f32 %v5144_v36, %v5095_v35 }
 0x524   :  { %vm3286_vm1 = vcmp.gt.f32.partialorder %v3046_v11, 0.0  ;;  %v3357_v24 = vmul.f32 %v5153_v55, %v3046_v11 }
 0x525   :  { %v5163_v23 = vpop.f32.mrf.mxu0  ;;  %v3050_v26 = vpop.f32.mrf.mxu1  ;;  %3241 = vmatmul.mubr.bf16.gmra.mxu1 %v4388_v20  ;;  %v2778_v20 = vadd.f32 %v5144_v36, %v5097_v34 }
 0x526   :  { %v3421_v16 = vsel %vm3286_vm1, %v3046_v11, %v3357_v24  ;;  %v3051_v19 = vadd.f32 %v3050_v26, %v2762_v29  ;;  %3248 = vmatprep.mubr.bf16.mxu1 %v4389_v32  ;;  %v4392_v32 = vld [vmem:[#allocation5 + $0x3a8] ss:$16 sps:$4 sm:$0xff]  }
 0x527   :  { %v2875_v31 = vpop.f32.mrf.mxu0  ;;  %3485 = vst [vmem:[#allocation10 + $0x28] sm:$0xff] %v3421_v16  ;;  %v3052_v27 = vpop.f32.mrf.mxu1 }
 0x528   :  { %vm3287_vm2 = vcmp.gt.f32.partialorder %v3051_v19, 0.0  ;;  %v3358_v15 = vmul.f32 %v5153_v55, %v3051_v19 }
 0x529   :  { %v5168_v6 = vpop.f32.mrf.mxu0  ;;  %v3053_v13 = vpop.f32.mrf.mxu1 }
 0x52a   :  { %v3422_v43 = vsel %vm3287_vm2, %v3051_v19, %v3358_v15  ;;  %v3054_v40 = vadd.f32 %v3053_v13, %v2765_v58  ;;  %v4393_v58 = vld [vmem:[#allocation5 + $0x3cc] ss:$16 sps:$4 sm:$0xff]  }
 0x52b   :  { %v2878_v18 = vpop.f32.mrf.mxu0  ;;  %3486 = vst [vmem:[#allocation10 + $0x30] sm:$0xff] %v3422_v43  ;;  %v3055_v37 = vpop.f32.mrf.mxu1  ;;  %v2781_v43 = vadd.f32 %v5144_v36, %v5099_v8 }
 0x52c   :  { %vm3288_vm3 = vcmp.gt.f32.partialorder %v3054_v40, 0.0  ;;  %v3359_v56 = vmul.f32 %v5153_v55, %v3054_v40 }
 0x52d   :  { %v5173_v2 = vpop.f32.mrf.mxu0  ;;  %v3058_v63 = vpop.f32.mrf.mxu1  ;;  %3249 = vmatmul.mubr.bf16.gmra.mxu1 %v4390_v61  ;;  %v2786_v61 = vadd.f32 %v5144_v36, %v5101_v17 }
 0x52e   :  { %v3423_v1 = vsel %vm3288_vm3, %v3054_v40, %v3359_v56  ;;  %v3059_v3 = vadd.f32 %v3058_v63, %v2770_v57  ;;  %3256 = vmatprep.mubr.bf16.mxu1 %v4391_v62  ;;  %v4394_v62 = vld [vmem:[#allocation5 + $0x3c8] ss:$16 sps:$4 sm:$0xff]  }
 0x52f   :  { %v2883_v25 = vpop.f32.mrf.mxu0  ;;  %3487 = vst [vmem:[#allocation10 + $0x38] sm:$0xff] %v3423_v1  ;;  %v3060_v54 = vpop.f32.mrf.mxu1 }
 0x530   :  { %vm3289_vm4 = vcmp.gt.f32.partialorder %v3059_v3, 0.0  ;;  %v3360_v7 = vmul.f32 %v5153_v55, %v3059_v3 }
 0x531   :  { %v5178_v11 = vpop.f32.mrf.mxu0  ;;  %v3061_v45 = vpop.f32.mrf.mxu1 }
 0x532   :  { %v3424_v5 = vsel %vm3289_vm4, %v3059_v3, %v3360_v7  ;;  %v3062_v29 = vadd.f32 %v3061_v45, %v2773_v52  ;;  %v4395_v52 = vld [vmem:[#allocation5 + $0x3ec] ss:$16 sps:$4 sm:$0xff]  }
 0x533   :  { %v2886_v24 = vpop.f32.mrf.mxu0  ;;  %3488 = vst [vmem:[#allocation10 + $0x40] sm:$0xff] %v3424_v5  ;;  %v3063_v26 = vpop.f32.mrf.mxu1  ;;  %v2789_v5 = vadd.f32 %v5144_v36, %v5103_v59 }
 0x534   :  { %vm3290_vm5 = vcmp.gt.f32.partialorder %v3062_v29, 0.0  ;;  %v3361_v16 = vmul.f32 %v5153_v55, %v3062_v29 }
 0x535   :  { %v5183_v19 = vpop.f32.mrf.mxu0  ;;  %v3066_v35 = vpop.f32.mrf.mxu1  ;;  %3257 = vmatmul.mubr.bf16.gmra.mxu1 %v4392_v32  ;;  %v2794_v32 = vadd.f32 %v5144_v36, %v5105_v47 }
 0x536   :  { %v3425_v31 = vsel %vm3290_vm5, %v3062_v29, %v3361_v16  ;;  %v3067_v27 = vadd.f32 %v3066_v35, %v2778_v20  ;;  %3264 = vmatprep.mubr.bf16.mxu1 %v4393_v58  ;;  %v4396_v58 = vld [vmem:[#allocation5 + $0x3e8] ss:$16 sps:$4 sm:$0xff]  }
 0x537   :  { %v2891_v15 = vpop.f32.mrf.mxu0  ;;  %3489 = vst [vmem:[#allocation10 + $0x48] sm:$0xff] %v3425_v31  ;;  %v3068_v13 = vpop.f32.mrf.mxu1 }
 0x538   :  { %vm3291_vm6 = vcmp.gt.f32.partialorder %v3067_v27, 0.0  ;;  %v3362_v34 = vmul.f32 %v5153_v55, %v3067_v27 }
 0x539   :  { %v5188_v40 = vpop.f32.mrf.mxu0  ;;  %v3069_v18 = vpop.f32.mrf.mxu1 }
 0x53a   :  { %v3426_v37 = vsel %vm3291_vm6, %v3067_v27, %v3362_v34  ;;  %v3070_v57 = vadd.f32 %v3069_v18, %v2781_v43  ;;  %v2797_v18 = vadd.f32 %v5144_v36, %v5107_v41 }
 0x53b   :  { %v2894_v56 = vpop.f32.mrf.mxu0  ;;  %3490 = vst [vmem:[#allocation10 + $0x50] sm:$0xff] %v3426_v37  ;;  %v3071_v63 = vpop.f32.mrf.mxu1 }
 0x53c   :  { %vm3292_vm7 = vcmp.gt.f32.partialorder %v3070_v57, 0.0  ;;  %v3363_v1 = vmul.f32 %v5153_v55, %v3070_v57 }
 0x53d   :  { %v5193_v3 = vpop.f32.mrf.mxu0  ;;  %v3074_v8 = vpop.f32.mrf.mxu1  ;;  %3265 = vmatmul.mubr.bf16.gmra.mxu1 %v4394_v62 }
 0x53e   :  { %v3427_v25 = vsel %vm3292_vm7, %v3070_v57, %v3363_v1  ;;  %v3075_v54 = vadd.f32 %v3074_v8, %v2786_v61  ;;  %3272 = vmatprep.mubr.bf16.mxu1 %v4395_v52  ;;  %v2802_v8 = vadd.f32 %v5144_v36, %v5109_v28 }
 0x53f   :  { %v2899_v7 = vpop.f32.mrf.mxu0  ;;  %3491 = vst [vmem:[#allocation10 + $0x58] sm:$0xff] %v3427_v25  ;;  %v3076_v45 = vpop.f32.mrf.mxu1 }
 0x540   :  { %vm3293_vm8 = vcmp.gt.f32.partialorder %v3075_v54, 0.0  ;;  %v3364_v17 = vmul.f32 %v5153_v55, %v3075_v54 }
 0x541   :  { %v5198_v29 = vpop.f32.mrf.mxu0  ;;  %v3077_v24 = vpop.f32.mrf.mxu1 }
 0x542   :  { %v3428_v26 = vsel %vm3293_vm8, %v3075_v54, %v3364_v17  ;;  %v3078_v20 = vadd.f32 %v3077_v24, %v2789_v5  ;;  %v2805_v5 = vadd.f32 %v5144_v36, %v5111_v12 }
 0x543   :  { %v2902_v16 = vpop.f32.mrf.mxu0  ;;  %3492 = vst [vmem:[#allocation10 + $0x60] sm:$0xff] %v3428_v26  ;;  %v3079_v35 = vpop.f32.mrf.mxu1 }
 0x544   :  { %vm3294_vm9 = vcmp.gt.f32.partialorder %v3078_v20, 0.0  ;;  %v3365_v31 = vmul.f32 %v5153_v55, %v3078_v20 }
 0x545   :  { %v5203_v27 = vpop.f32.mrf.mxu0  ;;  %v3082_v59 = vpop.f32.mrf.mxu1  ;;  %3273 = vmatmul.mubr.bf16.gmra.mxu1 %v4396_v58 }
 0x546   :  { %v3429_v15 = vsel %vm3294_vm9, %v3078_v20, %v3365_v31  ;;  %v3083_v13 = vadd.f32 %v3082_v59, %v2794_v32  ;;  %v2810_v32 = vadd.f32 %v5144_v36, %v5113_v10 }
 0x547   :  { %v2907_v43 = vpop.f32.mrf.mxu0  ;;  %3493 = vst [vmem:[#allocation10 + $0x68] sm:$0xff] %v3429_v15  ;;  %v3084_v34 = vpop.f32.mrf.mxu1 }
 0x548   :  { %vm3295_vm10 = vcmp.gt.f32.partialorder %v3083_v13, 0.0  ;;  %v3366_v37 = vmul.f32 %v5153_v55, %v3083_v13  ;;  %v2813_v34 = vadd.f32 %v5144_v36, %v5115_v44 }
 0x549   :  { %v5208_v47 = vpop.f32.mrf.mxu0  ;;  %v3085_v57 = vpop.f32.mrf.mxu1 }
 0x54a   :  { %v3430_v56 = vsel %vm3295_vm10, %v3083_v13, %v3366_v37  ;;  %v3086_v63 = vadd.f32 %v3085_v57, %v2797_v18 }
 0x54b   :  { %v2910_v61 = vpop.f32.mrf.mxu0  ;;  %3494 = vst [vmem:[#allocation10 + $0x70] sm:$0xff] %v3430_v56  ;;  %v3087_v1 = vpop.f32.mrf.mxu1 }
 0x54c   :  { %vm3296_vm11 = vcmp.gt.f32.partialorder %v3086_v63, 0.0  ;;  %v3367_v62 = vmul.f32 %v5153_v55, %v3086_v63  ;;  %v2818_v1 = vadd.f32 %v5144_v36, %v5117_v21 }
 0x54d   :  { %v5213_v25 = vpop.f32.mrf.mxu0  ;;  %v3090_v41 = vpop.f32.mrf.mxu1 }
 0x54e   :  { %v3431_v54 = vsel %vm3296_vm11, %v3086_v63, %v3367_v62  ;;  %v3091_v52 = vadd.f32 %v3090_v41, %v2802_v8 }
 0x54f   :  { %v2915_v7 = vpop.f32.mrf.mxu0  ;;  %3495 = vst [vmem:[#allocation10 + $0x78] sm:$0xff] %v3431_v54  ;;  %v3092_v45 = vpop.f32.mrf.mxu1 }
 0x550   :  { %vm3297_vm12 = vcmp.gt.f32.partialorder %v3091_v52, 0.0  ;;  %v3368_v17 = vmul.f32 %v5153_v55, %v3091_v52  ;;  %v2821_v45 = vadd.f32 %v5144_v36, %v5119_v0 }
 0x551   :  { %v5218_v24 = vpop.f32.mrf.mxu0  ;;  %v3093_v28 = vpop.f32.mrf.mxu1 }
 0x552   :  { %v3432_v26 = vsel %vm3297_vm12, %v3091_v52, %v3368_v17  ;;  %v3094_v20 = vadd.f32 %v3093_v28, %v2805_v5 }
 0x553   :  { %v2918_v16 = vpop.f32.mrf.mxu0  ;;  %3496 = vst [vmem:[#allocation10 + $0x80] sm:$0xff] %v3432_v26  ;;  %v3095_v35 = vpop.f32.mrf.mxu1 }
 0x554   :  { %vm3298_vm13 = vcmp.gt.f32.partialorder %v3094_v20, 0.0  ;;  %v3369_v31 = vmul.f32 %v5153_v55, %v3094_v20  ;;  %v2826_v35 = vadd.f32 %v5144_v36, %v5121_v33 }
 0x555   :  { %v5223_v59 = vpop.f32.mrf.mxu0  ;;  %v3098_v12 = vpop.f32.mrf.mxu1 }
 0x556   :  { %v3433_v58 = vsel %vm3298_vm13, %v3094_v20, %v3369_v31  ;;  %v3099_v15 = vadd.f32 %v3098_v12, %v2810_v32 }
 0x557   :  { %v2923_v13 = vpop.f32.mrf.mxu0  ;;  %3497 = vst [vmem:[#allocation10 + $0x88] sm:$0xff] %v3433_v58  ;;  %v3100_v43 = vpop.f32.mrf.mxu1 }
 0x558   :  { %vm3299_vm14 = vcmp.gt.f32.partialorder %v3099_v15, 0.0  ;;  %v3370_v18 = vmul.f32 %v5153_v55, %v3099_v15  ;;  %v2829_v43 = vadd.f32 %v5144_v36, %v5123_v50 }
 0x559   :  { %v5228_v37 = vpop.f32.mrf.mxu0  ;;  %v3101_v10 = vpop.f32.mrf.mxu1 }
 0x55a   :  { %v3434_v57 = vsel %vm3299_vm14, %v3099_v15, %v3370_v18  ;;  %v3102_v56 = vadd.f32 %v3101_v10, %v2813_v34 }
 0x55b   :  { %v2926_v63 = vpop.f32.mrf.mxu0  ;;  %3498 = vst [vmem:[#allocation10 + $0x90] sm:$0xff] %v3434_v57  ;;  %v3103_v61 = vpop.f32.mrf.mxu1 }
 0x55c   :  { %vm3300_vm15 = vcmp.gt.f32.partialorder %v3102_v56, 0.0  ;;  %v3371_v8 = vmul.f32 %v5153_v55, %v3102_v56  ;;  %v2834_v61 = vadd.f32 %v5144_v36, %v5125_v14 }
 0x55d   :  { %v5233_v62 = vpop.f32.mrf.mxu0  ;;  %v3106_v44 = vpop.f32.mrf.mxu1 }
 0x55e   :  { %v3435_v41 = vsel %vm3300_vm15, %v3102_v56, %v3371_v8  ;;  %v3107_v54 = vadd.f32 %v3106_v44, %v2818_v1 }
 0x55f   :  { %v2931_v52 = vpop.f32.mrf.mxu0  ;;  %3499 = vst [vmem:[#allocation10 + $0x98] sm:$0xff] %v3435_v41  ;;  %v3108_v7 = vpop.f32.mrf.mxu1 }
 0x560   :  { %vm3301_vm0 = vcmp.gt.f32.partialorder %v3107_v54, 0.0  ;;  %v3372_v5 = vmul.f32 %v5153_v55, %v3107_v54  ;;  %v2837_v7 = vadd.f32 %v5144_v36, %v5127_v51 }
 0x561   :  { %v5238_v17 = vpop.f32.mrf.mxu0  ;;  %v3109_v21 = vpop.f32.mrf.mxu1 }
 0x562   :  { %v3436_v28 = vsel %vm3301_vm0, %v3107_v54, %v3372_v5  ;;  %v3110_v26 = vadd.f32 %v3109_v21, %v2821_v45 }
 0x563   :  { %v2934_v20 = vpop.f32.mrf.mxu0  ;;  %3500 = vst [vmem:[#allocation10 + $0xa0] sm:$0xff] %v3436_v28  ;;  %v3111_v16 = vpop.f32.mrf.mxu1 }
 0x564   :  { %vm3302_vm1 = vcmp.gt.f32.partialorder %v3110_v26, 0.0  ;;  %v3373_v32 = vmul.f32 %v5153_v55, %v3110_v26  ;;  %v2842_v16 = vadd.f32 %v5144_v36, %v5129_v60 }
 0x565   :  { %v5243_v31 = vpop.f32.mrf.mxu0  ;;  %v3114_v0 = vpop.f32.mrf.mxu1 }
 0x566   :  { %v3437_v12 = vsel %vm3302_vm1, %v3110_v26, %v3373_v32  ;;  %v3115_v58 = vadd.f32 %v3114_v0, %v2826_v35 }
 0x567   :  { %v2939_v15 = vpop.f32.mrf.mxu0  ;;  %3501 = vst [vmem:[#allocation10 + $0xa8] sm:$0xff] %v3437_v12  ;;  %v3116_v13 = vpop.f32.mrf.mxu1 }
 0x568   :  { %vm3303_vm2 = vcmp.gt.f32.partialorder %v3115_v58, 0.0  ;;  %v3374_v34 = vmul.f32 %v5153_v55, %v3115_v58  ;;  %v2845_v13 = vadd.f32 %v5144_v36, %v5131_v22 }
 0x569   :  { %v5248_v18 = vpop.f32.mrf.mxu0  ;;  %v3117_v33 = vpop.f32.mrf.mxu1 }
 0x56a   :  { %v3438_v10 = vsel %vm3303_vm2, %v3115_v58, %v3374_v34  ;;  %v3118_v57 = vadd.f32 %v3117_v33, %v2829_v43 }
 0x56b   :  { %v2942_v56 = vpop.f32.mrf.mxu0  ;;  %3502 = vst [vmem:[#allocation10 + $0xb0] sm:$0xff] %v3438_v10  ;;  %v3119_v63 = vpop.f32.mrf.mxu1 }
 0x56c   :  { %vm3304_vm3 = vcmp.gt.f32.partialorder %v3118_v57, 0.0  ;;  %v3375_v1 = vmul.f32 %v5153_v55, %v3118_v57  ;;  %v2850_v63 = vadd.f32 %v5144_v36, %v5133_v30 }
 0x56d   :  { %v5253_v8 = vpop.f32.mrf.mxu0  ;;  %v3122_v50 = vpop.f32.mrf.mxu1 }
 0x56e   :  { %v3439_v44 = vsel %vm3304_vm3, %v3118_v57, %v3375_v1  ;;  %v3123_v41 = vadd.f32 %v3122_v50, %v2834_v61 }
 0x56f   :  { %v2947_v54 = vpop.f32.mrf.mxu0  ;;  %3503 = vst [vmem:[#allocation10 + $0xb8] sm:$0xff] %v3439_v44  ;;  %v3124_v52 = vpop.f32.mrf.mxu1 }
 0x570   :  { %vm3305_vm4 = vcmp.gt.f32.partialorder %v3123_v41, 0.0  ;;  %v3376_v45 = vmul.f32 %v5153_v55, %v3123_v41  ;;  %v2853_v52 = vadd.f32 %v5144_v36, %v5135_v48 }
 0x571   :  { %v5258_v5 = vpop.f32.mrf.mxu0  ;;  %v3125_v14 = vpop.f32.mrf.mxu1 }
 0x572   :  { %v3440_v21 = vsel %vm3305_vm4, %v3123_v41, %v3376_v45  ;;  %v3126_v28 = vadd.f32 %v3125_v14, %v2837_v7 }
 0x573   :  { %v2950_v26 = vpop.f32.mrf.mxu0  ;;  %3504 = vst [vmem:[#allocation10 + $0xc0] sm:$0xff] %v3440_v21  ;;  %v3127_v20 = vpop.f32.mrf.mxu1 }
 0x574   :  { %vm3306_vm5 = vcmp.gt.f32.partialorder %v3126_v28, 0.0  ;;  %v3377_v35 = vmul.f32 %v5153_v55, %v3126_v28  ;;  %v2858_v20 = vadd.f32 %v5144_v36, %v5137_v53 }
 0x575   :  { %v5263_v32 = vpop.f32.mrf.mxu0  ;;  %v3130_v51 = vpop.f32.mrf.mxu1 }
 0x576   :  { %v3441_v0 = vsel %vm3306_vm5, %v3126_v28, %v3377_v35  ;;  %v3131_v12 = vadd.f32 %v3130_v51, %v2842_v16 }
 0x577   :  { %v2955_v58 = vpop.f32.mrf.mxu0  ;;  %3505 = vst [vmem:[#allocation10 + $0xc8] sm:$0xff] %v3441_v0  ;;  %v3132_v15 = vpop.f32.mrf.mxu1 }
 0x578   :  { %vm3307_vm6 = vcmp.gt.f32.partialorder %v3131_v12, 0.0  ;;  %v3378_v43 = vmul.f32 %v5153_v55, %v3131_v12  ;;  %v2861_v15 = vadd.f32 %v5144_v36, %v5139_v42 }
 0x579   :  { %v5268_v34 = vpop.f32.mrf.mxu0  ;;  %v3133_v60 = vpop.f32.mrf.mxu1 }
 0x57a   :  { %v3442_v33 = vsel %vm3307_vm6, %v3131_v12, %v3378_v43  ;;  %v3134_v10 = vadd.f32 %v3133_v60, %v2845_v13 }
 0x57b   :  { %v2958_v57 = vpop.f32.mrf.mxu0  ;;  %3506 = vst [vmem:[#allocation10 + $0xd0] sm:$0xff] %v3442_v33  ;;  %v3135_v56 = vpop.f32.mrf.mxu1 }
 0x57c   :  { %vm3308_vm7 = vcmp.gt.f32.partialorder %v3134_v10, 0.0  ;;  %v3379_v61 = vmul.f32 %v5153_v55, %v3134_v10  ;;  %v2866_v56 = vadd.f32 %v5144_v36, %v5148_v49 }
 0x57d   :  { %v5273_v1 = vpop.f32.mrf.mxu0  ;;  %v3138_v22 = vpop.f32.mrf.mxu1 }
 0x57e   :  { %v3443_v50 = vsel %vm3308_vm7, %v3134_v10, %v3379_v61  ;;  %v3139_v44 = vadd.f32 %v3138_v22, %v2850_v63 }
 0x57f   :  { %v2963_v41 = vpop.f32.mrf.mxu0  ;;  %3507 = vst [vmem:[#allocation10 + $0xd8] sm:$0xff] %v3443_v50  ;;  %v3140_v54 = vpop.f32.mrf.mxu1 }
 0x580   :  { %vm3309_vm8 = vcmp.gt.f32.partialorder %v3139_v44, 0.0  ;;  %v3380_v7 = vmul.f32 %v5153_v55, %v3139_v44  ;;  %v2869_v54 = vadd.f32 %v5144_v36, %v5158_v39 }
 0x581   :  { %v5278_v45 = vpop.f32.mrf.mxu0  ;;  %v3141_v30 = vpop.f32.mrf.mxu1 }
 0x582   :  { %v3444_v14 = vsel %vm3309_vm8, %v3139_v44, %v3380_v7  ;;  %v3142_v21 = vadd.f32 %v3141_v30, %v2853_v52 }
 0x583   :  { %v2966_v28 = vpop.f32.mrf.mxu0  ;;  %3508 = vst [vmem:[#allocation10 + $0xe0] sm:$0xff] %v3444_v14  ;;  %v3143_v26 = vpop.f32.mrf.mxu1 }
 0x584   :  { %vm3310_vm9 = vcmp.gt.f32.partialorder %v3142_v21, 0.0  ;;  %v3381_v16 = vmul.f32 %v5153_v55, %v3142_v21  ;;  %v2874_v26 = vadd.f32 %v5144_v36, %v5163_v23 }
 0x585   :  { %v5283_v35 = vpop.f32.mrf.mxu0  ;;  %v3146_v48 = vpop.f32.mrf.mxu1 }
 0x586   :  { %v3445_v51 = vsel %vm3310_vm9, %v3142_v21, %v3381_v16  ;;  %v3147_v0 = vadd.f32 %v3146_v48, %v2858_v20 }
 0x587   :  { %v2971_v12 = vpop.f32.mrf.mxu0  ;;  %3509 = vst [vmem:[#allocation10 + $0xe8] sm:$0xff] %v3445_v51  ;;  %v3148_v58 = vpop.f32.mrf.mxu1 }
 0x588   :  { %vm3311_vm10 = vcmp.gt.f32.partialorder %v3147_v0, 0.0  ;;  %v3382_v13 = vmul.f32 %v5153_v55, %v3147_v0  ;;  %v2877_v58 = vadd.f32 %v5144_v36, %v5168_v6 }
 0x589   :  { %v5288_v43 = vpop.f32.mrf.mxu0  ;;  %v3149_v53 = vpop.f32.mrf.mxu1 }
 0x58a   :  { %v3446_v60 = vsel %vm3311_vm10, %v3147_v0, %v3382_v13  ;;  %v3150_v33 = vadd.f32 %v3149_v53, %v2861_v15 }
 0x58b   :  { %v2974_v10 = vpop.f32.mrf.mxu0  ;;  %3510 = vst [vmem:[#allocation10 + $0xf0] sm:$0xff] %v3446_v60  ;;  %v3151_v57 = vpop.f32.mrf.mxu1 }
 0x58c   :  { %vm3312_vm11 = vcmp.gt.f32.partialorder %v3150_v33, 0.0  ;;  %v3383_v63 = vmul.f32 %v5153_v55, %v3150_v33  ;;  %v2738_v57 = vadd.f32 %v5144_v36, %v5077_v46 }
 0x58d   :  { %v5293_v61 = vpop.f32.mrf.mxu0  ;;  %v3154_v42 = vpop.f32.mrf.mxu1 }
 0x58e   :  { %v3447_v22 = vsel %vm3312_vm11, %v3150_v33, %v3383_v63  ;;  %v3155_v50 = vadd.f32 %v3154_v42, %v2866_v56  ;;  %v2882_v56 = vadd.f32 %v5144_v36, %v5173_v2 }
 0x58f   :  { %v2979_v44 = vpop.f32.mrf.mxu0  ;;  %3511 = vst [vmem:[#allocation10 + $0xf8] sm:$0xff] %v3447_v22  ;;  %v3156_v41 = vpop.f32.mrf.mxu1 }
 0x590   :  { %vm3313_vm12 = vcmp.gt.f32.partialorder %v3155_v50, 0.0  ;;  %v3384_v52 = vmul.f32 %v5153_v55, %v3155_v50  ;;  %v2741_v41 = vadd.f32 %v5144_v36, %v5079_v38  ;;  %v2746_v38 = vadd.f32 %v5144_v36, %v5081_v9 }
 0x591   :  { %v5298_v7 = vpop.f32.mrf.mxu0  ;;  %v3157_v49 = vpop.f32.mrf.mxu1  ;;  %v2749_v9 = vadd.f32 %v5144_v36, %v5083_v4  ;;  %v2898_v4 = vadd.f32 %v5144_v36, %v5193_v3  ;;  %v2901_v3 = vadd.f32 %v5144_v36, %v5198_v29  ;;  %v2909_v29 = vadd.f32 %v5144_v36, %v5208_v47 }
 0x592   :  { %v3448_v30 = vsel %vm3313_vm12, %v3155_v50, %v3384_v52  ;;  %v3158_v14 = vadd.f32 %v3157_v49, %v2869_v54  ;;  %v2885_v54 = vadd.f32 %v5144_v36, %v5178_v11  ;;  %v2890_v11 = vadd.f32 %v5144_v36, %v5183_v19 }
 0x593   :  { %v2982_v21 = vpop.f32.mrf.mxu0  ;;  %3512 = vst [vmem:[#allocation10 + $0x100] sm:$0xff] %v3448_v30  ;;  %v3159_v28 = vpop.f32.mrf.mxu1  ;;  %v2893_v19 = vadd.f32 %v5144_v36, %v5188_v40  ;;  %v2917_v47 = vadd.f32 %v5144_v36, %v5218_v24  ;;  %v2925_v24 = vadd.f32 %v5144_v36, %v5228_v37  ;;  %v2933_v37 = vadd.f32 %v5144_v36, %v5238_v17 }
 0x594   :  { %vm3314_vm13 = vcmp.gt.f32.partialorder %v3158_v14, 0.0  ;;  %v3385_v20 = vmul.f32 %v5153_v55, %v3158_v14  ;;  %v2941_v17 = vadd.f32 %v5144_v36, %v5248_v18  ;;  %v2949_v18 = vadd.f32 %v5144_v36, %v5258_v5  ;;  %v5382_v5 = vld [vmem:[%s5426_s6] ss:$0 sm:$0xff]  ;;  %s4516_s6 = smov [#allocation10]  }
 0x595   :  { %v5303_v16 = vpop.f32.mrf.mxu0  ;;  %v3162_v39 = vpop.f32.mrf.mxu1 }
 0x596   :  { %v3449_v48 = vsel %vm3314_vm13, %v3158_v14, %v3385_v20  ;;  %v3163_v51 = vadd.f32 %v3162_v39, %v2874_v26 }
 0x597   :  { %v2987_v0 = vpop.f32.mrf.mxu0  ;;  %3513 = vst [vmem:[#allocation10 + $0x108] sm:$0xff] %v3449_v48  ;;  %v3164_v12 = vpop.f32.mrf.mxu1 }
 0x598   :  { %vm3315_vm14 = vcmp.gt.f32.partialorder %v3163_v51, 0.0  ;;  %v3386_v15 = vmul.f32 %v5153_v55, %v3163_v51 }
 0x599   :  { %v5308_v13 = vpop.f32.mrf.mxu0  ;;  %v3165_v23 = vpop.f32.mrf.mxu1 }
 0x59a   :  { %v3450_v53 = vsel %vm3315_vm14, %v3163_v51, %v3386_v15  ;;  %v3166_v60 = vadd.f32 %v3165_v23, %v2877_v58 }
 0x59b   :  { %v2990_v33 = vpop.f32.mrf.mxu0  ;;  %3514 = vst [vmem:[#allocation10 + $0x110] sm:$0xff] %v3450_v53  ;;  %v3167_v10 = vpop.f32.mrf.mxu1 }
 0x59c   :  { %vm3316_vm15 = vcmp.gt.f32.partialorder %v3166_v60, 0.0  ;;  %v3387_v6 = vmul.f32 %v5153_v55, %v3166_v60 }
 0x59d   :  { %v3026_v63 = vpop.f32.mrf.mxu0  ;;  %v3170_v42 = vpop.f32.mrf.mxu1 }
 0x59e   :  { %v3027_v22 = vadd.f32 %v3026_v63, %v2738_v57  ;;  %v3451_v50 = vsel %vm3316_vm15, %v3166_v60, %v3387_v6  ;;  %v3171_v44 = vadd.f32 %v3170_v42, %v2882_v56 }
 0x59f   :  { %v3028_v52 = vpop.f32.mrf.mxu0  ;;  %3515 = vst [vmem:[#allocation10 + $0x118] sm:$0xff] %v3451_v50  ;;  %v3172_v46 = vpop.f32.mrf.mxu1 }
 0x5a0   :  { %vm3281_vm0 = vcmp.gt.f32.partialorder %v3027_v22, 0.0  ;;  %v3352_v2 = vmul.f32 %v5153_v55, %v3027_v22  ;;  %vm3317_vm1 = vcmp.gt.f32.partialorder %v3171_v44, 0.0  ;;  %v3388_v49 = vmul.f32 %v5153_v55, %v3171_v44 }
 0x5a1   :  { %v3029_v30 = vpop.f32.mrf.mxu0  ;;  %v3173_v14 = vpop.f32.mrf.mxu1 }
 0x5a2   :  { %v3416_v21 = vsel %vm3281_vm0, %v3027_v22, %v3352_v2  ;;  %v3030_v28 = vadd.f32 %v3029_v30, %v2741_v41  ;;  %v3452_v26 = vsel %vm3317_vm1, %v3171_v44, %v3388_v49  ;;  %v3174_v20 = vadd.f32 %v3173_v14, %v2885_v54 }
 0x5a3   :  { %3480 = vst [vmem:[#allocation10] sm:$0xff] %v3416_v21  ;;  %v3031_v39 = vpop.f32.mrf.mxu0  ;;  %3516 = vst [vmem:[#allocation10 + $0x120] sm:$0xff] %v3452_v26  ;;  %v3175_v48 = vpop.f32.mrf.mxu1 }
 0x5a4   :  { %vm3282_vm2 = vcmp.gt.f32.partialorder %v3030_v28, 0.0  ;;  %v3353_v51 = vmul.f32 %v5153_v55, %v3030_v28  ;;  %vm3318_vm3 = vcmp.gt.f32.partialorder %v3174_v20, 0.0  ;;  %v3389_v0 = vmul.f32 %v5153_v55, %v3174_v20 }
 0x5a5   :  { %v3034_v12 = vpop.f32.mrf.mxu0  ;;  %v3178_v58 = vpop.f32.mrf.mxu1 }
 0x5a6   :  { %v3417_v15 = vsel %vm3282_vm2, %v3030_v28, %v3353_v51  ;;  %v3035_v23 = vadd.f32 %v3034_v12, %v2746_v38  ;;  %v3453_v53 = vsel %vm3318_vm3, %v3174_v20, %v3389_v0  ;;  %v3179_v60 = vadd.f32 %v3178_v58, %v2890_v11 }
 0x5a7   :  { %3481 = vst [vmem:[#allocation10 + $0x8] sm:$0xff] %v3417_v15  ;;  %v3036_v33 = vpop.f32.mrf.mxu0  ;;  %3517 = vst [vmem:[#allocation10 + $0x128] sm:$0xff] %v3453_v53  ;;  %v3180_v10 = vpop.f32.mrf.mxu1  ;;  %v2906_v11 = vadd.f32 %v5144_v36, %v5203_v27  ;;  %v2914_v27 = vadd.f32 %v5144_v36, %v5213_v25  ;;  %v2922_v25 = vadd.f32 %v5144_v36, %v5223_v59 }
 0x5a8   :  { %vm3283_vm4 = vcmp.gt.f32.partialorder %v3035_v23, 0.0  ;;  %v3354_v57 = vmul.f32 %v5153_v55, %v3035_v23  ;;  %vm3319_vm5 = vcmp.gt.f32.partialorder %v3179_v60, 0.0  ;;  %v3390_v56 = vmul.f32 %v5153_v55, %v3179_v60 }
 0x5a9   :  { %v3037_v6 = vpop.f32.mrf.mxu0  ;;  %v3181_v63 = vpop.f32.mrf.mxu1  ;;  %v2930_v59 = vadd.f32 %v5144_v36, %v5233_v62  ;;  %v2938_v62 = vadd.f32 %v5144_v36, %v5243_v31  ;;  %v2946_v31 = vadd.f32 %v5144_v36, %v5253_v8  ;;  %v2954_v8 = vadd.f32 %v5144_v36, %v5263_v32 }
 0x5aa   :  { %v3418_v42 = vsel %vm3283_vm4, %v3035_v23, %v3354_v57  ;;  %v3038_v22 = vadd.f32 %v3037_v6, %v2749_v9  ;;  %v3454_v50 = vsel %vm3319_vm5, %v3179_v60, %v3390_v56  ;;  %v3182_v44 = vadd.f32 %v3181_v63, %v2893_v19 }
 0x5ab   :  { %3482 = vst [vmem:[#allocation10 + $0x10] sm:$0xff] %v3418_v42  ;;  %3518 = vst [vmem:[#allocation10 + $0x130] sm:$0xff] %v3454_v50  ;;  %v3183_v40 = vpop.f32.mrf.mxu1  ;;  %v3039_v41 = vpop.f32.mrf.mxu0 }
 0x5ac   :  { %vm3284_vm6 = vcmp.gt.f32.partialorder %v3038_v22, 0.0  ;;  %v3355_v54 = vmul.f32 %v5153_v55, %v3038_v22  ;;  %vm3320_vm7 = vcmp.gt.f32.partialorder %v3182_v44, 0.0  ;;  %v3391_v52 = vmul.f32 %v5153_v55, %v3182_v44 }
 0x5ad   :  { %v3186_v46 = vpop.f32.mrf.mxu1 }
 0x5ae   :  { %v3419_v2 = vsel %vm3284_vm6, %v3038_v22, %v3355_v54  ;;  %v3455_v49 = vsel %vm3320_vm7, %v3182_v44, %v3391_v52  ;;  %v3187_v30 = vadd.f32 %v3186_v46, %v2898_v4 }
 0x5af   :  { %3483 = vst [vmem:[#allocation10 + $0x18] sm:$0xff] %v3419_v2  ;;  %3519 = vst [vmem:[#allocation10 + $0x138] sm:$0xff] %v3455_v49  ;;  %v3188_v14 = vpop.f32.mrf.mxu1 }
 0x5b0   :  { %vm3321_vm8 = vcmp.gt.f32.partialorder %v3187_v30, 0.0  ;;  %v3392_v21 = vmul.f32 %v5153_v55, %v3187_v30 }
 0x5b1   :  { %v3189_v28 = vpop.f32.mrf.mxu1 }
 0x5b2   :  { %v3456_v26 = vsel %vm3321_vm8, %v3187_v30, %v3392_v21  ;;  %v3190_v20 = vadd.f32 %v3189_v28, %v2901_v3 }
 0x5b3   :  { %3520 = vst [vmem:[#allocation10 + $0x140] sm:$0xff] %v3456_v26  ;;  %v3191_v38 = vpop.f32.mrf.mxu1 }
 0x5b4   :  { %vm3322_vm9 = vcmp.gt.f32.partialorder %v3190_v20, 0.0  ;;  %v3393_v39 = vmul.f32 %v5153_v55, %v3190_v20 }
 0x5b5   :  { %v3194_v48 = vpop.f32.mrf.mxu1 }
 0x5b6   :  { %v3457_v51 = vsel %vm3322_vm9, %v3190_v20, %v3393_v39  ;;  %v3195_v0 = vadd.f32 %v3194_v48, %v2906_v11 }
 0x5b7   :  { %3521 = vst [vmem:[#allocation10 + $0x148] sm:$0xff] %v3457_v51  ;;  %v3196_v12 = vpop.f32.mrf.mxu1 }
 0x5b8   :  { %vm3323_vm10 = vcmp.gt.f32.partialorder %v3195_v0, 0.0  ;;  %v3394_v58 = vmul.f32 %v5153_v55, %v3195_v0 }
 0x5b9   :  { %v3197_v15 = vpop.f32.mrf.mxu1 }
 0x5ba   :  { %v3458_v23 = vsel %vm3323_vm10, %v3195_v0, %v3394_v58  ;;  %v3198_v53 = vadd.f32 %v3197_v15, %v2909_v29 }
 0x5bb   :  { %3522 = vst [vmem:[#allocation10 + $0x150] sm:$0xff] %v3458_v23  ;;  %v3199_v60 = vpop.f32.mrf.mxu1 }
 0x5bc   :  { %vm3324_vm11 = vcmp.gt.f32.partialorder %v3198_v53, 0.0  ;;  %v3395_v9 = vmul.f32 %v5153_v55, %v3198_v53 }
 0x5bd   :  { %v3202_v19 = vpop.f32.mrf.mxu1 }
 0x5be   :  { %v3459_v33 = vsel %vm3324_vm11, %v3198_v53, %v3395_v9  ;;  %v3203_v10 = vadd.f32 %v3202_v19, %v2914_v27 }
 0x5bf   :  { %3523 = vst [vmem:[#allocation10 + $0x158] sm:$0xff] %v3459_v33  ;;  %v3204_v57 = vpop.f32.mrf.mxu1 }
 0x5c0   :  { %vm3325_vm12 = vcmp.gt.f32.partialorder %v3203_v10, 0.0  ;;  %v3396_v56 = vmul.f32 %v5153_v55, %v3203_v10 }
 0x5c1   :  { %v3205_v6 = vpop.f32.mrf.mxu1 }
 0x5c2   :  { %v3460_v63 = vsel %vm3325_vm12, %v3203_v10, %v3396_v56  ;;  %v3206_v42 = vadd.f32 %v3205_v6, %v2917_v47 }
 0x5c3   :  { %3524 = vst [vmem:[#allocation10 + $0x160] sm:$0xff] %v3460_v63  ;;  %v3207_v22 = vpop.f32.mrf.mxu1 }
 0x5c4   :  { %vm3326_vm13 = vcmp.gt.f32.partialorder %v3206_v42, 0.0  ;;  %v3397_v50 = vmul.f32 %v5153_v55, %v3206_v42 }
 0x5c5   :  { %v3210_v44 = vpop.f32.mrf.mxu1 }
 0x5c6   :  { %v3461_v4 = vsel %vm3326_vm13, %v3206_v42, %v3397_v50  ;;  %v3211_v40 = vadd.f32 %v3210_v44, %v2922_v25 }
 0x5c7   :  { %3525 = vst [vmem:[#allocation10 + $0x168] sm:$0xff] %v3461_v4  ;;  %v3212_v41 = vpop.f32.mrf.mxu1  ;;  %v2957_v4 = vadd.f32 %v5382_v5, %v5268_v34 }
 0x5c8   :  { %vm3327_vm14 = vcmp.gt.f32.partialorder %v3211_v40, 0.0  ;;  %v3398_v54 = vmul.f32 %v5153_v55, %v3211_v40 }
 0x5c9   :  { %v3213_v52 = vpop.f32.mrf.mxu1 }
 0x5ca   :  { %v3462_v46 = vsel %vm3327_vm14, %v3211_v40, %v3398_v54  ;;  %v3214_v2 = vadd.f32 %v3213_v52, %v2925_v24  ;;  %v2962_v54 = vadd.f32 %v5382_v5, %v5273_v1  ;;  %v5392_v52 = vld [vmem:[%s5427_s7] ss:$0 sm:$0xff]  ;;  %s3549_s7 = sshll.u32 %s4516_s6, 4  ;;  %s3550_s7 = int_to_ptr.vmem [resolvable:$true] %s3549_s7 }
 0x5cb   :  { %3526 = vst [vmem:[#allocation10 + $0x170] sm:$0xff] %v3462_v46  ;;  %v3215_v49 = vpop.f32.mrf.mxu1  ;;  %s4479_s17 = scalar_lea.vmem %s3550_s7, 8192  ;;  %p4484_p7 = scmp.lt.s32.totalorder %s3550_s7, %s3550_s7 }
 0x5cc   :  { %vm3328_vm15 = vcmp.gt.f32.partialorder %v3214_v2, 0.0  ;;  %v3399_v30 = vmul.f32 %v5153_v55, %v3214_v2  ;;  %p4480_p6 = scmp.ne.s32.totalorder %s3550_s7, %s4479_s17  ;;  %p4485_p8 = scmp.lt.s32.totalorder %s4479_s17, %s4479_s17 }
 0x5cd   :  { %v3218_v14 = vpop.f32.mrf.mxu1 }
 0x5ce   :  { %v3463_v3 = vsel %vm3328_vm15, %v3214_v2, %v3399_v30  ;;  %v3219_v21 = vadd.f32 %v3218_v14, %v2930_v59  ;;  %v2965_v59 = vadd.f32 %v5382_v5, %v5278_v45  ;;  %v2973_v45 = vadd.f32 %v5382_v5, %v5288_v43  ;;  %p4486_p9 = por %p4485_p8, %p4484_p7 }
 0x5cf   :  { %3527 = vst [vmem:[#allocation10 + $0x178] sm:$0xff] %v3463_v3  ;;  %v3220_v28 = vpop.f32.mrf.mxu1  ;;  %v2981_v43 = vadd.f32 %v5382_v5, %v5298_v7  ;;  %v2989_v7 = vadd.f32 %v5382_v5, %v5308_v13 }
 0x5d0   :  { %vm3329_vm0 = vcmp.gt.f32.partialorder %v3219_v21, 0.0  ;;  %v3400_v26 = vmul.f32 %v5153_v55, %v3219_v21  ;;  %v2970_v28 = vadd.f32 %v5382_v5, %v5283_v35  ;;  %v2978_v35 = vadd.f32 %v5382_v5, %v5293_v61  ;;  %p4487_p10 = pnand %p4486_p9, %p4480_p6 }
 0x5d1   :  { %v3221_v20 = vpop.f32.mrf.mxu1  ;;  %v2986_v61 = vadd.f32 %v5382_v5, %v5303_v16 }
 0x5d2   :  { %v3464_v38 = vsel %vm3329_vm0, %v3219_v21, %v3400_v26  ;;  %v3222_v11 = vadd.f32 %v3221_v20, %v2933_v37 }
 0x5d3   :  { %3528 = vst [vmem:[#allocation10 + $0x180] sm:$0xff] %v3464_v38  ;;  %v3223_v39 = vpop.f32.mrf.mxu1 }
 0x5d4   :  { %vm3330_vm1 = vcmp.gt.f32.partialorder %v3222_v11, 0.0  ;;  %v3401_v48 = vmul.f32 %v5153_v55, %v3222_v11 }
 0x5d5   :  { %v3226_v51 = vpop.f32.mrf.mxu1 }
 0x5d6   :  { %v3465_v0 = vsel %vm3330_vm1, %v3222_v11, %v3401_v48  ;;  %v3227_v12 = vadd.f32 %v3226_v51, %v2938_v62 }
 0x5d7   :  { %3529 = vst [vmem:[#allocation10 + $0x188] sm:$0xff] %v3465_v0  ;;  %v3228_v29 = vpop.f32.mrf.mxu1 }
 0x5d8   :  { %vm3331_vm2 = vcmp.gt.f32.partialorder %v3227_v12, 0.0  ;;  %v3402_v58 = vmul.f32 %v5153_v55, %v3227_v12 }
 0x5d9   :  { %v3229_v15 = vpop.f32.mrf.mxu1 }
 0x5da   :  { %v3466_v23 = vsel %vm3331_vm2, %v3227_v12, %v3402_v58  ;;  %v3230_v53 = vadd.f32 %v3229_v15, %v2941_v17 }
 0x5db   :  { %3530 = vst [vmem:[#allocation10 + $0x190] sm:$0xff] %v3466_v23  ;;  %v3231_v60 = vpop.f32.mrf.mxu1 }
 0x5dc   :  { %vm3332_vm3 = vcmp.gt.f32.partialorder %v3230_v53, 0.0  ;;  %v3403_v27 = vmul.f32 %v5153_v55, %v3230_v53 }
 0x5dd   :  { %v3234_v9 = vpop.f32.mrf.mxu1 }
 0x5de   :  { %v3467_v19 = vsel %vm3332_vm3, %v3230_v53, %v3403_v27  ;;  %v3235_v33 = vadd.f32 %v3234_v9, %v2946_v31 }
 0x5df   :  { %3531 = vst [vmem:[#allocation10 + $0x198] sm:$0xff] %v3467_v19  ;;  %v3236_v10 = vpop.f32.mrf.mxu1 }
 0x5e0   :  { %vm3333_vm4 = vcmp.gt.f32.partialorder %v3235_v33, 0.0  ;;  %v3404_v57 = vmul.f32 %v5153_v55, %v3235_v33 }
 0x5e1   :  { %v3237_v47 = vpop.f32.mrf.mxu1 }
 0x5e2   :  { %v3468_v56 = vsel %vm3333_vm4, %v3235_v33, %v3404_v57  ;;  %v3238_v6 = vadd.f32 %v3237_v47, %v2949_v18 }
 0x5e3   :  { %3532 = vst [vmem:[#allocation10 + $0x1a0] sm:$0xff] %v3468_v56  ;;  %v3239_v63 = vpop.f32.mrf.mxu1 }
 0x5e4   :  { %vm3334_vm5 = vcmp.gt.f32.partialorder %v3238_v6, 0.0  ;;  %v3405_v42 = vmul.f32 %v5153_v55, %v3238_v6 }
 0x5e5   :  { %v3242_v22 = vpop.f32.mrf.mxu1 }
 0x5e6   :  { %v3469_v25 = vsel %vm3334_vm5, %v3238_v6, %v3405_v42  ;;  %v3243_v50 = vadd.f32 %v3242_v22, %v2954_v8 }
 0x5e7   :  { %3533 = vst [vmem:[#allocation10 + $0x1a8] sm:$0xff] %v3469_v25  ;;  %v3244_v44 = vpop.f32.mrf.mxu1 }
 0x5e8   :  { %vm3335_vm6 = vcmp.gt.f32.partialorder %v3243_v50, 0.0  ;;  %v3406_v40 = vmul.f32 %v5153_v55, %v3243_v50 }
 0x5e9   :  { %v3245_v36 = vpop.f32.mrf.mxu1 }
 0x5ea   :  { %v3470_v32 = vsel %vm3335_vm6, %v3243_v50, %v3406_v40  ;;  %v3246_v41 = vadd.f32 %v3245_v36, %v2957_v4 }
 0x5eb   :  { %3534 = vst [vmem:[#allocation10 + $0x1b0] sm:$0xff] %v3470_v32  ;;  %v3247_v24 = vpop.f32.mrf.mxu1 }
 0x5ec   :  { %vm3336_vm7 = vcmp.gt.f32.partialorder %v3246_v41, 0.0  ;;  %v3407_v46 = vmul.f32 %v5392_v52, %v3246_v41 }
 0x5ed   :  { %v3250_v34 = vpop.f32.mrf.mxu1 }
 0x5ee   :  { %v3471_v2 = vsel %vm3336_vm7, %v3246_v41, %v3407_v46  ;;  %v3251_v49 = vadd.f32 %v3250_v34, %v2962_v54 }
 0x5ef   :  { %3535 = vst [vmem:[#allocation10 + $0x1b8] sm:$0xff] %v3471_v2  ;;  %v3252_v55 = vpop.f32.mrf.mxu1 }
 0x5f0   :  { %vm3337_vm8 = vcmp.gt.f32.partialorder %v3251_v49, 0.0  ;;  %v3408_v30 = vmul.f32 %v5392_v52, %v3251_v49 }
 0x5f1   :  { %v3253_v1 = vpop.f32.mrf.mxu1 }
 0x5f2   :  { %v3472_v14 = vsel %vm3337_vm8, %v3251_v49, %v3408_v30  ;;  %v3254_v3 = vadd.f32 %v3253_v1, %v2965_v59 }
 0x5f3   :  { %3536 = vst [vmem:[#allocation10 + $0x1c0] sm:$0xff] %v3472_v14  ;;  %v3255_v21 = vpop.f32.mrf.mxu1 }
 0x5f4   :  { %vm3338_vm9 = vcmp.gt.f32.partialorder %v3254_v3, 0.0  ;;  %v3409_v37 = vmul.f32 %v5392_v52, %v3254_v3 }
 0x5f5   :  { %v3258_v26 = vpop.f32.mrf.mxu1 }
 0x5f6   :  { %v3473_v20 = vsel %vm3338_vm9, %v3254_v3, %v3409_v37  ;;  %v3259_v38 = vadd.f32 %v3258_v26, %v2970_v28 }
 0x5f7   :  { %3537 = vst [vmem:[#allocation10 + $0x1c8] sm:$0xff] %v3473_v20  ;;  %v3260_v11 = vpop.f32.mrf.mxu1 }
 0x5f8   :  { %vm3339_vm10 = vcmp.gt.f32.partialorder %v3259_v38, 0.0  ;;  %v3410_v39 = vmul.f32 %v5392_v52, %v3259_v38 }
 0x5f9   :  { %v3261_v62 = vpop.f32.mrf.mxu1 }
 0x5fa   :  { %v3474_v48 = vsel %vm3339_vm10, %v3259_v38, %v3410_v39  ;;  %v3262_v51 = vadd.f32 %v3261_v62, %v2973_v45 }
 0x5fb   :  { %3538 = vst [vmem:[#allocation10 + $0x1d0] sm:$0xff] %v3474_v48  ;;  %v3263_v0 = vpop.f32.mrf.mxu1 }
 0x5fc   :  { %vm3340_vm11 = vcmp.gt.f32.partialorder %v3262_v51, 0.0  ;;  %v3411_v12 = vmul.f32 %v5392_v52, %v3262_v51 }
 0x5fd   :  { %v3266_v29 = vpop.f32.mrf.mxu1 }
 0x5fe   :  { %v3475_v17 = vsel %vm3340_vm11, %v3262_v51, %v3411_v12  ;;  %v3267_v58 = vadd.f32 %v3266_v29, %v2978_v35 }
 0x5ff   :  { %3539 = vst [vmem:[#allocation10 + $0x1d8] sm:$0xff] %v3475_v17  ;;  %v3268_v15 = vpop.f32.mrf.mxu1 }
 0x600   :  { %vm3341_vm12 = vcmp.gt.f32.partialorder %v3267_v58, 0.0  ;;  %v3412_v23 = vmul.f32 %v5392_v52, %v3267_v58 }
 0x601   :  { %v3269_v53 = vpop.f32.mrf.mxu1 }
 0x602   :  { %v3476_v60 = vsel %vm3341_vm12, %v3267_v58, %v3412_v23  ;;  %v3270_v31 = vadd.f32 %v3269_v53, %v2981_v43 }
 0x603   :  { %3540 = vst [vmem:[#allocation10 + $0x1e0] sm:$0xff] %v3476_v60  ;;  %v3271_v27 = vpop.f32.mrf.mxu1 }
 0x604   :  { %vm3342_vm13 = vcmp.gt.f32.partialorder %v3270_v31, 0.0  ;;  %v3413_v9 = vmul.f32 %v5392_v52, %v3270_v31 }
 0x605   :  { %v3274_v19 = vpop.f32.mrf.mxu1 }
 0x606   :  { %v3477_v33 = vsel %vm3342_vm13, %v3270_v31, %v3413_v9  ;;  %v3275_v10 = vadd.f32 %v3274_v19, %v2986_v61 }
 0x607   :  { %3541 = vst [vmem:[#allocation10 + $0x1e8] sm:$0xff] %v3477_v33  ;;  %v3276_v18 = vpop.f32.mrf.mxu1 }
 0x608   :  { %vm3343_vm14 = vcmp.gt.f32.partialorder %v3275_v10, 0.0  ;;  %v3414_v57 = vmul.f32 %v5392_v52, %v3275_v10 }
 0x609   :  { %v3277_v47 = vpop.f32.mrf.mxu1 }
 0x60a   :  { %v3478_v56 = vsel %vm3343_vm14, %v3275_v10, %v3414_v57  ;;  %v3278_v6 = vadd.f32 %v3277_v47, %v2989_v7 }
 0x60b   :  { %3542 = vst [vmem:[#allocation10 + $0x1f0] sm:$0xff] %v3478_v56  ;;  %v3279_v16 = vpop.f32.mrf.mxu1 }
 0x60c   :  { %vm3344_vm15 = vcmp.gt.f32.partialorder %v3278_v6, 0.0  ;;  %v3415_v63 = vmul.f32 %v5392_v52, %v3278_v6 }
 0x60e   :  { %v3479_v8 = vsel %vm3344_vm15, %v3278_v6, %v3415_v63 }
 0x60f   :  { %3543 = vst [vmem:[#allocation10 + $0x1f8] sm:$0xff] %v3479_v8 }
 0x610   :  { %4490 = shalt.err (!%p4487_p10)
}
 0x611   :  { %s4517_s18 = smov 128   ;;  %s4518_s19 = smov 8  }
 0x612   :  { %3555 = dma.vmem_to_hbm [thread:$0]  %s3550_s7, 8192, %s5428_s8, [#allocation4], %s4517_s18, %s4517_s18, %s4518_s19  }
 0x613   :  { %4505 = dma.done.wait [#allocation4], 8192  }
 0x614   :  { %4506 = vsyncadd [#allocation4], 4294959104 }
 0x615   :  { %3559 = vsyncpa [#allocation3], 1 }
 0x616   :  { %3560 = vsyncpa [#allocation6], 1 }
 0x617   :  { %3561 = vsyncpa [#allocation9], 1 }
 0x618   :  { %3562 = vsyncpa [#allocation4], 1 }

</bundles_post_ra>
